<compile_context>
chip_gen: v7x
topology: tpu7x:2x2x1
jax: 0.10.0
libtpu: 0.0.40
codegen_flags: <defaults>
</compile_context>

<pallas_src>
import math

import jax
import jax.numpy as jnp
from jax.experimental import pallas as pl
from jax.experimental.pallas import tpu as pltpu

X_DIM = 28 ** 2   # 784  (multiple of 8/16; used unpadded as a full-dim block)
H_DIM = 1000
Z_DIM = 2

HP = 1024   # hidden 1000 -> 1024 (lane-dense)
ZP = 128    # output 2    -> 128  (lane-dense stores, no masked tail)


def qnet_kernel(x_ref, w1_ref, s1_ref, b1_ref, w2_ref, s2_ref, b2_ref,
                w3_ref, s3_ref, b3_ref, o_ref):
    # Fused 3-layer MLP. int8 weights -> bf16 dequant on VPU (DMA-bound, so
    # free), bf16 MXU inputs, f32 accumulation, per-channel f32 scale + bias.
    x = x_ref[...]                                              # bf16 [TM, 784]

    w1 = w1_ref[...].astype(jnp.bfloat16)                       # int8 -> bf16 (exact)
    h1 = jnp.dot(x, w1, preferred_element_type=jnp.float32)
    h1 = jnp.maximum(h1 * s1_ref[...] + b1_ref[...], 0.0)       # dropout = id (eval)

    w2 = w2_ref[...].astype(jnp.bfloat16)
    h2 = jnp.dot(h1.astype(jnp.bfloat16), w2,
                 preferred_element_type=jnp.float32)
    h2 = jnp.maximum(h2 * s2_ref[...] + b2_ref[...], 0.0)

    w3 = w3_ref[...].astype(jnp.bfloat16)
    out = jnp.dot(h2.astype(jnp.bfloat16), w3,
                  preferred_element_type=jnp.float32)
    o_ref[...] = (out * s3_ref[...] + b3_ref[...]).astype(o_ref.dtype)


def _pad_to(a, shape):
    pads = [(0, t - s) for s, t in zip(a.shape, shape)]
    return jnp.pad(a, pads)


def _quant_int8_per_col(w):
    """Symmetric per-output-channel int8 quantization of [in, out] weights.

    Zero (padded) columns get scale 1.0 so they quantize exactly to 0 and the
    zero-padding identity is preserved.
    """
    amax = jnp.max(jnp.abs(w), axis=0, keepdims=True)
    scale = jnp.where(amax > 0, amax / 127.0, 1.0).astype(jnp.float32)
    q = jnp.round(w / scale).astype(jnp.int8)
    return q, scale


def q_net_forward(x, params, *, tm=512):
    """x: [B, X_DIM] float32. Returns [B, Z_DIM] float32."""
    w1, b1, w2, b2, w3, b3 = params
    B = x.shape[0]

    # ---- param prep: lane-dense zero padding, int8 weights + f32 scales,
    #      f32 biases. (In practice this would be done once, offline.)
    w1q, s1 = _quant_int8_per_col(_pad_to(w1, (X_DIM, HP)))   # (784, 1024) i8
    w2q, s2 = _quant_int8_per_col(_pad_to(w2, (HP, HP)))      # (1024,1024) i8
    w3q, s3 = _quant_int8_per_col(_pad_to(w3, (HP, ZP)))      # (1024, 128) i8
    b1p = _pad_to(b1, (1, HP))
    b2p = _pad_to(b2, (1, HP))
    b3p = _pad_to(b3, (1, ZP))

    # ---- batch tiling: TM rows per grid step (multiple of 16 for bf16
    #      sublane packing); weights/scales/biases resident across steps.
    TM = min(tm, max(16, ((B + 15) // 16) * 16))
    Bp = ((B + TM - 1) // TM) * TM
    xp = _pad_to(x, (Bp, X_DIM)).astype(jnp.bfloat16)
    n_b = Bp // TM

    # Megacore split only pays off when each TensorCore gets >=2 steps of work;
    # otherwise it just duplicates the resident weight DMA (v7x has 2 TCs).
    dim_sem = ("parallel",) if n_b >= 4 else ("arbitrary",)

    const = lambda i: (0, 0)   # resident operands: same block every step

    out = pl.pallas_call(
        qnet_kernel,
        out_shape=jax.ShapeDtypeStruct((Bp, ZP), jnp.float32),
        grid=(n_b,),
        in_specs=[
            pl.BlockSpec((TM, X_DIM), lambda i: (i, 0)),   # x tile (pipelined)
            pl.BlockSpec((X_DIM, HP), const),              # w1 (int8)
            pl.BlockSpec((1, HP), const),                  # s1
            pl.BlockSpec((1, HP), const),                  # b1
            pl.BlockSpec((HP, HP), const),                 # w2 (int8)
            pl.BlockSpec((1, HP), const),                  # s2
            pl.BlockSpec((1, HP), const),                  # b2
            pl.BlockSpec((HP, ZP), const),                 # w3 (int8)
            pl.BlockSpec((1, ZP), const),                  # s3
            pl.BlockSpec((1, ZP), const),                  # b3
        ],
        out_specs=pl.BlockSpec((TM, ZP), lambda i: (i, 0)),
        compiler_params=pltpu.CompilerParams(
            dimension_semantics=dim_sem,
            vmem_limit_bytes=32 << 20,     # safe on 64 MiB v7x VMEM
        ),
    )(xp, w1q, s1, b1p, w2q, s2, b2p, w3q, s3, b3p)

    return out[:B, :Z_DIM]


def init_params(key):
    """Deterministic init mirroring nn.Linear defaults (U[-1/sqrt(fan_in), +])."""
    def linear(key, fan_in, fan_out):
        kw, kb = jax.random.split(key)
        bound = 1.0 / math.sqrt(fan_in)
        # stored as [in, out] (pre-transposed relative to torch's [out, in])
        w = jax.random.uniform(kw, (fan_in, fan_out), jnp.float32, -bound, bound)
        b = jax.random.uniform(kb, (1, fan_out), jnp.float32, -bound, bound)
        return w, b

    k1, k2, k3 = jax.random.split(key, 3)
    w1, b1 = linear(k1, X_DIM, H_DIM)
    w2, b2 = linear(k2, H_DIM, H_DIM)
    w3, b3 = linear(k3, H_DIM, Z_DIM)
    return (w1, b1, w2, b2, w3, b3)


def reference_forward(x, params):
    """Full-precision f32 reference (original module semantics, eval mode)."""
    w1, b1, w2, b2, w3, b3 = params
    h = jnp.maximum(x @ w1 + b1, 0.0)
    h = jnp.maximum(h @ w2 + b2, 0.0)
    return h @ w3 + b3


if __name__ == "__main__":
    key = jax.random.PRNGKey(0)
    kp, kx = jax.random.split(key)

    params = init_params(kp)
    B = 8  # small batch
    x = jax.random.normal(kx, (B, X_DIM), jnp.float32)

    out = q_net_forward(x, params)
    out = jax.block_until_ready(out)

    ref = reference_forward(x, params)
    assert out.shape == (B, Z_DIM), out.shape
    # int8 weights + bf16 MXU activations -> relaxed tolerance vs f32 ref
    # (estimated max error ~3e-3; tolerance leaves margin).
    max_err = float(jnp.max(jnp.abs(out - ref)))
    assert jnp.allclose(out, ref, atol=3e-2, rtol=3e-2), max_err

    print("KERNEL_OK")
</pallas_src>

<mosaic_0001>
module attributes {stable_mosaic.version = 11 : i64} {
  func.func @qnet_kernel(%arg0: i32, %arg1: memref<16x784xbf16, #tpu.memory_space<vmem>>, %arg2: memref<784x1024xi8, #tpu.memory_space<vmem>>, %arg3: memref<1x1024xf32, #tpu.memory_space<vmem>>, %arg4: memref<1x1024xf32, #tpu.memory_space<vmem>>, %arg5: memref<1024x1024xi8, #tpu.memory_space<vmem>>, %arg6: memref<1x1024xf32, #tpu.memory_space<vmem>>, %arg7: memref<1x1024xf32, #tpu.memory_space<vmem>>, %arg8: memref<1024x128xi8, #tpu.memory_space<vmem>>, %arg9: memref<1x128xf32, #tpu.memory_space<vmem>>, %arg10: memref<1x128xf32, #tpu.memory_space<vmem>>, %arg11: memref<16x128xf32, #tpu.memory_space<vmem>>) attributes {dimension_semantics = [#tpu.dimension_semantics<arbitrary>], iteration_bounds = array<i64: 1>, scalar_prefetch = 0 : i64, scratch_operands = 0 : i64, tpu.core_type = #tpu.core_type<tc>, window_params = [{transform_indices = @transform_0, window_bounds = array<i64: 16, 784>}, {pipeline_mode = #tpu.pipeline_mode<synchronous>, transform_indices = @transform_1, window_bounds = array<i64: 784, 1024>}, {pipeline_mode = #tpu.pipeline_mode<synchronous>, transform_indices = @transform_2, window_bounds = array<i64: 1, 1024>}, {pipeline_mode = #tpu.pipeline_mode<synchronous>, transform_indices = @transform_3, window_bounds = array<i64: 1, 1024>}, {pipeline_mode = #tpu.pipeline_mode<synchronous>, transform_indices = @transform_4, window_bounds = array<i64: 1024, 1024>}, {pipeline_mode = #tpu.pipeline_mode<synchronous>, transform_indices = @transform_5, window_bounds = array<i64: 1, 1024>}, {pipeline_mode = #tpu.pipeline_mode<synchronous>, transform_indices = @transform_6, window_bounds = array<i64: 1, 1024>}, {pipeline_mode = #tpu.pipeline_mode<synchronous>, transform_indices = @transform_7, window_bounds = array<i64: 1024, 128>}, {pipeline_mode = #tpu.pipeline_mode<synchronous>, transform_indices = @transform_8, window_bounds = array<i64: 1, 128>}, {pipeline_mode = #tpu.pipeline_mode<synchronous>, transform_indices = @transform_9, window_bounds = array<i64: 1, 128>}, {transform_indices = @transform_10, window_bounds = array<i64: 16, 128>}]} {
    %c0 = arith.constant 0 : index
    %c0_0 = arith.constant 0 : index
    %0 = vector.load %arg1[%c0, %c0_0] : memref<16x784xbf16, #tpu.memory_space<vmem>>, vector<16x784xbf16>
    %c0_1 = arith.constant 0 : index
    %c0_2 = arith.constant 0 : index
    %1 = vector.load %arg2[%c0_1, %c0_2] : memref<784x1024xi8, #tpu.memory_space<vmem>>, vector<784x1024xi8>
    %2 = arith.sitofp %1 : vector<784x1024xi8> to vector<784x1024xbf16>
    %cst = arith.constant dense<0.000000e+00> : vector<16x1024xf32>
    %3 = tpu.matmul %0, %2, %cst {dimension_numbers = #tpu.dot_dimension_numbers<[1], [0], [0], [1], [0, 0, 1, 1], [], []>} : vector<16x784xbf16>, vector<784x1024xbf16>, vector<16x1024xf32> -> vector<16x1024xf32>
    %c0_3 = arith.constant 0 : index
    %c0_4 = arith.constant 0 : index
    %4 = vector.load %arg3[%c0_3, %c0_4] : memref<1x1024xf32, #tpu.memory_space<vmem>>, vector<1x1024xf32>
    %5 = vector.broadcast %4 : vector<1x1024xf32> to vector<16x1024xf32>
    %6 = arith.mulf %3, %5 : vector<16x1024xf32>
    %c0_5 = arith.constant 0 : index
    %c0_6 = arith.constant 0 : index
    %7 = vector.load %arg4[%c0_5, %c0_6] : memref<1x1024xf32, #tpu.memory_space<vmem>>, vector<1x1024xf32>
    %8 = vector.broadcast %7 : vector<1x1024xf32> to vector<16x1024xf32>
    %9 = arith.addf %6, %8 : vector<16x1024xf32>
    %cst_7 = arith.constant 0.000000e+00 : f32
    %10 = vector.broadcast %cst_7 : f32 to vector<16x1024xf32>
    %11 = arith.maximumf %9, %10 : vector<16x1024xf32>
    %c0_8 = arith.constant 0 : index
    %c0_9 = arith.constant 0 : index
    %12 = vector.load %arg5[%c0_8, %c0_9] : memref<1024x1024xi8, #tpu.memory_space<vmem>>, vector<1024x1024xi8>
    %13 = arith.sitofp %12 : vector<1024x1024xi8> to vector<1024x1024xbf16>
    %14 = arith.truncf %11 : vector<16x1024xf32> to vector<16x1024xbf16>
    %cst_10 = arith.constant dense<0.000000e+00> : vector<16x1024xf32>
    %15 = tpu.matmul %14, %13, %cst_10 {dimension_numbers = #tpu.dot_dimension_numbers<[1], [0], [0], [1], [0, 0, 1, 1], [], []>} : vector<16x1024xbf16>, vector<1024x1024xbf16>, vector<16x1024xf32> -> vector<16x1024xf32>
    %c0_11 = arith.constant 0 : index
    %c0_12 = arith.constant 0 : index
    %16 = vector.load %arg6[%c0_11, %c0_12] : memref<1x1024xf32, #tpu.memory_space<vmem>>, vector<1x1024xf32>
    %17 = vector.broadcast %16 : vector<1x1024xf32> to vector<16x1024xf32>
    %18 = arith.mulf %15, %17 : vector<16x1024xf32>
    %c0_13 = arith.constant 0 : index
    %c0_14 = arith.constant 0 : index
    %19 = vector.load %arg7[%c0_13, %c0_14] : memref<1x1024xf32, #tpu.memory_space<vmem>>, vector<1x1024xf32>
    %20 = vector.broadcast %19 : vector<1x1024xf32> to vector<16x1024xf32>
    %21 = arith.addf %18, %20 : vector<16x1024xf32>
    %cst_15 = arith.constant 0.000000e+00 : f32
    %22 = vector.broadcast %cst_15 : f32 to vector<16x1024xf32>
    %23 = arith.maximumf %21, %22 : vector<16x1024xf32>
    %c0_16 = arith.constant 0 : index
    %c0_17 = arith.constant 0 : index
    %24 = vector.load %arg8[%c0_16, %c0_17] : memref<1024x128xi8, #tpu.memory_space<vmem>>, vector<1024x128xi8>
    %25 = arith.sitofp %24 : vector<1024x128xi8> to vector<1024x128xbf16>
    %26 = arith.truncf %23 : vector<16x1024xf32> to vector<16x1024xbf16>
    %cst_18 = arith.constant dense<0.000000e+00> : vector<16x128xf32>
    %27 = tpu.matmul %26, %25, %cst_18 {dimension_numbers = #tpu.dot_dimension_numbers<[1], [0], [0], [1], [0, 0, 1, 1], [], []>} : vector<16x1024xbf16>, vector<1024x128xbf16>, vector<16x128xf32> -> vector<16x128xf32>
    %c0_19 = arith.constant 0 : index
    %c0_20 = arith.constant 0 : index
    %28 = vector.load %arg9[%c0_19, %c0_20] : memref<1x128xf32, #tpu.memory_space<vmem>>, vector<1x128xf32>
    %29 = vector.broadcast %28 : vector<1x128xf32> to vector<16x128xf32>
    %30 = arith.mulf %27, %29 : vector<16x128xf32>
    %c0_21 = arith.constant 0 : index
    %c0_22 = arith.constant 0 : index
    %31 = vector.load %arg10[%c0_21, %c0_22] : memref<1x128xf32, #tpu.memory_space<vmem>>, vector<1x128xf32>
    %32 = vector.broadcast %31 : vector<1x128xf32> to vector<16x128xf32>
    %33 = arith.addf %30, %32 : vector<16x128xf32>
    %c0_23 = arith.constant 0 : index
    %c0_24 = arith.constant 0 : index
    %34 = vector.load %arg11[%c0_23, %c0_24] : memref<16x128xf32, #tpu.memory_space<vmem>>, vector<16x128xf32>
    tpu.vector_store %arg11[%c0_23, %c0_24], %33 {strides = array<i32>} : memref<16x128xf32, #tpu.memory_space<vmem>>, vector<16x128xf32>,
    return
  }
  func.func @transform_0(%arg0: i32) -> (i32, i32) {
    %c0_i32 = arith.constant 0 : i32
    %c0_i32_0 = arith.constant 0 : i32
    return %arg0, %c0_i32 : i32, i32
  }
  func.func @transform_1(%arg0: i32) -> (i32, i32) {
    %c0_i32 = arith.constant 0 : i32
    %c0_i32_0 = arith.constant 0 : i32
    %c0_i32_1 = arith.constant 0 : i32
    return %c0_i32, %c0_i32_0 : i32, i32
  }
  func.func @transform_2(%arg0: i32) -> (i32, i32) {
    %c0_i32 = arith.constant 0 : i32
    %c0_i32_0 = arith.constant 0 : i32
    %c0_i32_1 = arith.constant 0 : i32
    return %c0_i32, %c0_i32_0 : i32, i32
  }
  func.func @transform_3(%arg0: i32) -> (i32, i32) {
    %c0_i32 = arith.constant 0 : i32
    %c0_i32_0 = arith.constant 0 : i32
    %c0_i32_1 = arith.constant 0 : i32
    return %c0_i32, %c0_i32_0 : i32, i32
  }
  func.func @transform_4(%arg0: i32) -> (i32, i32) {
    %c0_i32 = arith.constant 0 : i32
    %c0_i32_0 = arith.constant 0 : i32
    %c0_i32_1 = arith.constant 0 : i32
    return %c0_i32, %c0_i32_0 : i32, i32
  }
  func.func @transform_5(%arg0: i32) -> (i32, i32) {
    %c0_i32 = arith.constant 0 : i32
    %c0_i32_0 = arith.constant 0 : i32
    %c0_i32_1 = arith.constant 0 : i32
    return %c0_i32, %c0_i32_0 : i32, i32
  }
  func.func @transform_6(%arg0: i32) -> (i32, i32) {
    %c0_i32 = arith.constant 0 : i32
    %c0_i32_0 = arith.constant 0 : i32
    %c0_i32_1 = arith.constant 0 : i32
    return %c0_i32, %c0_i32_0 : i32, i32
  }
  func.func @transform_7(%arg0: i32) -> (i32, i32) {
    %c0_i32 = arith.constant 0 : i32
    %c0_i32_0 = arith.constant 0 : i32
    %c0_i32_1 = arith.constant 0 : i32
    return %c0_i32, %c0_i32_0 : i32, i32
  }
  func.func @transform_8(%arg0: i32) -> (i32, i32) {
    %c0_i32 = arith.constant 0 : i32
    %c0_i32_0 = arith.constant 0 : i32
    %c0_i32_1 = arith.constant 0 : i32
    return %c0_i32, %c0_i32_0 : i32, i32
  }
  func.func @transform_9(%arg0: i32) -> (i32, i32) {
    %c0_i32 = arith.constant 0 : i32
    %c0_i32_0 = arith.constant 0 : i32
    %c0_i32_1 = arith.constant 0 : i32
    return %c0_i32, %c0_i32_0 : i32, i32
  }
  func.func @transform_10(%arg0: i32) -> (i32, i32) {
    %c0_i32 = arith.constant 0 : i32
    %c0_i32_0 = arith.constant 0 : i32
    return %arg0, %c0_i32 : i32, i32
  }
}

</mosaic_0001>

<bundles_post_ra>
// kernel: tpu_custom_call.1
= control target key start
LH: loop header
LB: loop body
LE: loop exit
PB: predicated region body
PF: predicated region fallthrough
CT: control target
= control target key end

     0   :  { %15 = vsyncpa [#allocation3], 0  ;;  %s6580_s0 = inlined_call_operand.hbm [shape: bf16[16,784], index: 0, kind: input, shape index: {}]   ;;  %s6581_s1 = inlined_call_operand.hbm [shape: s8[784,1024], index: 1, kind: input, shape index: {}]   ;;  %s6582_s2 = inlined_call_operand.hbm [shape: f32[1,1024], index: 2, kind: input, shape index: {}]   ;;  %s6583_s3 = inlined_call_operand.vmem [shape: f32[1,1024], index: 3, kind: input, shape index: {}]   ;;  %s6584_s4 = inlined_call_operand.hbm [shape: s8[1024,1024], index: 4, kind: input, shape index: {}]   ;;  %s6585_s5 = inlined_call_operand.vmem [shape: f32[1,1024], index: 5, kind: input, shape index: {}]   ;;  %s6586_s6 = inlined_call_operand.hbm [shape: f32[1,1024], index: 6, kind: input, shape index: {}]   ;;  %s6587_s7 = inlined_call_operand.hbm [shape: s8[1024,128], index: 7, kind: input, shape index: {}]   ;;  %s6588_s8 = inlined_call_operand.vmem [shape: f32[1,128], index: 8, kind: input, shape index: {}]   ;;  %s6589_s9 = inlined_call_operand.vmem [shape: f32[1,128], index: 9, kind: input, shape index: {}]   ;;  %s6590_s10 = inlined_call_operand.hbm [shape: f32[16,128], index: 10, kind: output, shape index: {}]  }
   0x1   :  { %16 = vsyncpa [#allocation6], 0 }
   0x2   :  { %17 = vsyncpa [#allocation9], 0 }
   0x3   :  { %18 = vsyncpa [#allocation12], 0 }
   0x4   :  { %19 = vsyncpa [#allocation4], 0  ;;  %s6222_s13 = smov [#allocation5]   ;;  %s6058_s17 = scalar_lea.hbm %s6581_s1, 25088 }
   0x5   :  { %s37_s14 = sshll.u32 %s6222_s13, 4  ;;  %p6059_p0 = scmp.ne.s32.totalorder %s6581_s1, %s6058_s17  ;;  %s38_s14 = int_to_ptr.vmem [resolvable:$true] %s37_s14 }
   0x6   :  { %p6062_p1 = scmp.lt.u32.totalorder %s6058_s17, %s6581_s1 }
   0x8   :  { %p6064_p2 = pnand %p6062_p1, %p6059_p0 }
   0xa   :  { %6067 = shalt.err (!%p6064_p2)
}
   0xb   :  { %s6068_s22 = scalar_lea.vmem %s38_s14, 25088  ;;  %p6073_p4 = scmp.lt.s32.totalorder %s38_s14, %s38_s14 }
   0xc   :  { %p6069_p3 = scmp.ne.s32.totalorder %s38_s14, %s6068_s22  ;;  %p6074_p5 = scmp.lt.s32.totalorder %s6068_s22, %s6068_s22 }
   0xe   :  { %p6075_p6 = por %p6074_p5, %p6073_p4 }
  0x10   :  { %p6076_p7 = pnand %p6075_p6, %p6069_p3 }
  0x12   :  { %6079 = shalt.err (!%p6076_p7)
}
  0x13   :  { %s6223_s23 = smov 256   ;;  %s6224_s24 = smov 16  }
  0x14   :  { %43 = dma.hbm_to_vmem [thread:$0]  %s6581_s1, 25088, %s38_s14, [#allocation6], %s6223_s23, %s6223_s23, %s6224_s24  }
  0x15   :  { %s6225_s27 = smov [#allocation8]   ;;  %s6080_s11 = scalar_lea.hbm %s6584_s4, 32768 }
  0x16   :  { %s61_s28 = sshll.u32 %s6225_s27, 4  ;;  %p6081_p8 = scmp.ne.s32.totalorder %s6584_s4, %s6080_s11  ;;  %s62_s28 = int_to_ptr.vmem [resolvable:$true] %s61_s28 }
  0x17   :  { %p6084_p9 = scmp.lt.u32.totalorder %s6080_s11, %s6584_s4 }
  0x19   :  { %p6086_p10 = pnand %p6084_p9, %p6081_p8 }
  0x1b   :  { %6089 = shalt.err (!%p6086_p10)
}
  0x1c   :  { %s6090_s17 = scalar_lea.vmem %s62_s28, 32768  ;;  %p6095_p12 = scmp.lt.s32.totalorder %s62_s28, %s62_s28 }
  0x1d   :  { %p6091_p11 = scmp.ne.s32.totalorder %s62_s28, %s6090_s17  ;;  %p6096_p13 = scmp.lt.s32.totalorder %s6090_s17, %s6090_s17 }
  0x1f   :  { %p6097_p0 = por %p6096_p13, %p6095_p12 }
  0x21   :  { %p6098_p1 = pnand %p6097_p0, %p6091_p11 }
  0x23   :  { %6101 = shalt.err (!%p6098_p1)
}
  0x24   :  { %s6226_s1 = smov 1024   ;;  %s6227_s14 = smov 64  }
  0x25   :  { %67 = dma.hbm_to_vmem [thread:$0]  %s6584_s4, 32768, %s62_s28, [#allocation9], %s6226_s1, %s6226_s1, %s6227_s14  }
  0x26   :  { %s6228_s20 = smov [#allocation2]   ;;  %s6102_s24 = scalar_lea.hbm %s6580_s0, 896 }
  0x27   :  { %s25_s21 = sshll.u32 %s6228_s20, 4  ;;  %p6103_p2 = scmp.ne.s32.totalorder %s6580_s0, %s6102_s24  ;;  %s26_s21 = int_to_ptr.vmem [resolvable:$true] %s25_s21 }
  0x28   :  { %p6106_p3 = scmp.lt.u32.totalorder %s6102_s24, %s6580_s0 }
  0x2a   :  { %p6108_p4 = pnand %p6106_p3, %p6103_p2 }
  0x2c   :  { %6111 = shalt.err (!%p6108_p4)
}
  0x2d   :  { %s6112_s30 = scalar_lea.vmem %s26_s21, 896  ;;  %p6117_p6 = scmp.lt.s32.totalorder %s26_s21, %s26_s21 }
  0x2e   :  { %p6113_p5 = scmp.ne.s32.totalorder %s26_s21, %s6112_s30  ;;  %p6118_p7 = scmp.lt.s32.totalorder %s6112_s30, %s6112_s30 }
  0x30   :  { %p6119_p8 = por %p6118_p7, %p6117_p6 }
  0x32   :  { %p6120_p9 = pnand %p6119_p8, %p6113_p5 }
  0x34   :  { %6123 = shalt.err (!%p6120_p9)
}
  0x35   :  { %s6229_s4 = smov 448   ;;  %s6230_s28 = smov 28  }
  0x36   :  { %31 = dma.hbm_to_vmem [thread:$0]  %s6580_s0, 896, %s26_s21, [#allocation3], %s6229_s4, %s6229_s4, %s6230_s28  }
  0x37   :  { %s6231_s13 = smov [#allocation7]   ;;  %s6232_s16 = smov [#allocation10]  }
  0x38   :  { %s50_s15 = sshll.u32 %s6231_s13, 4  ;;  %s76_s17 = sshll.u32 %s6232_s16, 4  ;;  %s51_s15 = int_to_ptr.vmem [resolvable:$true] %s50_s15  ;;  %s77_s17 = int_to_ptr.vmem [resolvable:$true] %s76_s17 }
  0x39   :  { %s6124_s18 = scalar_lea.hbm %s6582_s2, 128 }
  0x3a   :  { %p6125_p10 = scmp.ne.s32.totalorder %s6582_s2, %s6124_s18  ;;  %p6128_p11 = scmp.lt.u32.totalorder %s6124_s18, %s6582_s2 }
  0x3c   :  { %p6130_p12 = pnand %p6128_p11, %p6125_p10 }
  0x3e   :  { %6133 = shalt.err (!%p6130_p12)
}
  0x3f   :  { %s6134_s0 = scalar_lea.vmem %s51_s15, 128  ;;  %p6139_p0 = scmp.lt.s32.totalorder %s51_s15, %s51_s15 }
  0x40   :  { %p6135_p13 = scmp.ne.s32.totalorder %s51_s15, %s6134_s0  ;;  %p6140_p1 = scmp.lt.s32.totalorder %s6134_s0, %s6134_s0 }
  0x42   :  { %p6141_p2 = por %p6140_p1, %p6139_p0 }
  0x44   :  { %p6142_p3 = pnand %p6141_p2, %p6135_p13 }
  0x46   :  { %6145 = shalt.err (!%p6142_p3)
}
  0x47   :  { %53 = dma.hbm_to_vmem [thread:$0]  %s6582_s2, 128, %s51_s15, [#allocation6]  }
  0x48   :  { %s6146_s27 = scalar_lea.hbm %s6586_s6, 128 }
  0x49   :  { %p6147_p4 = scmp.ne.s32.totalorder %s6586_s6, %s6146_s27  ;;  %p6150_p5 = scmp.lt.u32.totalorder %s6146_s27, %s6586_s6 }
  0x4b   :  { %p6152_p6 = pnand %p6150_p5, %p6147_p4 }
  0x4d   :  { %6155 = shalt.err (!%p6152_p6)
}
  0x4e   :  { %s6156_s11 = scalar_lea.vmem %s77_s17, 128  ;;  %p6161_p8 = scmp.lt.s32.totalorder %s77_s17, %s77_s17 }
  0x4f   :  { %p6157_p7 = scmp.ne.s32.totalorder %s77_s17, %s6156_s11  ;;  %p6162_p9 = scmp.lt.s32.totalorder %s6156_s11, %s6156_s11 }
  0x51   :  { %p6163_p10 = por %p6162_p9, %p6161_p8 }
  0x53   :  { %p6164_p11 = pnand %p6163_p10, %p6157_p7 }
  0x55   :  { %6167 = shalt.err (!%p6164_p11)
}
  0x56   :  { %79 = dma.hbm_to_vmem [thread:$0]  %s6586_s6, 128, %s77_s17, [#allocation9]  }
  0x57   :  { %s6233_s13 = smov [#allocation11]   ;;  %s6168_s14 = scalar_lea.hbm %s6587_s7, 4096 }
  0x58   :  { %s85_s15 = sshll.u32 %s6233_s13, 4  ;;  %p6169_p12 = scmp.ne.s32.totalorder %s6587_s7, %s6168_s14  ;;  %s86_s15 = int_to_ptr.vmem [resolvable:$true] %s85_s15 }
  0x59   :  { %p6172_p13 = scmp.lt.u32.totalorder %s6168_s14, %s6587_s7 }
  0x5b   :  { %p6174_p0 = pnand %p6172_p13, %p6169_p12 }
  0x5d   :  { %6177 = shalt.err (!%p6174_p0)
}
  0x5e   :  { %s6178_s23 = scalar_lea.vmem %s86_s15, 4096  ;;  %p6183_p2 = scmp.lt.s32.totalorder %s86_s15, %s86_s15 }
  0x5f   :  { %p6179_p1 = scmp.ne.s32.totalorder %s86_s15, %s6178_s23  ;;  %p6184_p3 = scmp.lt.s32.totalorder %s6178_s23, %s6178_s23 }
  0x61   :  { %p6185_p4 = por %p6184_p3, %p6183_p2 }
  0x63   :  { %p6186_p5 = pnand %p6185_p4, %p6179_p1 }
  0x65   :  { %6189 = shalt.err (!%p6186_p5)
}
  0x66   :  { %s6234_s6 = smov 128   ;;  %s6235_s17 = smov 8  }
  0x67   :  { %91 = dma.hbm_to_vmem [thread:$0]  %s6587_s7, 4096, %s86_s15, [#allocation12], %s6234_s6, %s6234_s6, %s6235_s17  }
  0x68   :  { %6212 = dma.done.wait [#allocation3], 896  }
  0x69   :  { %6213 = vsyncadd [#allocation3], 4294966400 }
  0x6a   :  { %6214 = dma.done.wait [#allocation6], 25216  }
  0x6b   :  { %6215 = vsyncadd [#allocation6], 4294942080 }
  0x6c   :  { %6216 = dma.done.wait [#allocation9], 32896  }
  0x6d   :  { %6217 = vsyncadd [#allocation9], 4294934400 }
  0x6e   :  { %6218 = dma.done.wait [#allocation12], 4096  }
  0x6f   :  { %6219 = vsyncadd [#allocation12], 4294963200  ;;  %v123_v0 = vld [vmem:[#allocation5] sm:$0xff]  ;;  %v125_v1 = vld [vmem:[#allocation5 + $0x10] sm:$0xff]  ;;  %vm2706_vm0 = vcmask 130048   ;;  %s6237_s28 = smov [#allocation13]  }
  0x70   :  { %v127_v2 = vld [vmem:[#allocation5 + $0x20] sm:$0xff]  ;;  %v319_v3 = vunpack.c.l.s8.bf16 %v123_v0  ;;  %v323_v4 = vunpack.c.l.s8.bf16 %v125_v1  ;;  %v320_v5 = vunpack.c.h.s8.bf16 %v123_v0  ;;  %v324_v6 = vunpack.c.h.s8.bf16 %v125_v1  ;;  %v129_v7 = vld [vmem:[#allocation5 + $0x30] sm:$0xff]  ;;  %v6039_v46 = vld [vmem:[#allocation2 + $0x4] ss:$28 sps:$4 sm:$0xff]   ;;  %s5419_s11 = sshll.u32 %s6237_s28, 4  ;;  %s5420_s11 = int_to_ptr.vmem [resolvable:$true] %s5419_s11 }
  0x71   :  { %v327_v8 = vunpack.c.l.s8.bf16 %v127_v2  ;;  %v331_v9 = vunpack.c.l.s8.bf16 %v129_v7  ;;  %v328_v10 = vunpack.c.h.s8.bf16 %v127_v2  ;;  %v332_v11 = vunpack.c.h.s8.bf16 %v129_v7  ;;  %v131_v12 = vld [vmem:[#allocation5 + $0x40] sm:$0xff]  ;;  %v133_v13 = vld [vmem:[#allocation5 + $0x50] sm:$0xff]  ;;  %2742 = vmatprep.mubr.bf16.mxu0 %v6039_v46  ;;  %2914 = vmatprep.mubr.bf16.mxu1 %v6039_v46  ;;  %s6190_s2 = scalar_lea.vmem %s5420_s11, 256  ;;  %p6195_p7 = scmp.lt.s32.totalorder %s5420_s11, %s5420_s11 }
  0x72   :  { %v5442_v14 = vcombine.high %v319_v3, %v323_v4  ;;  %v5444_v15 = vcombine.high %v320_v5, %v324_v6  ;;  %v5441_v16 = vcombine.low %v319_v3, %v323_v4  ;;  %v5443_v17 = vcombine.low %v320_v5, %v324_v6  ;;  %v135_v18 = vld [vmem:[#allocation5 + $0x60] sm:$0xff]  ;;  %v137_v19 = vld [vmem:[#allocation5 + $0x70] sm:$0xff]  ;;  %p6191_p6 = scmp.ne.s32.totalorder %s5420_s11, %s6190_s2  ;;  %p6196_p8 = scmp.lt.s32.totalorder %s6190_s2, %s6190_s2 }
  0x73   :  { %v5450_v20 = vcombine.high %v327_v8, %v331_v9  ;;  %v5452_v21 = vcombine.high %v328_v10, %v332_v11  ;;  %v335_v22 = vunpack.c.l.s8.bf16 %v131_v12  ;;  %v339_v23 = vunpack.c.l.s8.bf16 %v133_v13  ;;  %v139_v34 = vld [vmem:[#allocation5 + $0x80] sm:$0xff]  ;;  %v141_v35 = vld [vmem:[#allocation5 + $0x90] sm:$0xff] }
  0x74   :  { %2710 = vmatprep.subr.bf16.mxu0 %v5442_v14  ;;  %2882 = vmatprep.subr.bf16.mxu1 %v5444_v15  ;;  %v336_v24 = vunpack.c.h.s8.bf16 %v131_v12  ;;  %v340_v25 = vunpack.c.h.s8.bf16 %v133_v13  ;;  %v5449_v26 = vcombine.low %v327_v8, %v331_v9  ;;  %v5451_v27 = vcombine.low %v328_v10, %v332_v11  ;;  %v143_v40 = vld [vmem:[#allocation5 + $0xa0] sm:$0xff]  ;;  %v145_v45 = vld [vmem:[#allocation5 + $0xb0] sm:$0xff]  ;;  %p6197_p9 = por %p6196_p8, %p6195_p7 }
  0x75   :  { %2711 = vmatpush1.bf16.msra.mxu0 %v5441_v16  ;;  %2883 = vmatpush1.bf16.msra.mxu1 %v5443_v17  ;;  %v343_v28 = vunpack.c.l.s8.bf16 %v135_v18  ;;  %v347_v29 = vunpack.c.l.s8.bf16 %v137_v19  ;;  %v5458_v30 = vcombine.high %v335_v22, %v339_v23  ;;  %v344_v32 = vunpack.c.h.s8.bf16 %v135_v18  ;;  %v147_v55 = vld [vmem:[#allocation5 + $0xc0] sm:$0xff]  ;;  %v149_v56 = vld [vmem:[#allocation5 + $0xd0] sm:$0xff] }
  0x76   :  { %2712 = vmatprep.subr.bf16.mxu0 %v5450_v20  ;;  %2884 = vmatprep.subr.bf16.mxu1 %v5452_v21  ;;  %v5460_v31 = vcombine.high %v336_v24, %v340_v25  ;;  %v348_v33 = vunpack.c.h.s8.bf16 %v137_v19  ;;  %v5457_v36 = vcombine.low %v335_v22, %v339_v23  ;;  %v5459_v37 = vcombine.low %v336_v24, %v340_v25  ;;  %v151_v1 = vld [vmem:[#allocation5 + $0xe0] sm:$0xff]  ;;  %v153_v2 = vld [vmem:[#allocation5 + $0xf0] sm:$0xff]  ;;  %p6198_p10 = pnand %p6197_p9, %p6191_p6 }
  0x77   :  { %v5466_v38 = vcombine.high %v343_v28, %v347_v29  ;;  %v351_v39 = vunpack.c.l.s8.bf16 %v139_v34  ;;  %v355_v42 = vunpack.c.l.s8.bf16 %v141_v35  ;;  %v352_v43 = vunpack.c.h.s8.bf16 %v139_v34  ;;  %v155_v11 = vld [vmem:[#allocation5 + $0x100] sm:$0xff]  ;;  %v157_v12 = vld [vmem:[#allocation5 + $0x110] sm:$0xff] }
  0x78   :  { %v5468_v41 = vcombine.high %v344_v32, %v348_v33  ;;  %v356_v44 = vunpack.c.h.s8.bf16 %v141_v35  ;;  %v5465_v47 = vcombine.low %v343_v28, %v347_v29  ;;  %v5467_v48 = vcombine.low %v344_v32, %v348_v33  ;;  %v159_v21 = vld [vmem:[#allocation5 + $0x120] sm:$0xff]  ;;  %v161_v22 = vld [vmem:[#allocation5 + $0x130] sm:$0xff] }
  0x79   :  { %2713 = vmatpush1.bf16.msra.mxu0 %v5449_v26  ;;  %2885 = vmatpush1.bf16.msra.mxu1 %v5451_v27  ;;  %v359_v49 = vunpack.c.l.s8.bf16 %v143_v40  ;;  %v363_v50 = vunpack.c.l.s8.bf16 %v145_v45  ;;  %v5474_v51 = vcombine.high %v351_v39, %v355_v42  ;;  %v360_v53 = vunpack.c.h.s8.bf16 %v143_v40  ;;  %v165_v32 = vld [vmem:[#allocation5 + $0x150] sm:$0xff] }
  0x7a   :  { %2714 = vmatprep.subr.bf16.mxu0 %v5458_v30  ;;  %2886 = vmatprep.subr.bf16.mxu1 %v5460_v31  ;;  %v5476_v52 = vcombine.high %v352_v43, %v356_v44  ;;  %v364_v54 = vunpack.c.h.s8.bf16 %v145_v45  ;;  %v5473_v57 = vcombine.low %v351_v39, %v355_v42  ;;  %v5475_v58 = vcombine.low %v352_v43, %v356_v44  ;;  %v163_v31 = vld [vmem:[#allocation5 + $0x140] sm:$0xff]  ;;  %v169_v42 = vld [vmem:[#allocation5 + $0x170] sm:$0xff] }
  0x7b   :  { %v5482_v59 = vcombine.high %v359_v49, %v363_v50  ;;  %v367_v60 = vunpack.c.l.s8.bf16 %v147_v55  ;;  %v371_v62 = vunpack.c.l.s8.bf16 %v149_v56  ;;  %v368_v63 = vunpack.c.h.s8.bf16 %v147_v55 }
  0x7c   :  { %v5484_v61 = vcombine.high %v360_v53, %v364_v54  ;;  %v372_v0 = vunpack.c.h.s8.bf16 %v149_v56  ;;  %v5481_v3 = vcombine.low %v359_v49, %v363_v50  ;;  %v5483_v4 = vcombine.low %v360_v53, %v364_v54 }
  0x7d   :  { %2715 = vmatpush1.bf16.msra.mxu0 %v5457_v36  ;;  %2887 = vmatpush1.bf16.msra.mxu1 %v5459_v37  ;;  %v375_v5 = vunpack.c.l.s8.bf16 %v151_v1  ;;  %v379_v6 = vunpack.c.l.s8.bf16 %v153_v2  ;;  %v5490_v7 = vcombine.high %v367_v60, %v371_v62  ;;  %v376_v9 = vunpack.c.h.s8.bf16 %v151_v1 }
  0x7e   :  { %2716 = vmatprep.subr.bf16.mxu0 %v5466_v38  ;;  %2888 = vmatprep.subr.bf16.mxu1 %v5468_v41  ;;  %v5492_v8 = vcombine.high %v368_v63, %v372_v0  ;;  %v380_v10 = vunpack.c.h.s8.bf16 %v153_v2  ;;  %v5489_v13 = vcombine.low %v367_v60, %v371_v62  ;;  %v5491_v14 = vcombine.low %v368_v63, %v372_v0  ;;  %v167_v41 = vld [vmem:[#allocation5 + $0x160] sm:$0xff]  ;;  %v177_v62 = vld [vmem:[#allocation5 + $0x1b0] sm:$0xff] }
  0x7f   :  { %v5498_v15 = vcombine.high %v375_v5, %v379_v6  ;;  %v383_v16 = vunpack.c.l.s8.bf16 %v155_v11  ;;  %v387_v18 = vunpack.c.l.s8.bf16 %v157_v12  ;;  %v384_v19 = vunpack.c.h.s8.bf16 %v155_v11 }
  0x80   :  { %v5500_v17 = vcombine.high %v376_v9, %v380_v10  ;;  %v388_v20 = vunpack.c.h.s8.bf16 %v157_v12  ;;  %v5497_v23 = vcombine.low %v375_v5, %v379_v6  ;;  %v5499_v24 = vcombine.low %v376_v9, %v380_v10 }
  0x81   :  { %2717 = vmatpush1.bf16.msra.mxu0 %v5465_v47  ;;  %2889 = vmatpush1.bf16.msra.mxu1 %v5467_v48  ;;  %v391_v25 = vunpack.c.l.s8.bf16 %v159_v21  ;;  %v395_v26 = vunpack.c.l.s8.bf16 %v161_v22  ;;  %v5506_v27 = vcombine.high %v383_v16, %v387_v18  ;;  %v392_v29 = vunpack.c.h.s8.bf16 %v159_v21 }
  0x82   :  { %2718 = vmatprep.subr.bf16.mxu0 %v5474_v51  ;;  %2890 = vmatprep.subr.bf16.mxu1 %v5476_v52  ;;  %v5508_v28 = vcombine.high %v384_v19, %v388_v20  ;;  %v396_v30 = vunpack.c.h.s8.bf16 %v161_v22  ;;  %v5505_v33 = vcombine.low %v383_v16, %v387_v18  ;;  %v5507_v34 = vcombine.low %v384_v19, %v388_v20  ;;  %v171_v51 = vld [vmem:[#allocation5 + $0x180] sm:$0xff]  ;;  %v173_v52 = vld [vmem:[#allocation5 + $0x190] sm:$0xff] }
  0x83   :  { %v5514_v35 = vcombine.high %v391_v25, %v395_v26  ;;  %v399_v36 = vunpack.c.l.s8.bf16 %v163_v31  ;;  %v403_v38 = vunpack.c.l.s8.bf16 %v165_v32  ;;  %v400_v39 = vunpack.c.h.s8.bf16 %v163_v31  ;;  %v185_v18 = vld [vmem:[#allocation5 + $0x1f0] sm:$0xff] }
  0x84   :  { %v5516_v37 = vcombine.high %v392_v29, %v396_v30  ;;  %v404_v40 = vunpack.c.h.s8.bf16 %v165_v32  ;;  %v5513_v43 = vcombine.low %v391_v25, %v395_v26  ;;  %v5515_v44 = vcombine.low %v392_v29, %v396_v30 }
  0x85   :  { %2719 = vmatpush1.bf16.msra.mxu0 %v5473_v57  ;;  %2891 = vmatpush1.bf16.msra.mxu1 %v5475_v58  ;;  %v407_v45 = vunpack.c.l.s8.bf16 %v167_v41  ;;  %v411_v46 = vunpack.c.l.s8.bf16 %v169_v42  ;;  %v5522_v47 = vcombine.high %v399_v36, %v403_v38  ;;  %v408_v49 = vunpack.c.h.s8.bf16 %v167_v41 }
  0x86   :  { %2720 = vmatprep.subr.bf16.mxu0 %v5482_v59  ;;  %2892 = vmatprep.subr.bf16.mxu1 %v5484_v61  ;;  %v5524_v48 = vcombine.high %v400_v39, %v404_v40  ;;  %v412_v50 = vunpack.c.h.s8.bf16 %v169_v42  ;;  %v5521_v53 = vcombine.low %v399_v36, %v403_v38  ;;  %v5523_v54 = vcombine.low %v400_v39, %v404_v40  ;;  %v175_v61 = vld [vmem:[#allocation5 + $0x1a0] sm:$0xff]  ;;  %v193_v38 = vld [vmem:[#allocation5 + $0x230] sm:$0xff] }
  0x87   :  { %v5530_v55 = vcombine.high %v407_v45, %v411_v46  ;;  %v415_v56 = vunpack.c.l.s8.bf16 %v171_v51  ;;  %v419_v58 = vunpack.c.l.s8.bf16 %v173_v52  ;;  %v416_v59 = vunpack.c.h.s8.bf16 %v171_v51 }
  0x88   :  { %v5532_v57 = vcombine.high %v408_v49, %v412_v50  ;;  %v420_v60 = vunpack.c.h.s8.bf16 %v173_v52  ;;  %v5529_v63 = vcombine.low %v407_v45, %v411_v46  ;;  %v5531_v0 = vcombine.low %v408_v49, %v412_v50  ;;  %v6041_v49 = vld [vmem:[#allocation2] ss:$28 sps:$4 sm:$0xff]  }
  0x89   :  { %2721 = vmatpush1.bf16.msra.mxu0 %v5481_v3  ;;  %2893 = vmatpush1.bf16.msra.mxu1 %v5483_v4  ;;  %v423_v1 = vunpack.c.l.s8.bf16 %v175_v61  ;;  %v427_v2 = vunpack.c.l.s8.bf16 %v177_v62  ;;  %v5538_v3 = vcombine.high %v415_v56, %v419_v58  ;;  %v424_v5 = vunpack.c.h.s8.bf16 %v175_v61 }
  0x8a   :  { %2722 = vmatprep.subr.bf16.mxu0 %v5490_v7  ;;  %2894 = vmatprep.subr.bf16.mxu1 %v5492_v8  ;;  %v5540_v4 = vcombine.high %v416_v59, %v420_v60  ;;  %v428_v6 = vunpack.c.h.s8.bf16 %v177_v62  ;;  %v179_v7 = vld [vmem:[#allocation5 + $0x1c0] sm:$0xff]  ;;  %v181_v8 = vld [vmem:[#allocation5 + $0x1d0] sm:$0xff]  ;;  %v5537_v9 = vcombine.low %v415_v56, %v419_v58  ;;  %v5539_v10 = vcombine.low %v416_v59, %v420_v60 }
  0x8b   :  { %v5546_v11 = vcombine.high %v423_v1, %v427_v2  ;;  %v431_v12 = vunpack.c.l.s8.bf16 %v179_v7  ;;  %v436_v16 = vunpack.c.h.s8.bf16 %v181_v8  ;;  %v5545_v19 = vcombine.low %v423_v1, %v427_v2  ;;  %v199_v58 = vld [vmem:[#allocation5 + $0x260] sm:$0xff]  ;;  %v201_v59 = vld [vmem:[#allocation5 + $0x270] sm:$0xff] }
  0x8c   :  { %v5547_v20 = vcombine.low %v424_v5, %v428_v6  ;;  %v443_v22 = vunpack.c.l.s8.bf16 %v185_v18  ;;  %v444_v26 = vunpack.c.h.s8.bf16 %v185_v18  ;;  %v459_v42 = vunpack.c.l.s8.bf16 %v193_v38  ;;  %v6042_v60 = vld [vmem:[#allocation2 + $0xc] ss:$28 sps:$4 sm:$0xff]  }
  0x8d   :  { %2723 = vmatpush1.bf16.msra.mxu0 %v5489_v13  ;;  %2895 = vmatpush1.bf16.msra.mxu1 %v5491_v14  ;;  %v5548_v13 = vcombine.high %v424_v5, %v428_v6  ;;  %v435_v14 = vunpack.c.l.s8.bf16 %v181_v8  ;;  %v460_v46 = vunpack.c.h.s8.bf16 %v193_v38  ;;  %v203_v5 = vld [vmem:[#allocation5 + $0x280] sm:$0xff]  ;;  %v205_v6 = vld [vmem:[#allocation5 + $0x290] sm:$0xff] }
  0x8e   :  { %2724 = vmatprep.subr.bf16.mxu0 %v5498_v15  ;;  %2896 = vmatprep.subr.bf16.mxu1 %v5500_v17  ;;  %v432_v15 = vunpack.c.h.s8.bf16 %v179_v7  ;;  %v183_v17 = vld [vmem:[#allocation5 + $0x1e0] sm:$0xff] }
  0x8f   :  { %v439_v21 = vunpack.c.l.s8.bf16 %v183_v17  ;;  %v440_v25 = vunpack.c.h.s8.bf16 %v183_v17  ;;  %v5553_v29 = vcombine.low %v431_v12, %v435_v14 }
  0x90   :  { %v5555_v30 = vcombine.low %v432_v15, %v436_v16 }
  0x91   :  { %2725 = vmatpush1.bf16.msra.mxu0 %v5497_v23  ;;  %2897 = vmatpush1.bf16.msra.mxu1 %v5499_v24  ;;  %v5554_v23 = vcombine.high %v431_v12, %v435_v14  ;;  %v5556_v24 = vcombine.high %v432_v15, %v436_v16  ;;  %v5562_v31 = vcombine.high %v439_v21, %v443_v22  ;;  %v483_v12 = vunpack.c.l.s8.bf16 %v205_v6  ;;  %v207_v15 = vld [vmem:[#allocation5 + $0x2a0] sm:$0xff]  ;;  %v209_v16 = vld [vmem:[#allocation5 + $0x2b0] sm:$0xff] }
  0x92   :  { %2726 = vmatprep.subr.bf16.mxu0 %v5506_v27  ;;  %2898 = vmatprep.subr.bf16.mxu1 %v5508_v28  ;;  %v187_v27 = vld [vmem:[#allocation5 + $0x200] sm:$0xff]  ;;  %v189_v28 = vld [vmem:[#allocation5 + $0x210] sm:$0xff]  ;;  %v5561_v39 = vcombine.low %v439_v21, %v443_v22  ;;  %v5563_v40 = vcombine.low %v440_v25, %v444_v26  ;;  %v484_v14 = vunpack.c.h.s8.bf16 %v205_v6 }
  0x93   :  { %v447_v32 = vunpack.c.l.s8.bf16 %v187_v27  ;;  %v452_v36 = vunpack.c.h.s8.bf16 %v189_v28 }
  0x95   :  { %2727 = vmatpush1.bf16.msra.mxu0 %v5505_v33  ;;  %2899 = vmatpush1.bf16.msra.mxu1 %v5507_v34  ;;  %v5564_v33 = vcombine.high %v440_v25, %v444_v26  ;;  %v451_v34 = vunpack.c.l.s8.bf16 %v189_v28  ;;  %v211_v25 = vld [vmem:[#allocation5 + $0x2c0] sm:$0xff]  ;;  %v213_v26 = vld [vmem:[#allocation5 + $0x2d0] sm:$0xff] }
  0x96   :  { %2728 = vmatprep.subr.bf16.mxu0 %v5514_v35  ;;  %2900 = vmatprep.subr.bf16.mxu1 %v5516_v37  ;;  %v448_v35 = vunpack.c.h.s8.bf16 %v187_v27  ;;  %v191_v37 = vld [vmem:[#allocation5 + $0x220] sm:$0xff] }
  0x97   :  { %v455_v41 = vunpack.c.l.s8.bf16 %v191_v37  ;;  %v456_v45 = vunpack.c.h.s8.bf16 %v191_v37  ;;  %v5569_v50 = vcombine.low %v447_v32, %v451_v34 }
  0x98   :  { %v5571_v51 = vcombine.low %v448_v35, %v452_v36 }
  0x99   :  { %2729 = vmatpush1.bf16.msra.mxu0 %v5513_v43  ;;  %2901 = vmatpush1.bf16.msra.mxu1 %v5515_v44  ;;  %v5570_v43 = vcombine.high %v447_v32, %v451_v34  ;;  %v5572_v44 = vcombine.high %v448_v35, %v452_v36  ;;  %v5578_v52 = vcombine.high %v455_v41, %v459_v42  ;;  %v499_v32 = vunpack.c.l.s8.bf16 %v213_v26  ;;  %v215_v35 = vld [vmem:[#allocation5 + $0x2e0] sm:$0xff]  ;;  %v217_v36 = vld [vmem:[#allocation5 + $0x2f0] sm:$0xff] }
  0x9a   :  { %2730 = vmatprep.subr.bf16.mxu0 %v5522_v47  ;;  %2902 = vmatprep.subr.bf16.mxu1 %v5524_v48  ;;  %v195_v47 = vld [vmem:[#allocation5 + $0x240] sm:$0xff]  ;;  %v197_v48 = vld [vmem:[#allocation5 + $0x250] sm:$0xff]  ;;  %v5577_v61 = vcombine.low %v455_v41, %v459_v42  ;;  %v5579_v62 = vcombine.low %v456_v45, %v460_v46  ;;  %v500_v34 = vunpack.c.h.s8.bf16 %v213_v26 }
  0x9b   :  { %v464_v56 = vunpack.c.h.s8.bf16 %v195_v47 }
  0x9d   :  { %2731 = vmatpush1.bf16.msra.mxu0 %v5521_v53  ;;  %2903 = vmatpush1.bf16.msra.mxu1 %v5523_v54  ;;  %v463_v53 = vunpack.c.l.s8.bf16 %v195_v47  ;;  %v5580_v54 = vcombine.high %v456_v45, %v460_v46  ;;  %v219_v45 = vld [vmem:[#allocation5 + $0x300] sm:$0xff]  ;;  %v221_v46 = vld [vmem:[#allocation5 + $0x310] sm:$0xff] }
  0x9e   :  { %2732 = vmatprep.subr.bf16.mxu0 %v5530_v55  ;;  %2904 = vmatprep.subr.bf16.mxu1 %v5532_v57  ;;  %v467_v55 = vunpack.c.l.s8.bf16 %v197_v48  ;;  %v468_v57 = vunpack.c.h.s8.bf16 %v197_v48 }
  0xa0   :  { %v5586_v1 = vcombine.high %v463_v53, %v467_v55  ;;  %v5588_v2 = vcombine.high %v464_v56, %v468_v57  ;;  %v5585_v7 = vcombine.low %v463_v53, %v467_v55  ;;  %v5587_v8 = vcombine.low %v464_v56, %v468_v57  ;;  %v223_v55 = vld [vmem:[#allocation5 + $0x320] sm:$0xff]  ;;  %v225_v56 = vld [vmem:[#allocation5 + $0x330] sm:$0xff] }
  0xa1   :  { %2733 = vmatpush1.bf16.msra.mxu0 %v5529_v63  ;;  %2905 = vmatpush1.bf16.msra.mxu1 %v5531_v0  ;;  %v471_v63 = vunpack.c.l.s8.bf16 %v199_v58  ;;  %v475_v0 = vunpack.c.l.s8.bf16 %v201_v59  ;;  %v512_v53 = vunpack.c.h.s8.bf16 %v219_v45 }
  0xa2   :  { %2734 = vmatprep.subr.bf16.mxu0 %v5538_v3  ;;  %2906 = vmatprep.subr.bf16.mxu1 %v5540_v4  ;;  %v472_v3 = vunpack.c.h.s8.bf16 %v199_v58  ;;  %v476_v4 = vunpack.c.h.s8.bf16 %v201_v59  ;;  %v519_v59 = vunpack.c.l.s8.bf16 %v223_v55 }
  0xa3   :  { %v5593_v17 = vcombine.low %v471_v63, %v475_v0 }
  0xa4   :  { %v5595_v18 = vcombine.low %v472_v3, %v476_v4 }
  0xa5   :  { %2735 = vmatpush1.bf16.msra.mxu0 %v5537_v9  ;;  %2907 = vmatpush1.bf16.msra.mxu1 %v5539_v10  ;;  %v5594_v9 = vcombine.high %v471_v63, %v475_v0  ;;  %v479_v10 = vunpack.c.l.s8.bf16 %v203_v5  ;;  %v520_v63 = vunpack.c.h.s8.bf16 %v223_v55  ;;  %v524_v0 = vunpack.c.h.s8.bf16 %v225_v56 }
  0xa6   :  { %2736 = vmatprep.subr.bf16.mxu0 %v5546_v11  ;;  %2908 = vmatprep.subr.bf16.mxu1 %v5548_v13  ;;  %v5596_v11 = vcombine.high %v472_v3, %v476_v4  ;;  %v480_v13 = vunpack.c.h.s8.bf16 %v203_v5 }
  0xa7   :  { %v5602_v21 = vcombine.high %v479_v10, %v483_v12  ;;  %v5601_v27 = vcombine.low %v479_v10, %v483_v12  ;;  %v233_v12 = vld [vmem:[#allocation5 + $0x370] sm:$0xff] }
  0xa8   :  { %v5604_v22 = vcombine.high %v480_v13, %v484_v14  ;;  %v5603_v28 = vcombine.low %v480_v13, %v484_v14  ;;  %v5643_v14 = vcombine.low %v520_v63, %v524_v0 }
  0xa9   :  { %2737 = vmatpush1.bf16.msra.mxu0 %v5545_v19  ;;  %2909 = vmatpush1.bf16.msra.mxu1 %v5547_v20  ;;  %v487_v19 = vunpack.c.l.s8.bf16 %v207_v15  ;;  %v491_v20 = vunpack.c.l.s8.bf16 %v209_v16 }
  0xaa   :  { %2738 = vmatprep.subr.bf16.mxu0 %v5554_v23  ;;  %2910 = vmatprep.subr.bf16.mxu1 %v5556_v24  ;;  %v488_v23 = vunpack.c.h.s8.bf16 %v207_v15  ;;  %v492_v24 = vunpack.c.h.s8.bf16 %v209_v16  ;;  %v539_v16 = vunpack.c.l.s8.bf16 %v233_v12 }
  0xab   :  { %v5609_v37 = vcombine.low %v487_v19, %v491_v20 }
  0xac   :  { %v5611_v38 = vcombine.low %v488_v23, %v492_v24 }
  0xad   :  { %2739 = vmatpush1.bf16.msra.mxu0 %v5553_v29  ;;  %2911 = vmatpush1.bf16.msra.mxu1 %v5555_v30  ;;  %v5610_v29 = vcombine.high %v487_v19, %v491_v20  ;;  %v495_v30 = vunpack.c.l.s8.bf16 %v211_v25  ;;  %v540_v20 = vunpack.c.h.s8.bf16 %v233_v12 }
  0xae   :  { %2740 = vmatprep.subr.bf16.mxu0 %v5562_v31  ;;  %2912 = vmatprep.subr.bf16.mxu1 %v5564_v33  ;;  %v5612_v31 = vcombine.high %v488_v23, %v492_v24  ;;  %v496_v33 = vunpack.c.h.s8.bf16 %v211_v25 }
  0xaf   :  { %v5618_v41 = vcombine.high %v495_v30, %v499_v32  ;;  %v5617_v47 = vcombine.low %v495_v30, %v499_v32  ;;  %v241_v32 = vld [vmem:[#allocation5 + $0x3b0] sm:$0xff] }
  0xb0   :  { %v5620_v42 = vcombine.high %v496_v33, %v500_v34  ;;  %v5619_v48 = vcombine.low %v496_v33, %v500_v34 }
  0xb1   :  { %2741 = vmatpush1.bf16.msra.mxu0 %v5561_v39  ;;  %2913 = vmatpush1.bf16.msra.mxu1 %v5563_v40  ;;  %v503_v39 = vunpack.c.l.s8.bf16 %v215_v35  ;;  %v507_v40 = vunpack.c.l.s8.bf16 %v217_v36 }
  0xb2   :  { %2753 = vmatprep.subr.bf16.mxu0 %v5570_v43  ;;  %2925 = vmatprep.subr.bf16.mxu1 %v5572_v44  ;;  %v504_v43 = vunpack.c.h.s8.bf16 %v215_v35  ;;  %v508_v44 = vunpack.c.h.s8.bf16 %v217_v36  ;;  %v555_v36 = vunpack.c.l.s8.bf16 %v241_v32 }
  0xb3   :  { %v5625_v57 = vcombine.low %v503_v39, %v507_v40 }
  0xb4   :  { %2743 = vmatmul.mubr.bf16.vlgmr.msra.gmra.mrb[0].mxu0 %v6041_v49  ;;  %2915 = vmatmul.mubr.bf16.vlgmr.msra.gmra.mrb[0].mxu1 %v6041_v49  ;;  %v5626_v49 = vcombine.high %v503_v39, %v507_v40  ;;  %v5627_v58 = vcombine.low %v504_v43, %v508_v44  ;;  %v556_v40 = vunpack.c.h.s8.bf16 %v241_v32 }
  0xb5   :  { %2754 = vmatpush1.bf16.msra.mxu0 %v5569_v50  ;;  %2926 = vmatpush1.bf16.msra.mxu1 %v5571_v51  ;;  %v511_v50 = vunpack.c.l.s8.bf16 %v219_v45  ;;  %v5628_v51 = vcombine.high %v504_v43, %v508_v44 }
  0xb6   :  { %2755 = vmatprep.subr.bf16.mxu0 %v5578_v52  ;;  %2927 = vmatprep.subr.bf16.mxu1 %v5580_v54  ;;  %v515_v52 = vunpack.c.l.s8.bf16 %v221_v46  ;;  %v516_v54 = vunpack.c.h.s8.bf16 %v221_v46 }
  0xb7   :  { %2785 = vmatprep.mubr.bf16.mxu0 %v6042_v60  ;;  %2957 = vmatprep.mubr.bf16.mxu1 %v6042_v60  ;;  %v523_v60 = vunpack.c.l.s8.bf16 %v225_v56 }
  0xb8   :  { %v5633_v3 = vcombine.low %v511_v50, %v515_v52  ;;  %v5635_v4 = vcombine.low %v512_v53, %v516_v54 }
  0xb9   :  { %2756 = vmatpush1.bf16.msra.mxu0 %v5577_v61  ;;  %2928 = vmatpush1.bf16.msra.mxu1 %v5579_v62  ;;  %v5634_v61 = vcombine.high %v511_v50, %v515_v52  ;;  %v5636_v62 = vcombine.high %v512_v53, %v516_v54  ;;  %v5642_v5 = vcombine.high %v519_v59, %v523_v60  ;;  %v249_v52 = vld [vmem:[#allocation5 + $0x3f0] sm:$0xff] }
  0xba   :  { %2757 = vmatprep.subr.bf16.mxu0 %v5586_v1  ;;  %2929 = vmatprep.subr.bf16.mxu1 %v5588_v2  ;;  %v227_v1 = vld [vmem:[#allocation5 + $0x340] sm:$0xff]  ;;  %v229_v2 = vld [vmem:[#allocation5 + $0x350] sm:$0xff]  ;;  %v5641_v13 = vcombine.low %v519_v59, %v523_v60  ;;  %v571_v56 = vunpack.c.l.s8.bf16 %v249_v52  ;;  %v572_v60 = vunpack.c.h.s8.bf16 %v249_v52 }
  0xbb   :  { %v527_v6 = vunpack.c.l.s8.bf16 %v227_v1  ;;  %v532_v10 = vunpack.c.h.s8.bf16 %v229_v2 }
  0xbd   :  { %2758 = vmatpush1.bf16.msra.mxu0 %v5585_v7  ;;  %2930 = vmatpush1.bf16.msra.mxu1 %v5587_v8  ;;  %v5644_v7 = vcombine.high %v520_v63, %v524_v0  ;;  %v531_v8 = vunpack.c.l.s8.bf16 %v229_v2 }
  0xbe   :  { %2759 = vmatprep.subr.bf16.mxu0 %v5594_v9  ;;  %2931 = vmatprep.subr.bf16.mxu1 %v5596_v11  ;;  %v528_v9 = vunpack.c.h.s8.bf16 %v227_v1  ;;  %v231_v11 = vld [vmem:[#allocation5 + $0x360] sm:$0xff] }
  0xbf   :  { %v535_v15 = vunpack.c.l.s8.bf16 %v231_v11  ;;  %v536_v19 = vunpack.c.h.s8.bf16 %v231_v11  ;;  %v5649_v23 = vcombine.low %v527_v6, %v531_v8 }
  0xc0   :  { %v5651_v24 = vcombine.low %v528_v9, %v532_v10 }
  0xc1   :  { %2760 = vmatpush1.bf16.msra.mxu0 %v5593_v17  ;;  %2932 = vmatpush1.bf16.msra.mxu1 %v5595_v18  ;;  %v5650_v17 = vcombine.high %v527_v6, %v531_v8  ;;  %v5652_v18 = vcombine.high %v528_v9, %v532_v10  ;;  %v5658_v25 = vcombine.high %v535_v15, %v539_v16  ;;  %v257_v8 = vld [vmem:[#allocation5 + $0x430] sm:$0xff] }
  0xc2   :  { %2761 = vmatprep.subr.bf16.mxu0 %v5602_v21  ;;  %2933 = vmatprep.subr.bf16.mxu1 %v5604_v22  ;;  %v235_v21 = vld [vmem:[#allocation5 + $0x380] sm:$0xff]  ;;  %v237_v22 = vld [vmem:[#allocation5 + $0x390] sm:$0xff]  ;;  %v5657_v33 = vcombine.low %v535_v15, %v539_v16  ;;  %v5659_v34 = vcombine.low %v536_v19, %v540_v20  ;;  %v587_v12 = vunpack.c.l.s8.bf16 %v257_v8  ;;  %v588_v16 = vunpack.c.h.s8.bf16 %v257_v8 }
  0xc3   :  { %v543_v26 = vunpack.c.l.s8.bf16 %v235_v21  ;;  %v548_v30 = vunpack.c.h.s8.bf16 %v237_v22 }
  0xc5   :  { %2762 = vmatpush1.bf16.msra.mxu0 %v5601_v27  ;;  %2934 = vmatpush1.bf16.msra.mxu1 %v5603_v28  ;;  %v5660_v27 = vcombine.high %v536_v19, %v540_v20  ;;  %v547_v28 = vunpack.c.l.s8.bf16 %v237_v22  ;;  %v6044_v19 = vld [vmem:[#allocation2 + $0x8] ss:$28 sps:$4 sm:$0xff]  }
  0xc6   :  { %2763 = vmatprep.subr.bf16.mxu0 %v5610_v29  ;;  %2935 = vmatprep.subr.bf16.mxu1 %v5612_v31  ;;  %v544_v29 = vunpack.c.h.s8.bf16 %v235_v21  ;;  %v239_v31 = vld [vmem:[#allocation5 + $0x3a0] sm:$0xff] }
  0xc7   :  { %v551_v35 = vunpack.c.l.s8.bf16 %v239_v31  ;;  %v552_v39 = vunpack.c.h.s8.bf16 %v239_v31  ;;  %v5665_v43 = vcombine.low %v543_v26, %v547_v28 }
  0xc8   :  { %v5667_v44 = vcombine.low %v544_v29, %v548_v30 }
  0xc9   :  { %2764 = vmatpush1.bf16.msra.mxu0 %v5609_v37  ;;  %2936 = vmatpush1.bf16.msra.mxu1 %v5611_v38  ;;  %v5666_v37 = vcombine.high %v543_v26, %v547_v28  ;;  %v5668_v38 = vcombine.high %v544_v29, %v548_v30  ;;  %v5674_v45 = vcombine.high %v551_v35, %v555_v36  ;;  %v263_v28 = vld [vmem:[#allocation5 + $0x460] sm:$0xff]  ;;  %v265_v29 = vld [vmem:[#allocation5 + $0x470] sm:$0xff]  ;;  %v6045_v30 = vld [vmem:[#allocation2 + $0x14] ss:$28 sps:$4 sm:$0xff]  }
  0xca   :  { %2765 = vmatprep.subr.bf16.mxu0 %v5618_v41  ;;  %2937 = vmatprep.subr.bf16.mxu1 %v5620_v42  ;;  %v243_v41 = vld [vmem:[#allocation5 + $0x3c0] sm:$0xff]  ;;  %v245_v42 = vld [vmem:[#allocation5 + $0x3d0] sm:$0xff]  ;;  %v5673_v53 = vcombine.low %v551_v35, %v555_v36  ;;  %v5675_v54 = vcombine.low %v552_v39, %v556_v40 }
  0xcb   :  { %v559_v46 = vunpack.c.l.s8.bf16 %v243_v41  ;;  %v564_v50 = vunpack.c.h.s8.bf16 %v245_v42 }
  0xcd   :  { %2766 = vmatpush1.bf16.msra.mxu0 %v5617_v47  ;;  %2938 = vmatpush1.bf16.msra.mxu1 %v5619_v48  ;;  %v5676_v47 = vcombine.high %v552_v39, %v556_v40  ;;  %v563_v48 = vunpack.c.l.s8.bf16 %v245_v42  ;;  %v267_v39 = vld [vmem:[#allocation5 + $0x480] sm:$0xff]  ;;  %v269_v40 = vld [vmem:[#allocation5 + $0x490] sm:$0xff] }
  0xce   :  { %2767 = vmatprep.subr.bf16.mxu0 %v5626_v49  ;;  %2939 = vmatprep.subr.bf16.mxu1 %v5628_v51  ;;  %v560_v49 = vunpack.c.h.s8.bf16 %v243_v41  ;;  %v247_v51 = vld [vmem:[#allocation5 + $0x3e0] sm:$0xff] }
  0xcf   :  { %v567_v55 = vunpack.c.l.s8.bf16 %v247_v51  ;;  %v568_v59 = vunpack.c.h.s8.bf16 %v247_v51  ;;  %v5681_v63 = vcombine.low %v559_v46, %v563_v48 }
  0xd0   :  { %v5683_v0 = vcombine.low %v560_v49, %v564_v50 }
  0xd1   :  { %2768 = vmatpush1.bf16.msra.mxu0 %v5625_v57  ;;  %2940 = vmatpush1.bf16.msra.mxu1 %v5627_v58  ;;  %v5682_v57 = vcombine.high %v559_v46, %v563_v48  ;;  %v5684_v58 = vcombine.high %v560_v49, %v564_v50  ;;  %v5690_v1 = vcombine.high %v567_v55, %v571_v56  ;;  %v611_v46 = vunpack.c.l.s8.bf16 %v269_v40  ;;  %v271_v49 = vld [vmem:[#allocation5 + $0x4a0] sm:$0xff]  ;;  %v273_v50 = vld [vmem:[#allocation5 + $0x4b0] sm:$0xff] }
  0xd2   :  { %2769 = vmatprep.subr.bf16.mxu0 %v5634_v61  ;;  %2941 = vmatprep.subr.bf16.mxu1 %v5636_v62  ;;  %v251_v61 = vld [vmem:[#allocation5 + $0x400] sm:$0xff]  ;;  %v253_v62 = vld [vmem:[#allocation5 + $0x410] sm:$0xff]  ;;  %v5689_v9 = vcombine.low %v567_v55, %v571_v56  ;;  %v5691_v10 = vcombine.low %v568_v59, %v572_v60  ;;  %v612_v48 = vunpack.c.h.s8.bf16 %v269_v40 }
  0xd3   :  { %v575_v2 = vunpack.c.l.s8.bf16 %v251_v61  ;;  %v580_v6 = vunpack.c.h.s8.bf16 %v253_v62 }
  0xd5   :  { %2770 = vmatpush1.bf16.msra.mxu0 %v5633_v3  ;;  %2942 = vmatpush1.bf16.msra.mxu1 %v5635_v4  ;;  %v5692_v3 = vcombine.high %v568_v59, %v572_v60  ;;  %v579_v4 = vunpack.c.l.s8.bf16 %v253_v62  ;;  %v275_v59 = vld [vmem:[#allocation5 + $0x4c0] sm:$0xff]  ;;  %v277_v60 = vld [vmem:[#allocation5 + $0x4d0] sm:$0xff] }
  0xd6   :  { %2771 = vmatprep.subr.bf16.mxu0 %v5642_v5  ;;  %2943 = vmatprep.subr.bf16.mxu1 %v5644_v7  ;;  %v576_v5 = vunpack.c.h.s8.bf16 %v251_v61  ;;  %v255_v7 = vld [vmem:[#allocation5 + $0x420] sm:$0xff] }
  0xd7   :  { %v583_v11 = vunpack.c.l.s8.bf16 %v255_v7  ;;  %v584_v15 = vunpack.c.h.s8.bf16 %v255_v7  ;;  %v5697_v20 = vcombine.low %v575_v2, %v579_v4 }
  0xd8   :  { %v5699_v21 = vcombine.low %v576_v5, %v580_v6 }
  0xd9   :  { %2772 = vmatpush1.bf16.msra.mxu0 %v5641_v13  ;;  %2944 = vmatpush1.bf16.msra.mxu1 %v5643_v14  ;;  %v5698_v13 = vcombine.high %v575_v2, %v579_v4  ;;  %v5700_v14 = vcombine.high %v576_v5, %v580_v6  ;;  %v5706_v22 = vcombine.high %v583_v11, %v587_v12  ;;  %v627_v2 = vunpack.c.l.s8.bf16 %v277_v60  ;;  %v279_v5 = vld [vmem:[#allocation5 + $0x4e0] sm:$0xff]  ;;  %v281_v6 = vld [vmem:[#allocation5 + $0x4f0] sm:$0xff] }
  0xda   :  { %2773 = vmatprep.subr.bf16.mxu0 %v5650_v17  ;;  %2945 = vmatprep.subr.bf16.mxu1 %v5652_v18  ;;  %v259_v17 = vld [vmem:[#allocation5 + $0x440] sm:$0xff]  ;;  %v261_v18 = vld [vmem:[#allocation5 + $0x450] sm:$0xff]  ;;  %v5705_v31 = vcombine.low %v583_v11, %v587_v12  ;;  %v5707_v32 = vcombine.low %v584_v15, %v588_v16  ;;  %v628_v4 = vunpack.c.h.s8.bf16 %v277_v60 }
  0xdb   :  { %v592_v26 = vunpack.c.h.s8.bf16 %v259_v17 }
  0xdd   :  { %2774 = vmatpush1.bf16.msra.mxu0 %v5649_v23  ;;  %2946 = vmatpush1.bf16.msra.mxu1 %v5651_v24  ;;  %v591_v23 = vunpack.c.l.s8.bf16 %v259_v17  ;;  %v5708_v24 = vcombine.high %v584_v15, %v588_v16  ;;  %v283_v15 = vld [vmem:[#allocation5 + $0x500] sm:$0xff]  ;;  %v285_v16 = vld [vmem:[#allocation5 + $0x510] sm:$0xff] }
  0xde   :  { %2775 = vmatprep.subr.bf16.mxu0 %v5658_v25  ;;  %2947 = vmatprep.subr.bf16.mxu1 %v5660_v27  ;;  %v595_v25 = vunpack.c.l.s8.bf16 %v261_v18  ;;  %v596_v27 = vunpack.c.h.s8.bf16 %v261_v18 }
  0xe0   :  { %v5714_v35 = vcombine.high %v591_v23, %v595_v25  ;;  %v5716_v36 = vcombine.high %v592_v26, %v596_v27  ;;  %v5713_v41 = vcombine.low %v591_v23, %v595_v25  ;;  %v5715_v42 = vcombine.low %v592_v26, %v596_v27  ;;  %v287_v25 = vld [vmem:[#allocation5 + $0x520] sm:$0xff]  ;;  %v289_v26 = vld [vmem:[#allocation5 + $0x530] sm:$0xff] }
  0xe1   :  { %2776 = vmatpush1.bf16.msra.mxu0 %v5657_v33  ;;  %2948 = vmatpush1.bf16.msra.mxu1 %v5659_v34  ;;  %v599_v33 = vunpack.c.l.s8.bf16 %v263_v28  ;;  %v603_v34 = vunpack.c.l.s8.bf16 %v265_v29  ;;  %v640_v23 = vunpack.c.h.s8.bf16 %v283_v15 }
  0xe2   :  { %2777 = vmatprep.subr.bf16.mxu0 %v5666_v37  ;;  %2949 = vmatprep.subr.bf16.mxu1 %v5668_v38  ;;  %v600_v37 = vunpack.c.h.s8.bf16 %v263_v28  ;;  %v604_v38 = vunpack.c.h.s8.bf16 %v265_v29  ;;  %v647_v29 = vunpack.c.l.s8.bf16 %v287_v25 }
  0xe3   :  { %v5721_v51 = vcombine.low %v599_v33, %v603_v34 }
  0xe4   :  { %v5723_v52 = vcombine.low %v600_v37, %v604_v38 }
  0xe5   :  { %2778 = vmatpush1.bf16.msra.mxu0 %v5665_v43  ;;  %2950 = vmatpush1.bf16.msra.mxu1 %v5667_v44  ;;  %v5722_v43 = vcombine.high %v599_v33, %v603_v34  ;;  %v607_v44 = vunpack.c.l.s8.bf16 %v267_v39  ;;  %v648_v33 = vunpack.c.h.s8.bf16 %v287_v25  ;;  %v652_v34 = vunpack.c.h.s8.bf16 %v289_v26 }
  0xe6   :  { %2779 = vmatprep.subr.bf16.mxu0 %v5674_v45  ;;  %2951 = vmatprep.subr.bf16.mxu1 %v5676_v47  ;;  %v5724_v45 = vcombine.high %v600_v37, %v604_v38  ;;  %v608_v47 = vunpack.c.h.s8.bf16 %v267_v39 }
  0xe7   :  { %v5730_v55 = vcombine.high %v607_v44, %v611_v46  ;;  %v5729_v61 = vcombine.low %v607_v44, %v611_v46  ;;  %v297_v46 = vld [vmem:[#allocation5 + $0x570] sm:$0xff] }
  0xe8   :  { %v5732_v56 = vcombine.high %v608_v47, %v612_v48  ;;  %v5731_v62 = vcombine.low %v608_v47, %v612_v48  ;;  %v5771_v48 = vcombine.low %v648_v33, %v652_v34 }
  0xe9   :  { %2780 = vmatpush1.bf16.msra.mxu0 %v5673_v53  ;;  %2952 = vmatpush1.bf16.msra.mxu1 %v5675_v54  ;;  %v615_v53 = vunpack.c.l.s8.bf16 %v271_v49  ;;  %v619_v54 = vunpack.c.l.s8.bf16 %v273_v50 }
  0xea   :  { %2781 = vmatprep.subr.bf16.mxu0 %v5682_v57  ;;  %2953 = vmatprep.subr.bf16.mxu1 %v5684_v58  ;;  %v616_v57 = vunpack.c.h.s8.bf16 %v271_v49  ;;  %v620_v58 = vunpack.c.h.s8.bf16 %v273_v50  ;;  %v667_v50 = vunpack.c.l.s8.bf16 %v297_v46 }
  0xeb   :  { %v5737_v7 = vcombine.low %v615_v53, %v619_v54 }
  0xec   :  { %v5739_v8 = vcombine.low %v616_v57, %v620_v58 }
  0xed   :  { %2782 = vmatpush1.bf16.msra.mxu0 %v5681_v63  ;;  %2954 = vmatpush1.bf16.msra.mxu1 %v5683_v0  ;;  %v5738_v63 = vcombine.high %v615_v53, %v619_v54  ;;  %v623_v0 = vunpack.c.l.s8.bf16 %v275_v59  ;;  %v668_v54 = vunpack.c.h.s8.bf16 %v297_v46 }
  0xee   :  { %2783 = vmatprep.subr.bf16.mxu0 %v5690_v1  ;;  %2955 = vmatprep.subr.bf16.mxu1 %v5692_v3  ;;  %v5740_v1 = vcombine.high %v616_v57, %v620_v58  ;;  %v624_v3 = vunpack.c.h.s8.bf16 %v275_v59 }
  0xef   :  { %v5746_v11 = vcombine.high %v623_v0, %v627_v2  ;;  %v5745_v17 = vcombine.low %v623_v0, %v627_v2  ;;  %v305_v2 = vld [vmem:[#allocation5 + $0x5b0] sm:$0xff] }
  0xf0   :  { %v5748_v12 = vcombine.high %v624_v3, %v628_v4  ;;  %v5747_v18 = vcombine.low %v624_v3, %v628_v4 }
  0xf1   :  { %2784 = vmatpush1.bf16.msra.mxu0 %v5689_v9  ;;  %2956 = vmatpush1.bf16.msra.mxu1 %v5691_v10  ;;  %v631_v9 = vunpack.c.l.s8.bf16 %v279_v5  ;;  %v635_v10 = vunpack.c.l.s8.bf16 %v281_v6 }
  0xf2   :  { %2796 = vmatprep.subr.bf16.mxu0 %v5698_v13  ;;  %2968 = vmatprep.subr.bf16.mxu1 %v5700_v14  ;;  %v632_v13 = vunpack.c.h.s8.bf16 %v279_v5  ;;  %v636_v14 = vunpack.c.h.s8.bf16 %v281_v6  ;;  %v683_v6 = vunpack.c.l.s8.bf16 %v305_v2 }
  0xf3   :  { %v5753_v27 = vcombine.low %v631_v9, %v635_v10 }
  0xf4   :  { %2786 = vmatmul.mubr.bf16.vlgmr.msra.gmra.mrb[0].mxu0 %v6044_v19  ;;  %2958 = vmatmul.mubr.bf16.vlgmr.msra.gmra.mrb[0].mxu1 %v6044_v19  ;;  %v5754_v19 = vcombine.high %v631_v9, %v635_v10  ;;  %v5755_v28 = vcombine.low %v632_v13, %v636_v14  ;;  %v684_v10 = vunpack.c.h.s8.bf16 %v305_v2 }
  0xf5   :  { %2797 = vmatpush1.bf16.msra.mxu0 %v5697_v20  ;;  %2969 = vmatpush1.bf16.msra.mxu1 %v5699_v21  ;;  %v639_v20 = vunpack.c.l.s8.bf16 %v283_v15  ;;  %v5756_v21 = vcombine.high %v632_v13, %v636_v14 }
  0xf6   :  { %2798 = vmatprep.subr.bf16.mxu0 %v5706_v22  ;;  %2970 = vmatprep.subr.bf16.mxu1 %v5708_v24  ;;  %v643_v22 = vunpack.c.l.s8.bf16 %v285_v16  ;;  %v644_v24 = vunpack.c.h.s8.bf16 %v285_v16 }
  0xf7   :  { %2828 = vmatprep.mubr.bf16.mxu0 %v6045_v30  ;;  %3000 = vmatprep.mubr.bf16.mxu1 %v6045_v30  ;;  %v651_v30 = vunpack.c.l.s8.bf16 %v289_v26 }
  0xf8   :  { %v5761_v37 = vcombine.low %v639_v20, %v643_v22  ;;  %v5763_v38 = vcombine.low %v640_v23, %v644_v24 }
  0xf9   :  { %2799 = vmatpush1.bf16.msra.mxu0 %v5705_v31  ;;  %2971 = vmatpush1.bf16.msra.mxu1 %v5707_v32  ;;  %v5762_v31 = vcombine.high %v639_v20, %v643_v22  ;;  %v5764_v32 = vcombine.high %v640_v23, %v644_v24  ;;  %v5770_v39 = vcombine.high %v647_v29, %v651_v30  ;;  %v313_v22 = vld [vmem:[#allocation5 + $0x5f0] sm:$0xff] }
  0xfa   :  { %2800 = vmatprep.subr.bf16.mxu0 %v5714_v35  ;;  %2972 = vmatprep.subr.bf16.mxu1 %v5716_v36  ;;  %v291_v35 = vld [vmem:[#allocation5 + $0x540] sm:$0xff]  ;;  %v293_v36 = vld [vmem:[#allocation5 + $0x550] sm:$0xff]  ;;  %v5769_v47 = vcombine.low %v647_v29, %v651_v30  ;;  %v699_v26 = vunpack.c.l.s8.bf16 %v313_v22  ;;  %v700_v30 = vunpack.c.h.s8.bf16 %v313_v22  ;;  %v6049_v22 = vld [vmem:[#allocation2 + $0x4] ss:$28 sps:$4 sm:$0xff]  }
  0xfb   :  { %v655_v40 = vunpack.c.l.s8.bf16 %v291_v35  ;;  %v660_v44 = vunpack.c.h.s8.bf16 %v293_v36 }
  0xfd   :  { %2801 = vmatpush1.bf16.msra.mxu0 %v5713_v41  ;;  %2973 = vmatpush1.bf16.msra.mxu1 %v5715_v42  ;;  %v5772_v41 = vcombine.high %v648_v33, %v652_v34  ;;  %v659_v42 = vunpack.c.l.s8.bf16 %v293_v36 }
  0xfe   :  { %2802 = vmatprep.subr.bf16.mxu0 %v5722_v43  ;;  %2974 = vmatprep.subr.bf16.mxu1 %v5724_v45  ;;  %v656_v43 = vunpack.c.h.s8.bf16 %v291_v35  ;;  %v295_v45 = vld [vmem:[#allocation5 + $0x560] sm:$0xff] }
  0xff   :  { %v663_v49 = vunpack.c.l.s8.bf16 %v295_v45  ;;  %v664_v53 = vunpack.c.h.s8.bf16 %v295_v45  ;;  %v5777_v57 = vcombine.low %v655_v40, %v659_v42 }
 0x100   :  { %v5779_v58 = vcombine.low %v656_v43, %v660_v44 }
 0x101   :  { %2803 = vmatpush1.bf16.msra.mxu0 %v5721_v51  ;;  %2975 = vmatpush1.bf16.msra.mxu1 %v5723_v52  ;;  %v5778_v51 = vcombine.high %v655_v40, %v659_v42  ;;  %v5780_v52 = vcombine.high %v656_v43, %v660_v44  ;;  %v5786_v59 = vcombine.high %v663_v49, %v667_v50  ;;  %v126_v42 = vld [vmem:[#allocation5 + $0x18] sm:$0xff] }
 0x102   :  { %2804 = vmatprep.subr.bf16.mxu0 %v5730_v55  ;;  %2976 = vmatprep.subr.bf16.mxu1 %v5732_v56  ;;  %v299_v55 = vld [vmem:[#allocation5 + $0x580] sm:$0xff]  ;;  %v301_v56 = vld [vmem:[#allocation5 + $0x590] sm:$0xff]  ;;  %v5785_v3 = vcombine.low %v663_v49, %v667_v50  ;;  %v5787_v4 = vcombine.low %v664_v53, %v668_v54  ;;  %v326_v50 = vunpack.c.h.s8.bf16 %v126_v42 }
 0x103   :  { %v671_v60 = vunpack.c.l.s8.bf16 %v299_v55  ;;  %v676_v0 = vunpack.c.h.s8.bf16 %v301_v56 }
 0x105   :  { %2805 = vmatpush1.bf16.msra.mxu0 %v5729_v61  ;;  %2977 = vmatpush1.bf16.msra.mxu1 %v5731_v62  ;;  %v5788_v61 = vcombine.high %v664_v53, %v668_v54  ;;  %v675_v62 = vunpack.c.l.s8.bf16 %v301_v56  ;;  %v6236_v56 = vmov 0  }
 0x106   :  { %2806 = vmatprep.subr.bf16.mxu0 %v5738_v63  ;;  %2978 = vmatprep.subr.bf16.mxu1 %v5740_v1  ;;  %v672_v63 = vunpack.c.h.s8.bf16 %v299_v55  ;;  %v303_v1 = vld [vmem:[#allocation5 + $0x5a0] sm:$0xff] }
 0x107   :  { %v679_v5 = vunpack.c.l.s8.bf16 %v303_v1  ;;  %v680_v9 = vunpack.c.h.s8.bf16 %v303_v1  ;;  %v5793_v13 = vcombine.low %v671_v60, %v675_v62  ;;  %v6048_v1 = vld [vmem:[#allocation2 + $0x18] ss:$28 sps:$4 sm:$0xff]  }
 0x108   :  { %v5795_v14 = vcombine.low %v672_v63, %v676_v0 }
 0x109   :  { %2807 = vmatpush1.bf16.msra.mxu0 %v5737_v7  ;;  %2979 = vmatpush1.bf16.msra.mxu1 %v5739_v8  ;;  %v5794_v7 = vcombine.high %v671_v60, %v675_v62  ;;  %v5796_v8 = vcombine.high %v672_v63, %v676_v0  ;;  %v5802_v15 = vcombine.high %v679_v5, %v683_v6  ;;  %v132_v63 = vld [vmem:[#allocation5 + $0x48] sm:$0xff]  ;;  %v134_v0 = vld [vmem:[#allocation5 + $0x58] sm:$0xff] }
 0x10a   :  { %2808 = vmatprep.subr.bf16.mxu0 %v5746_v11  ;;  %2980 = vmatprep.subr.bf16.mxu1 %v5748_v12  ;;  %v307_v11 = vld [vmem:[#allocation5 + $0x5c0] sm:$0xff]  ;;  %v309_v12 = vld [vmem:[#allocation5 + $0x5d0] sm:$0xff]  ;;  %v5801_v23 = vcombine.low %v679_v5, %v683_v6  ;;  %v5803_v24 = vcombine.low %v680_v9, %v684_v10  ;;  %v337_v5 = vunpack.c.l.s8.bf16 %v132_v63 }
 0x10b   :  { %v687_v16 = vunpack.c.l.s8.bf16 %v307_v11  ;;  %v692_v20 = vunpack.c.h.s8.bf16 %v309_v12 }
 0x10d   :  { %2809 = vmatpush1.bf16.msra.mxu0 %v5745_v17  ;;  %2981 = vmatpush1.bf16.msra.mxu1 %v5747_v18  ;;  %v5804_v17 = vcombine.high %v680_v9, %v684_v10  ;;  %v691_v18 = vunpack.c.l.s8.bf16 %v309_v12  ;;  %v342_v9 = vunpack.c.h.s8.bf16 %v134_v0  ;;  %v136_v10 = vld [vmem:[#allocation5 + $0x68] sm:$0xff] }
 0x10e   :  { %2810 = vmatprep.subr.bf16.mxu0 %v5754_v19  ;;  %2982 = vmatprep.subr.bf16.mxu1 %v5756_v21  ;;  %v688_v19 = vunpack.c.h.s8.bf16 %v307_v11  ;;  %v311_v21 = vld [vmem:[#allocation5 + $0x5e0] sm:$0xff]  ;;  %v138_v11 = vld [vmem:[#allocation5 + $0x78] sm:$0xff] }
 0x10f   :  { %v695_v25 = vunpack.c.l.s8.bf16 %v311_v21  ;;  %v696_v29 = vunpack.c.h.s8.bf16 %v311_v21  ;;  %v5809_v33 = vcombine.low %v687_v16, %v691_v18  ;;  %v142_v21 = vld [vmem:[#allocation5 + $0x98] sm:$0xff] }
 0x110   :  { %v5811_v34 = vcombine.low %v688_v19, %v692_v20 }
 0x111   :  { %2811 = vmatpush1.bf16.msra.mxu0 %v5753_v27  ;;  %2983 = vmatpush1.bf16.msra.mxu1 %v5755_v28  ;;  %v5810_v27 = vcombine.high %v687_v16, %v691_v18  ;;  %v5812_v28 = vcombine.high %v688_v19, %v692_v20  ;;  %v5818_v35 = vcombine.high %v695_v25, %v699_v26  ;;  %v346_v18 = vunpack.c.h.s8.bf16 %v136_v10  ;;  %v140_v20 = vld [vmem:[#allocation5 + $0x88] sm:$0xff] }
 0x112   :  { %2812 = vmatprep.subr.bf16.mxu0 %v5762_v31  ;;  %2984 = vmatprep.subr.bf16.mxu1 %v5764_v32  ;;  %v315_v31 = vld [vmem:[#allocation5 + $0x600] sm:$0xff]  ;;  %v317_v32 = vld [vmem:[#allocation5 + $0x610] sm:$0xff]  ;;  %v5817_v43 = vcombine.low %v695_v25, %v699_v26  ;;  %v5819_v44 = vcombine.low %v696_v29, %v700_v30  ;;  %v350_v19 = vunpack.c.h.s8.bf16 %v138_v11  ;;  %v353_v26 = vunpack.c.l.s8.bf16 %v140_v20 }
 0x113   :  { %v703_v36 = vunpack.c.l.s8.bf16 %v315_v31  ;;  %v708_v40 = vunpack.c.h.s8.bf16 %v317_v32 }
 0x115   :  { %2813 = vmatpush1.bf16.msra.mxu0 %v5761_v37  ;;  %2985 = vmatpush1.bf16.msra.mxu1 %v5763_v38  ;;  %v5820_v37 = vcombine.high %v696_v29, %v700_v30  ;;  %v707_v38 = vunpack.c.l.s8.bf16 %v317_v32  ;;  %v354_v29 = vunpack.c.h.s8.bf16 %v140_v20  ;;  %v358_v30 = vunpack.c.h.s8.bf16 %v142_v21  ;;  %v146_v32 = vld [vmem:[#allocation5 + $0xb8] sm:$0xff] }
 0x116   :  { %2814 = vmatprep.subr.bf16.mxu0 %v5770_v39  ;;  %2986 = vmatprep.subr.bf16.mxu1 %v5772_v41  ;;  %v704_v39 = vunpack.c.h.s8.bf16 %v315_v31  ;;  %v124_v41 = vld [vmem:[#allocation5 + $0x8] sm:$0xff] }
 0x117   :  { %v5826_v45 = vcombine.high %v703_v36, %v707_v38  ;;  %v322_v49 = vunpack.c.h.s8.bf16 %v124_v41  ;;  %v144_v31 = vld [vmem:[#allocation5 + $0xa8] sm:$0xff] }
 0x118   :  { %v5828_v46 = vcombine.high %v704_v39, %v708_v40  ;;  %v5827_v53 = vcombine.low %v704_v39, %v708_v40  ;;  %v362_v39 = vunpack.c.h.s8.bf16 %v144_v31  ;;  %v366_v40 = vunpack.c.h.s8.bf16 %v146_v32 }
 0x119   :  { %2815 = vmatpush1.bf16.msra.mxu0 %v5769_v47  ;;  %2987 = vmatpush1.bf16.msra.mxu1 %v5771_v48  ;;  %v321_v47 = vunpack.c.l.s8.bf16 %v124_v41  ;;  %v325_v48 = vunpack.c.l.s8.bf16 %v126_v42  ;;  %v5448_v55 = vcombine.high %v322_v49, %v326_v50  ;;  %v148_v41 = vld [vmem:[#allocation5 + $0xc8] sm:$0xff]  ;;  %v150_v42 = vld [vmem:[#allocation5 + $0xd8] sm:$0xff] }
 0x11a   :  { %2816 = vmatprep.subr.bf16.mxu0 %v5778_v51  ;;  %2988 = vmatprep.subr.bf16.mxu1 %v5780_v52  ;;  %v6047_v51 = vld [vmem:[#allocation2 + $0x10] ss:$28 sps:$4 sm:$0xff]   ;;  %v5825_v52 = vcombine.low %v703_v36, %v707_v38  ;;  %v365_v36 = vunpack.c.l.s8.bf16 %v146_v32  ;;  %v5480_v38 = vcombine.high %v354_v29, %v358_v30 }
 0x11b   :  { %v5446_v54 = vcombine.high %v321_v47, %v325_v48  ;;  %v5445_v2 = vcombine.low %v321_v47, %v325_v48  ;;  %v5488_v47 = vcombine.high %v362_v39, %v366_v40  ;;  %v373_v48 = vunpack.c.l.s8.bf16 %v150_v42 }
 0x11d   :  { %2817 = vmatpush1.bf16.msra.mxu0 %v5777_v57  ;;  %2989 = vmatpush1.bf16.msra.mxu1 %v5779_v58  ;;  %v128_v57 = vld [vmem:[#allocation5 + $0x28] sm:$0xff]  ;;  %v130_v58 = vld [vmem:[#allocation5 + $0x38] sm:$0xff] }
 0x11e   :  { %2818 = vmatprep.subr.bf16.mxu0 %v5786_v59  ;;  %2990 = vmatprep.subr.bf16.mxu1 %v5788_v61  ;;  %v329_v59 = vunpack.c.l.s8.bf16 %v128_v57  ;;  %v333_v60 = vunpack.c.l.s8.bf16 %v130_v58  ;;  %v330_v61 = vunpack.c.h.s8.bf16 %v128_v57  ;;  %v334_v62 = vunpack.c.h.s8.bf16 %v130_v58 }
 0x120   :  { %v5456_v6 = vcombine.high %v330_v61, %v334_v62  ;;  %v5453_v12 = vcombine.low %v329_v59, %v333_v60 }
 0x121   :  { %2819 = vmatpush1.bf16.msra.mxu0 %v5785_v3  ;;  %2991 = vmatpush1.bf16.msra.mxu1 %v5787_v4  ;;  %v5447_v3 = vcombine.low %v322_v49, %v326_v50  ;;  %v5454_v4 = vcombine.high %v329_v59, %v333_v60  ;;  %v370_v49 = vunpack.c.h.s8.bf16 %v148_v41  ;;  %v374_v50 = vunpack.c.h.s8.bf16 %v150_v42 }
 0x122   :  { %2820 = vmatprep.subr.bf16.mxu0 %v5794_v7  ;;  %2992 = vmatprep.subr.bf16.mxu1 %v5796_v8  ;;  %v341_v7 = vunpack.c.l.s8.bf16 %v134_v0  ;;  %v338_v8 = vunpack.c.h.s8.bf16 %v132_v63  ;;  %v158_v63 = vld [vmem:[#allocation5 + $0x118] sm:$0xff] }
 0x123   :  { %v5496_v59 = vcombine.high %v370_v49, %v374_v50 }
 0x124   :  { %v5462_v16 = vcombine.high %v337_v5, %v341_v7 }
 0x125   :  { %2821 = vmatpush1.bf16.msra.mxu0 %v5793_v13  ;;  %2993 = vmatpush1.bf16.msra.mxu1 %v5795_v14  ;;  %v5455_v13 = vcombine.low %v330_v61, %v334_v62  ;;  %v345_v14 = vunpack.c.l.s8.bf16 %v136_v10  ;;  %v156_v62 = vld [vmem:[#allocation5 + $0x108] sm:$0xff] }
 0x126   :  { %2822 = vmatprep.subr.bf16.mxu0 %v5802_v15  ;;  %2994 = vmatprep.subr.bf16.mxu1 %v5804_v17  ;;  %v349_v15 = vunpack.c.l.s8.bf16 %v138_v11  ;;  %v5464_v17 = vcombine.high %v338_v8, %v342_v9 }
 0x128   :  { %v5470_v25 = vcombine.high %v345_v14, %v349_v15 }
 0x129   :  { %2823 = vmatpush1.bf16.msra.mxu0 %v5801_v23  ;;  %2995 = vmatpush1.bf16.msra.mxu1 %v5803_v24  ;;  %v5461_v23 = vcombine.low %v337_v5, %v341_v7  ;;  %v5463_v24 = vcombine.low %v338_v8, %v342_v9  ;;  %v389_v5 = vunpack.c.l.s8.bf16 %v158_v63  ;;  %v390_v7 = vunpack.c.h.s8.bf16 %v158_v63  ;;  %v160_v8 = vld [vmem:[#allocation5 + $0x128] sm:$0xff]  ;;  %v162_v9 = vld [vmem:[#allocation5 + $0x138] sm:$0xff] }
 0x12a   :  { %2824 = vmatprep.subr.bf16.mxu0 %v5810_v27  ;;  %2996 = vmatprep.subr.bf16.mxu1 %v5812_v28  ;;  %v5472_v27 = vcombine.high %v346_v18, %v350_v19  ;;  %v357_v28 = vunpack.c.l.s8.bf16 %v142_v21 }
 0x12d   :  { %2825 = vmatpush1.bf16.msra.mxu0 %v5809_v33  ;;  %2997 = vmatpush1.bf16.msra.mxu1 %v5811_v34  ;;  %v5469_v33 = vcombine.low %v345_v14, %v349_v15  ;;  %v5471_v34 = vcombine.low %v346_v18, %v350_v19  ;;  %v164_v18 = vld [vmem:[#allocation5 + $0x148] sm:$0xff]  ;;  %v166_v19 = vld [vmem:[#allocation5 + $0x158] sm:$0xff] }
 0x12e   :  { %2826 = vmatprep.subr.bf16.mxu0 %v5818_v35  ;;  %2998 = vmatprep.subr.bf16.mxu1 %v5820_v37  ;;  %v361_v35 = vunpack.c.l.s8.bf16 %v144_v31  ;;  %v5478_v37 = vcombine.high %v353_v26, %v357_v28 }
 0x131   :  { %2827 = vmatpush1.bf16.msra.mxu0 %v5817_v43  ;;  %2999 = vmatpush1.bf16.msra.mxu1 %v5819_v44  ;;  %v5477_v43 = vcombine.low %v353_v26, %v357_v28  ;;  %v5479_v44 = vcombine.low %v354_v29, %v358_v30  ;;  %v402_v26 = vunpack.c.h.s8.bf16 %v164_v18  ;;  %v168_v28 = vld [vmem:[#allocation5 + $0x168] sm:$0xff]  ;;  %v170_v29 = vld [vmem:[#allocation5 + $0x178] sm:$0xff] }
 0x132   :  { %2839 = vmatprep.subr.bf16.mxu0 %v5826_v45  ;;  %3011 = vmatprep.subr.bf16.mxu1 %v5828_v46  ;;  %v5486_v45 = vcombine.high %v361_v35, %v365_v36  ;;  %v369_v46 = vunpack.c.l.s8.bf16 %v148_v41  ;;  %v409_v32 = vunpack.c.l.s8.bf16 %v168_v28 }
 0x134   :  { %2829 = vmatmul.mubr.bf16.vlgmr.msra.gmra.mrb[0].mxu0 %v6047_v51  ;;  %3001 = vmatmul.mubr.bf16.vlgmr.msra.gmra.mrb[0].mxu1 %v6047_v51  ;;  %v152_v51 = vld [vmem:[#allocation5 + $0xe8] sm:$0xff]  ;;  %v5494_v58 = vcombine.high %v369_v46, %v373_v48  ;;  %v5493_v0 = vcombine.low %v369_v46, %v373_v48 }
 0x135   :  { %2840 = vmatpush1.bf16.msra.mxu0 %v5825_v52  ;;  %3012 = vmatpush1.bf16.msra.mxu1 %v5827_v53  ;;  %v154_v52 = vld [vmem:[#allocation5 + $0xf8] sm:$0xff]  ;;  %v5485_v53 = vcombine.low %v361_v35, %v365_v36  ;;  %v378_v60 = vunpack.c.h.s8.bf16 %v152_v51  ;;  %v414_v35 = vunpack.c.h.s8.bf16 %v170_v29  ;;  %v176_v48 = vld [vmem:[#allocation5 + $0x1a8] sm:$0xff] }
 0x136   :  { %2871 = vmatprep.mubr.bf16.mxu0 %v6236_v56  ;;  %3043 = vmatprep.mubr.bf16.mxu1 %v6236_v56  ;;  %v381_v57 = vunpack.c.l.s8.bf16 %v154_v52  ;;  %v382_v61 = vunpack.c.h.s8.bf16 %v154_v52  ;;  %v425_v52 = vunpack.c.l.s8.bf16 %v176_v48 }
 0x137   :  { %3054 = vmatprep.subr.bf16.mxu0 %v5446_v54  ;;  %3226 = vmatprep.subr.bf16.mxu1 %v5448_v55  ;;  %v5487_v54 = vcombine.low %v362_v39, %v366_v40  ;;  %v377_v55 = vunpack.c.l.s8.bf16 %v152_v51  ;;  %v174_v39 = vld [vmem:[#allocation5 + $0x198] sm:$0xff] }
 0x138   :  { %v5503_v11 = vcombine.low %v378_v60, %v382_v61 }
 0x139   :  { %v5501_v10 = vcombine.low %v377_v55, %v381_v57 }
 0x140   :  { %5833 = vmatmul.mubr.msk.bf16.vlgmr.msra.gmra.mrb[0].mxu0 %vm2706_vm0, %v6048_v1  ;;  %5834 = vmatmul.mubr.msk.bf16.vlgmr.msra.gmra.mrb[0].mxu1 %vm2706_vm0, %v6048_v1  ;;  %v5495_v1 = vcombine.low %v370_v49, %v374_v50  ;;  %v178_v49 = vld [vmem:[#allocation5 + $0x1b8] sm:$0xff] }
 0x141   :  { %3055 = vmatpush1.bf16.msra.mxu0 %v5445_v2  ;;  %3227 = vmatpush1.bf16.msra.mxu1 %v5447_v3  ;;  %v5502_v2 = vcombine.high %v377_v55, %v381_v57  ;;  %v385_v3 = vunpack.c.l.s8.bf16 %v156_v62  ;;  %v430_v55 = vunpack.c.h.s8.bf16 %v178_v49 }
 0x142   :  { %3056 = vmatprep.subr.bf16.mxu0 %v5454_v4  ;;  %3228 = vmatprep.subr.bf16.mxu1 %v5456_v6  ;;  %v5504_v4 = vcombine.high %v378_v60, %v382_v61  ;;  %v386_v6 = vunpack.c.h.s8.bf16 %v156_v62  ;;  %v182_v60 = vld [vmem:[#allocation5 + $0x1d8] sm:$0xff] }
 0x143   :  { %3086 = vmatprep.mubr.bf16.mxu0 %v6049_v22  ;;  %3258 = vmatprep.mubr.bf16.mxu1 %v6049_v22  ;;  %v5510_v14 = vcombine.high %v385_v3, %v389_v5  ;;  %v5509_v20 = vcombine.low %v385_v3, %v389_v5  ;;  %v184_v5 = vld [vmem:[#allocation5 + $0x1e8] sm:$0xff] }
 0x144   :  { %v5512_v15 = vcombine.high %v386_v6, %v390_v7  ;;  %v5511_v21 = vcombine.low %v386_v6, %v390_v7  ;;  %v186_v6 = vld [vmem:[#allocation5 + $0x1f8] sm:$0xff] }
 0x145   :  { %3057 = vmatpush1.bf16.msra.mxu0 %v5453_v12  ;;  %3229 = vmatpush1.bf16.msra.mxu1 %v5455_v13  ;;  %v393_v12 = vunpack.c.l.s8.bf16 %v160_v8  ;;  %v397_v13 = vunpack.c.l.s8.bf16 %v162_v9 }
 0x146   :  { %3058 = vmatprep.subr.bf16.mxu0 %v5462_v16  ;;  %3230 = vmatprep.subr.bf16.mxu1 %v5464_v17  ;;  %v394_v16 = vunpack.c.h.s8.bf16 %v160_v8  ;;  %v398_v17 = vunpack.c.h.s8.bf16 %v162_v9  ;;  %v441_v9 = vunpack.c.l.s8.bf16 %v184_v5 }
 0x147   :  { %v5518_v22 = vcombine.high %v393_v12, %v397_v13  ;;  %v5517_v30 = vcombine.low %v393_v12, %v397_v13  ;;  %v446_v12 = vunpack.c.h.s8.bf16 %v186_v6 }
 0x148   :  { %v5519_v31 = vcombine.low %v394_v16, %v398_v17 }
 0x149   :  { %3059 = vmatpush1.bf16.msra.mxu0 %v5461_v23  ;;  %3231 = vmatpush1.bf16.msra.mxu1 %v5463_v24  ;;  %v401_v23 = vunpack.c.l.s8.bf16 %v164_v18  ;;  %v5520_v24 = vcombine.high %v394_v16, %v398_v17  ;;  %v190_v16 = vld [vmem:[#allocation5 + $0x218] sm:$0xff] }
 0x14a   :  { %3060 = vmatprep.subr.bf16.mxu0 %v5470_v25  ;;  %3232 = vmatprep.subr.bf16.mxu1 %v5472_v27  ;;  %v405_v25 = vunpack.c.l.s8.bf16 %v166_v19  ;;  %v406_v27 = vunpack.c.h.s8.bf16 %v166_v19 }
 0x14c   :  { %v5526_v36 = vcombine.high %v401_v23, %v405_v25  ;;  %v5525_v40 = vcombine.low %v401_v23, %v405_v25  ;;  %v5527_v41 = vcombine.low %v402_v26, %v406_v27  ;;  %v192_v25 = vld [vmem:[#allocation5 + $0x228] sm:$0xff] }
 0x14d   :  { %3061 = vmatpush1.bf16.msra.mxu0 %v5469_v33  ;;  %3233 = vmatpush1.bf16.msra.mxu1 %v5471_v34  ;;  %v413_v33 = vunpack.c.l.s8.bf16 %v170_v29  ;;  %v410_v34 = vunpack.c.h.s8.bf16 %v168_v28  ;;  %v457_v29 = vunpack.c.l.s8.bf16 %v192_v25 }
 0x14e   :  { %3062 = vmatprep.subr.bf16.mxu0 %v5478_v37  ;;  %3234 = vmatprep.subr.bf16.mxu1 %v5480_v38  ;;  %v5528_v37 = vcombine.high %v402_v26, %v406_v27  ;;  %v172_v38 = vld [vmem:[#allocation5 + $0x188] sm:$0xff]  ;;  %v194_v26 = vld [vmem:[#allocation5 + $0x238] sm:$0xff] }
 0x14f   :  { %v5534_v42 = vcombine.high %v409_v32, %v413_v33  ;;  %v418_v46 = vunpack.c.h.s8.bf16 %v172_v38  ;;  %v5533_v50 = vcombine.low %v409_v32, %v413_v33  ;;  %v5535_v51 = vcombine.low %v410_v34, %v414_v35 }
 0x150   :  { %v462_v32 = vunpack.c.h.s8.bf16 %v194_v26 }
 0x151   :  { %3063 = vmatpush1.bf16.msra.mxu0 %v5477_v43  ;;  %3235 = vmatpush1.bf16.msra.mxu1 %v5479_v44  ;;  %v5536_v43 = vcombine.high %v410_v34, %v414_v35  ;;  %v417_v44 = vunpack.c.l.s8.bf16 %v172_v38  ;;  %v196_v35 = vld [vmem:[#allocation5 + $0x248] sm:$0xff] }
 0x152   :  { %3064 = vmatprep.subr.bf16.mxu0 %v5486_v45  ;;  %3236 = vmatprep.subr.bf16.mxu1 %v5488_v47  ;;  %v421_v45 = vunpack.c.l.s8.bf16 %v174_v39  ;;  %v422_v47 = vunpack.c.h.s8.bf16 %v174_v39 }
 0x154   :  { %v5542_v57 = vcombine.high %v417_v44, %v421_v45  ;;  %v5541_v61 = vcombine.low %v417_v44, %v421_v45  ;;  %v5543_v62 = vcombine.low %v418_v46, %v422_v47  ;;  %v200_v45 = vld [vmem:[#allocation5 + $0x268] sm:$0xff] }
 0x155   :  { %3065 = vmatpush1.bf16.msra.mxu0 %v5485_v53  ;;  %3237 = vmatpush1.bf16.msra.mxu1 %v5487_v54  ;;  %v429_v53 = vunpack.c.l.s8.bf16 %v178_v49  ;;  %v426_v54 = vunpack.c.h.s8.bf16 %v176_v48 }
 0x156   :  { %3066 = vmatprep.subr.bf16.mxu0 %v5494_v58  ;;  %3238 = vmatprep.subr.bf16.mxu1 %v5496_v59  ;;  %v5544_v58 = vcombine.high %v418_v46, %v422_v47  ;;  %v180_v59 = vld [vmem:[#allocation5 + $0x1c8] sm:$0xff]  ;;  %v202_v46 = vld [vmem:[#allocation5 + $0x278] sm:$0xff] }
 0x157   :  { %v5550_v63 = vcombine.high %v425_v52, %v429_v53  ;;  %v434_v3 = vunpack.c.h.s8.bf16 %v180_v59  ;;  %v5549_v7 = vcombine.low %v425_v52, %v429_v53  ;;  %v5551_v8 = vcombine.low %v426_v54, %v430_v55  ;;  %v6050_v47 = vld [vmem:[#allocation2] ss:$28 sps:$4 sm:$0xff]  }
 0x158   :  { %v474_v52 = vunpack.c.h.s8.bf16 %v200_v45  ;;  %v478_v53 = vunpack.c.h.s8.bf16 %v202_v46 }
 0x159   :  { %3067 = vmatpush1.bf16.msra.mxu0 %v5493_v0  ;;  %3239 = vmatpush1.bf16.msra.mxu1 %v5495_v1  ;;  %v5552_v0 = vcombine.high %v426_v54, %v430_v55  ;;  %v433_v1 = vunpack.c.l.s8.bf16 %v180_v59  ;;  %v6051_v59 = vld [vmem:[#allocation2 + $0xc] ss:$28 sps:$4 sm:$0xff]  }
 0x15a   :  { %3068 = vmatprep.subr.bf16.mxu0 %v5502_v2  ;;  %3240 = vmatprep.subr.bf16.mxu1 %v5504_v4  ;;  %v437_v2 = vunpack.c.l.s8.bf16 %v182_v60  ;;  %v438_v4 = vunpack.c.h.s8.bf16 %v182_v60 }
 0x15c   :  { %v5558_v13 = vcombine.high %v433_v1, %v437_v2  ;;  %v5557_v17 = vcombine.low %v433_v1, %v437_v2  ;;  %v5559_v18 = vcombine.low %v434_v3, %v438_v4 }
 0x15d   :  { %3069 = vmatpush1.bf16.msra.mxu0 %v5501_v10  ;;  %3241 = vmatpush1.bf16.msra.mxu1 %v5503_v11  ;;  %v445_v10 = vunpack.c.l.s8.bf16 %v186_v6  ;;  %v442_v11 = vunpack.c.h.s8.bf16 %v184_v5  ;;  %v210_v5 = vld [vmem:[#allocation5 + $0x2b8] sm:$0xff] }
 0x15e   :  { %3070 = vmatprep.subr.bf16.mxu0 %v5510_v14  ;;  %3242 = vmatprep.subr.bf16.mxu1 %v5512_v15  ;;  %v5560_v14 = vcombine.high %v434_v3, %v438_v4  ;;  %v188_v15 = vld [vmem:[#allocation5 + $0x208] sm:$0xff] }
 0x15f   :  { %v5566_v19 = vcombine.high %v441_v9, %v445_v10  ;;  %v450_v23 = vunpack.c.h.s8.bf16 %v188_v15  ;;  %v5565_v27 = vcombine.low %v441_v9, %v445_v10  ;;  %v5567_v28 = vcombine.low %v442_v11, %v446_v12  ;;  %v208_v4 = vld [vmem:[#allocation5 + $0x2a8] sm:$0xff] }
 0x160   :  { %v493_v9 = vunpack.c.l.s8.bf16 %v210_v5  ;;  %v490_v10 = vunpack.c.h.s8.bf16 %v208_v4 }
 0x161   :  { %3071 = vmatpush1.bf16.msra.mxu0 %v5509_v20  ;;  %3243 = vmatpush1.bf16.msra.mxu1 %v5511_v21  ;;  %v5568_v20 = vcombine.high %v442_v11, %v446_v12  ;;  %v449_v21 = vunpack.c.l.s8.bf16 %v188_v15  ;;  %v494_v11 = vunpack.c.h.s8.bf16 %v210_v5  ;;  %v214_v15 = vld [vmem:[#allocation5 + $0x2d8] sm:$0xff] }
 0x162   :  { %3072 = vmatprep.subr.bf16.mxu0 %v5518_v22  ;;  %3244 = vmatprep.subr.bf16.mxu1 %v5520_v24  ;;  %v453_v22 = vunpack.c.l.s8.bf16 %v190_v16  ;;  %v454_v24 = vunpack.c.h.s8.bf16 %v190_v16 }
 0x164   :  { %v5574_v33 = vcombine.high %v449_v21, %v453_v22  ;;  %v5576_v34 = vcombine.high %v450_v23, %v454_v24  ;;  %v5575_v38 = vcombine.low %v450_v23, %v454_v24  ;;  %v502_v23 = vunpack.c.h.s8.bf16 %v214_v15  ;;  %v216_v24 = vld [vmem:[#allocation5 + $0x2e8] sm:$0xff] }
 0x165   :  { %3073 = vmatpush1.bf16.msra.mxu0 %v5517_v30  ;;  %3245 = vmatpush1.bf16.msra.mxu1 %v5519_v31  ;;  %v461_v30 = vunpack.c.l.s8.bf16 %v194_v26  ;;  %v458_v31 = vunpack.c.h.s8.bf16 %v192_v25  ;;  %v218_v25 = vld [vmem:[#allocation5 + $0x2f8] sm:$0xff] }
 0x166   :  { %3074 = vmatprep.subr.bf16.mxu0 %v5526_v36  ;;  %3246 = vmatprep.subr.bf16.mxu1 %v5528_v37  ;;  %v198_v36 = vld [vmem:[#allocation5 + $0x258] sm:$0xff]  ;;  %v5573_v37 = vcombine.low %v449_v21, %v453_v22  ;;  %v501_v21 = vunpack.c.l.s8.bf16 %v214_v15 }
 0x167   :  { %v5582_v39 = vcombine.high %v457_v29, %v461_v30  ;;  %v470_v44 = vunpack.c.h.s8.bf16 %v198_v36  ;;  %v5581_v48 = vcombine.low %v457_v29, %v461_v30  ;;  %v5583_v49 = vcombine.low %v458_v31, %v462_v32 }
 0x168   :  { %v509_v29 = vunpack.c.l.s8.bf16 %v218_v25  ;;  %v506_v30 = vunpack.c.h.s8.bf16 %v216_v24 }
 0x169   :  { %3075 = vmatpush1.bf16.msra.mxu0 %v5525_v40  ;;  %3247 = vmatpush1.bf16.msra.mxu1 %v5527_v41  ;;  %v5584_v40 = vcombine.high %v458_v31, %v462_v32  ;;  %v465_v41 = vunpack.c.l.s8.bf16 %v196_v35  ;;  %v510_v31 = vunpack.c.h.s8.bf16 %v218_v25 }
 0x16a   :  { %3076 = vmatprep.subr.bf16.mxu0 %v5534_v42  ;;  %3248 = vmatprep.subr.bf16.mxu1 %v5536_v43  ;;  %v469_v42 = vunpack.c.l.s8.bf16 %v198_v36  ;;  %v466_v43 = vunpack.c.h.s8.bf16 %v196_v35  ;;  %v222_v35 = vld [vmem:[#allocation5 + $0x318] sm:$0xff] }
 0x16c   :  { %v5590_v54 = vcombine.high %v465_v41, %v469_v42  ;;  %v5592_v55 = vcombine.high %v466_v43, %v470_v44  ;;  %v5589_v60 = vcombine.low %v465_v41, %v469_v42  ;;  %v517_v41 = vunpack.c.l.s8.bf16 %v222_v35 }
 0x16d   :  { %3077 = vmatpush1.bf16.msra.mxu0 %v5533_v50  ;;  %3249 = vmatpush1.bf16.msra.mxu1 %v5535_v51  ;;  %v473_v50 = vunpack.c.l.s8.bf16 %v200_v45  ;;  %v477_v51 = vunpack.c.l.s8.bf16 %v202_v46  ;;  %v226_v45 = vld [vmem:[#allocation5 + $0x338] sm:$0xff] }
 0x16e   :  { %3078 = vmatprep.subr.bf16.mxu0 %v5542_v57  ;;  %3250 = vmatprep.subr.bf16.mxu1 %v5544_v58  ;;  %v204_v57 = vld [vmem:[#allocation5 + $0x288] sm:$0xff]  ;;  %v206_v58 = vld [vmem:[#allocation5 + $0x298] sm:$0xff] }
 0x16f   :  { %v485_v1 = vunpack.c.l.s8.bf16 %v206_v58  ;;  %v482_v2 = vunpack.c.h.s8.bf16 %v204_v57  ;;  %v486_v3 = vunpack.c.h.s8.bf16 %v206_v58  ;;  %v5597_v6 = vcombine.low %v473_v50, %v477_v51 }
 0x171   :  { %3079 = vmatpush1.bf16.msra.mxu0 %v5541_v61  ;;  %3251 = vmatpush1.bf16.msra.mxu1 %v5543_v62  ;;  %v5591_v61 = vcombine.low %v466_v43, %v470_v44  ;;  %v5598_v62 = vcombine.high %v473_v50, %v477_v51  ;;  %v518_v43 = vunpack.c.h.s8.bf16 %v222_v35  ;;  %v224_v44 = vld [vmem:[#allocation5 + $0x328] sm:$0xff]  ;;  %v526_v51 = vunpack.c.h.s8.bf16 %v226_v45 }
 0x172   :  { %3080 = vmatprep.subr.bf16.mxu0 %v5550_v63  ;;  %3252 = vmatprep.subr.bf16.mxu1 %v5552_v0  ;;  %v5600_v63 = vcombine.high %v474_v52, %v478_v53  ;;  %v481_v0 = vunpack.c.l.s8.bf16 %v204_v57  ;;  %v522_v50 = vunpack.c.h.s8.bf16 %v224_v44 }
 0x174   :  { %v5606_v12 = vcombine.high %v481_v0, %v485_v1  ;;  %v5605_v16 = vcombine.low %v481_v0, %v485_v1  ;;  %v232_v1 = vld [vmem:[#allocation5 + $0x368] sm:$0xff] }
 0x175   :  { %3081 = vmatpush1.bf16.msra.mxu0 %v5549_v7  ;;  %3253 = vmatpush1.bf16.msra.mxu1 %v5551_v8  ;;  %v5599_v7 = vcombine.low %v474_v52, %v478_v53  ;;  %v489_v8 = vunpack.c.l.s8.bf16 %v208_v4  ;;  %v5647_v4 = vcombine.low %v522_v50, %v526_v51  ;;  %v537_v5 = vunpack.c.l.s8.bf16 %v232_v1 }
 0x176   :  { %3082 = vmatprep.subr.bf16.mxu0 %v5558_v13  ;;  %3254 = vmatprep.subr.bf16.mxu1 %v5560_v14  ;;  %v5608_v13 = vcombine.high %v482_v2, %v486_v3  ;;  %v212_v14 = vld [vmem:[#allocation5 + $0x2c8] sm:$0xff] }
 0x177   :  { %v498_v22 = vunpack.c.h.s8.bf16 %v212_v14  ;;  %v5613_v26 = vcombine.low %v489_v8, %v493_v9 }
 0x179   :  { %3083 = vmatpush1.bf16.msra.mxu0 %v5557_v17  ;;  %3255 = vmatpush1.bf16.msra.mxu1 %v5559_v18  ;;  %v5607_v17 = vcombine.low %v482_v2, %v486_v3  ;;  %v5614_v18 = vcombine.high %v489_v8, %v493_v9  ;;  %v234_v2 = vld [vmem:[#allocation5 + $0x378] sm:$0xff] }
 0x17a   :  { %3084 = vmatprep.subr.bf16.mxu0 %v5566_v19  ;;  %3256 = vmatprep.subr.bf16.mxu1 %v5568_v20  ;;  %v5616_v19 = vcombine.high %v490_v10, %v494_v11  ;;  %v497_v20 = vunpack.c.l.s8.bf16 %v212_v14  ;;  %v542_v8 = vunpack.c.h.s8.bf16 %v234_v2 }
 0x17c   :  { %v5622_v32 = vcombine.high %v497_v20, %v501_v21  ;;  %v5621_v36 = vcombine.low %v497_v20, %v501_v21  ;;  %v240_v21 = vld [vmem:[#allocation5 + $0x3a8] sm:$0xff] }
 0x17d   :  { %3085 = vmatpush1.bf16.msra.mxu0 %v5565_v27  ;;  %3257 = vmatpush1.bf16.msra.mxu1 %v5567_v28  ;;  %v5615_v27 = vcombine.low %v490_v10, %v494_v11  ;;  %v505_v28 = vunpack.c.l.s8.bf16 %v216_v24  ;;  %v236_v11 = vld [vmem:[#allocation5 + $0x388] sm:$0xff]  ;;  %v553_v25 = vunpack.c.l.s8.bf16 %v240_v21 }
 0x17e   :  { %3097 = vmatprep.subr.bf16.mxu0 %v5574_v33  ;;  %3269 = vmatprep.subr.bf16.mxu1 %v5576_v34  ;;  %v5624_v33 = vcombine.high %v498_v22, %v502_v23  ;;  %v220_v34 = vld [vmem:[#allocation5 + $0x308] sm:$0xff] }
 0x17f   :  { %v514_v42 = vunpack.c.h.s8.bf16 %v220_v34  ;;  %v5629_v46 = vcombine.low %v505_v28, %v509_v29 }
 0x180   :  { %3087 = vmatmul.mubr.bf16.vlgmr.msra.gmra.mrb[4].mxu0 %v6050_v47  ;;  %3259 = vmatmul.mubr.bf16.vlgmr.msra.gmra.mrb[4].mxu1 %v6050_v47  ;;  %v5631_v47 = vcombine.low %v506_v30, %v510_v31 }
 0x181   :  { %3098 = vmatpush1.bf16.msra.mxu0 %v5573_v37  ;;  %3270 = vmatpush1.bf16.msra.mxu1 %v5575_v38  ;;  %v5623_v37 = vcombine.low %v498_v22, %v502_v23  ;;  %v5630_v38 = vcombine.high %v505_v28, %v509_v29  ;;  %v5640_v53 = vcombine.high %v514_v42, %v518_v43  ;;  %v242_v22 = vld [vmem:[#allocation5 + $0x3b8] sm:$0xff] }
 0x182   :  { %3099 = vmatprep.subr.bf16.mxu0 %v5582_v39  ;;  %3271 = vmatprep.subr.bf16.mxu1 %v5584_v40  ;;  %v5632_v39 = vcombine.high %v506_v30, %v510_v31  ;;  %v513_v40 = vunpack.c.l.s8.bf16 %v220_v34  ;;  %v5639_v58 = vcombine.low %v514_v42, %v518_v43  ;;  %v558_v28 = vunpack.c.h.s8.bf16 %v242_v22  ;;  %v244_v31 = vld [vmem:[#allocation5 + $0x3c8] sm:$0xff]  ;;  %v250_v42 = vld [vmem:[#allocation5 + $0x3f8] sm:$0xff] }
 0x183   :  { %3129 = vmatprep.mubr.bf16.mxu0 %v6051_v59  ;;  %3301 = vmatprep.mubr.bf16.mxu1 %v6051_v59 }
 0x184   :  { %v5638_v52 = vcombine.high %v513_v40, %v517_v41  ;;  %v5637_v57 = vcombine.low %v513_v40, %v517_v41  ;;  %v248_v41 = vld [vmem:[#allocation5 + $0x3e8] sm:$0xff] }
 0x185   :  { %3100 = vmatpush1.bf16.msra.mxu0 %v5581_v48  ;;  %3272 = vmatpush1.bf16.msra.mxu1 %v5583_v49  ;;  %v521_v48 = vunpack.c.l.s8.bf16 %v224_v44  ;;  %v525_v49 = vunpack.c.l.s8.bf16 %v226_v45  ;;  %v569_v45 = vunpack.c.l.s8.bf16 %v248_v41 }
 0x186   :  { %3101 = vmatprep.subr.bf16.mxu0 %v5590_v54  ;;  %3273 = vmatprep.subr.bf16.mxu1 %v5592_v55  ;;  %v228_v54 = vld [vmem:[#allocation5 + $0x348] sm:$0xff]  ;;  %v230_v55 = vld [vmem:[#allocation5 + $0x358] sm:$0xff] }
 0x187   :  { %v5646_v59 = vcombine.high %v521_v48, %v525_v49  ;;  %v534_v0 = vunpack.c.h.s8.bf16 %v230_v55  ;;  %v5645_v3 = vcombine.low %v521_v48, %v525_v49  ;;  %v574_v48 = vunpack.c.h.s8.bf16 %v250_v42 }
 0x189   :  { %3102 = vmatpush1.bf16.msra.mxu0 %v5589_v60  ;;  %3274 = vmatpush1.bf16.msra.mxu1 %v5591_v61  ;;  %v5648_v60 = vcombine.high %v522_v50, %v526_v51  ;;  %v529_v61 = vunpack.c.l.s8.bf16 %v228_v54  ;;  %v252_v51 = vld [vmem:[#allocation5 + $0x408] sm:$0xff] }
 0x18a   :  { %3103 = vmatprep.subr.bf16.mxu0 %v5598_v62  ;;  %3275 = vmatprep.subr.bf16.mxu1 %v5600_v63  ;;  %v533_v62 = vunpack.c.l.s8.bf16 %v230_v55  ;;  %v530_v63 = vunpack.c.h.s8.bf16 %v228_v54 }
 0x18c   :  { %v5654_v9 = vcombine.high %v529_v61, %v533_v62  ;;  %v5656_v10 = vcombine.high %v530_v63, %v534_v0  ;;  %v5655_v14 = vcombine.low %v530_v63, %v534_v0  ;;  %v258_v63 = vld [vmem:[#allocation5 + $0x438] sm:$0xff] }
 0x18d   :  { %3104 = vmatpush1.bf16.msra.mxu0 %v5597_v6  ;;  %3276 = vmatpush1.bf16.msra.mxu1 %v5599_v7  ;;  %v541_v6 = vunpack.c.l.s8.bf16 %v234_v2  ;;  %v538_v7 = vunpack.c.h.s8.bf16 %v232_v1 }
 0x18e   :  { %3105 = vmatprep.subr.bf16.mxu0 %v5606_v12  ;;  %3277 = vmatprep.subr.bf16.mxu1 %v5608_v13  ;;  %v238_v12 = vld [vmem:[#allocation5 + $0x398] sm:$0xff]  ;;  %v5653_v13 = vcombine.low %v529_v61, %v533_v62  ;;  %v256_v62 = vld [vmem:[#allocation5 + $0x428] sm:$0xff] }
 0x18f   :  { %v5662_v15 = vcombine.high %v537_v5, %v541_v6  ;;  %v550_v20 = vunpack.c.h.s8.bf16 %v238_v12  ;;  %v5661_v23 = vcombine.low %v537_v5, %v541_v6  ;;  %v5663_v24 = vcombine.low %v538_v7, %v542_v8 }
 0x190   :  { %v585_v2 = vunpack.c.l.s8.bf16 %v256_v62  ;;  %v590_v5 = vunpack.c.h.s8.bf16 %v258_v63 }
 0x191   :  { %3106 = vmatpush1.bf16.msra.mxu0 %v5605_v16  ;;  %3278 = vmatpush1.bf16.msra.mxu1 %v5607_v17  ;;  %v5664_v16 = vcombine.high %v538_v7, %v542_v8  ;;  %v545_v17 = vunpack.c.l.s8.bf16 %v236_v11  ;;  %v260_v8 = vld [vmem:[#allocation5 + $0x448] sm:$0xff] }
 0x192   :  { %3107 = vmatprep.subr.bf16.mxu0 %v5614_v18  ;;  %3279 = vmatprep.subr.bf16.mxu1 %v5616_v19  ;;  %v549_v18 = vunpack.c.l.s8.bf16 %v238_v12  ;;  %v546_v19 = vunpack.c.h.s8.bf16 %v236_v11 }
 0x194   :  { %v5670_v29 = vcombine.high %v545_v17, %v549_v18  ;;  %v5672_v30 = vcombine.high %v546_v19, %v550_v20  ;;  %v5671_v34 = vcombine.low %v546_v19, %v550_v20  ;;  %v266_v19 = vld [vmem:[#allocation5 + $0x478] sm:$0xff]  ;;  %v6052_v20 = vld [vmem:[#allocation2 + $0x8] ss:$28 sps:$4 sm:$0xff]  }
 0x195   :  { %3108 = vmatpush1.bf16.msra.mxu0 %v5613_v26  ;;  %3280 = vmatpush1.bf16.msra.mxu1 %v5615_v27  ;;  %v557_v26 = vunpack.c.l.s8.bf16 %v242_v22  ;;  %v554_v27 = vunpack.c.h.s8.bf16 %v240_v21 }
 0x196   :  { %3109 = vmatprep.subr.bf16.mxu0 %v5622_v32  ;;  %3281 = vmatprep.subr.bf16.mxu1 %v5624_v33  ;;  %v246_v32 = vld [vmem:[#allocation5 + $0x3d8] sm:$0xff]  ;;  %v5669_v33 = vcombine.low %v545_v17, %v549_v18  ;;  %v264_v18 = vld [vmem:[#allocation5 + $0x468] sm:$0xff] }
 0x197   :  { %v5678_v35 = vcombine.high %v553_v25, %v557_v26  ;;  %v566_v40 = vunpack.c.h.s8.bf16 %v246_v32  ;;  %v5677_v43 = vcombine.low %v553_v25, %v557_v26  ;;  %v5679_v44 = vcombine.low %v554_v27, %v558_v28 }
 0x198   :  { %v602_v25 = vunpack.c.h.s8.bf16 %v264_v18  ;;  %v606_v26 = vunpack.c.h.s8.bf16 %v266_v19 }
 0x199   :  { %3110 = vmatpush1.bf16.msra.mxu0 %v5621_v36  ;;  %3282 = vmatpush1.bf16.msra.mxu1 %v5623_v37  ;;  %v5680_v36 = vcombine.high %v554_v27, %v558_v28  ;;  %v561_v37 = vunpack.c.l.s8.bf16 %v244_v31 }
 0x19a   :  { %3111 = vmatprep.subr.bf16.mxu0 %v5630_v38  ;;  %3283 = vmatprep.subr.bf16.mxu1 %v5632_v39  ;;  %v565_v38 = vunpack.c.l.s8.bf16 %v246_v32  ;;  %v562_v39 = vunpack.c.h.s8.bf16 %v244_v31  ;;  %v6053_v31 = vld [vmem:[#allocation2 + $0x14] ss:$28 sps:$4 sm:$0xff]  }
 0x19c   :  { %v5686_v49 = vcombine.high %v561_v37, %v565_v38  ;;  %v5688_v50 = vcombine.high %v562_v39, %v566_v40  ;;  %v5687_v54 = vcombine.low %v562_v39, %v566_v40  ;;  %v272_v40 = vld [vmem:[#allocation5 + $0x4a8] sm:$0xff] }
 0x19d   :  { %3112 = vmatpush1.bf16.msra.mxu0 %v5629_v46  ;;  %3284 = vmatpush1.bf16.msra.mxu1 %v5631_v47  ;;  %v573_v46 = vunpack.c.l.s8.bf16 %v250_v42  ;;  %v570_v47 = vunpack.c.h.s8.bf16 %v248_v41  ;;  %v274_v41 = vld [vmem:[#allocation5 + $0x4b8] sm:$0xff] }
 0x19e   :  { %3113 = vmatprep.subr.bf16.mxu0 %v5638_v52  ;;  %3285 = vmatprep.subr.bf16.mxu1 %v5640_v53  ;;  %v254_v52 = vld [vmem:[#allocation5 + $0x418] sm:$0xff]  ;;  %v5685_v53 = vcombine.low %v561_v37, %v565_v38 }
 0x19f   :  { %v5694_v55 = vcombine.high %v569_v45, %v573_v46  ;;  %v582_v61 = vunpack.c.h.s8.bf16 %v254_v52  ;;  %v5693_v0 = vcombine.low %v569_v45, %v573_v46  ;;  %v5695_v1 = vcombine.low %v570_v47, %v574_v48 }
 0x1a0   :  { %v621_v45 = vunpack.c.l.s8.bf16 %v274_v41  ;;  %v618_v46 = vunpack.c.h.s8.bf16 %v272_v40 }
 0x1a1   :  { %3114 = vmatpush1.bf16.msra.mxu0 %v5637_v57  ;;  %3286 = vmatpush1.bf16.msra.mxu1 %v5639_v58  ;;  %v5696_v57 = vcombine.high %v570_v47, %v574_v48  ;;  %v577_v58 = vunpack.c.l.s8.bf16 %v252_v51  ;;  %v622_v47 = vunpack.c.h.s8.bf16 %v274_v41 }
 0x1a2   :  { %3115 = vmatprep.subr.bf16.mxu0 %v5646_v59  ;;  %3287 = vmatprep.subr.bf16.mxu1 %v5648_v60  ;;  %v581_v59 = vunpack.c.l.s8.bf16 %v254_v52  ;;  %v578_v60 = vunpack.c.h.s8.bf16 %v252_v51  ;;  %v278_v51 = vld [vmem:[#allocation5 + $0x4d8] sm:$0xff] }
 0x1a4   :  { %v5702_v6 = vcombine.high %v577_v58, %v581_v59  ;;  %v5704_v7 = vcombine.high %v578_v60, %v582_v61  ;;  %v5703_v11 = vcombine.low %v578_v60, %v582_v61  ;;  %v630_v60 = vunpack.c.h.s8.bf16 %v278_v51  ;;  %v280_v61 = vld [vmem:[#allocation5 + $0x4e8] sm:$0xff] }
 0x1a5   :  { %3116 = vmatpush1.bf16.msra.mxu0 %v5645_v3  ;;  %3288 = vmatpush1.bf16.msra.mxu1 %v5647_v4  ;;  %v589_v3 = vunpack.c.l.s8.bf16 %v258_v63  ;;  %v586_v4 = vunpack.c.h.s8.bf16 %v256_v62  ;;  %v282_v62 = vld [vmem:[#allocation5 + $0x4f8] sm:$0xff] }
 0x1a6   :  { %3117 = vmatprep.subr.bf16.mxu0 %v5654_v9  ;;  %3289 = vmatprep.subr.bf16.mxu1 %v5656_v10  ;;  %v262_v9 = vld [vmem:[#allocation5 + $0x458] sm:$0xff]  ;;  %v5701_v10 = vcombine.low %v577_v58, %v581_v59  ;;  %v629_v58 = vunpack.c.l.s8.bf16 %v278_v51 }
 0x1a7   :  { %v5710_v12 = vcombine.high %v585_v2, %v589_v3  ;;  %v598_v17 = vunpack.c.h.s8.bf16 %v262_v9  ;;  %v5709_v21 = vcombine.low %v585_v2, %v589_v3  ;;  %v5711_v22 = vcombine.low %v586_v4, %v590_v5 }
 0x1a8   :  { %v637_v2 = vunpack.c.l.s8.bf16 %v282_v62  ;;  %v634_v3 = vunpack.c.h.s8.bf16 %v280_v61 }
 0x1a9   :  { %3118 = vmatpush1.bf16.msra.mxu0 %v5653_v13  ;;  %3290 = vmatpush1.bf16.msra.mxu1 %v5655_v14  ;;  %v5712_v13 = vcombine.high %v586_v4, %v590_v5  ;;  %v593_v14 = vunpack.c.l.s8.bf16 %v260_v8  ;;  %v638_v4 = vunpack.c.h.s8.bf16 %v282_v62 }
 0x1aa   :  { %3119 = vmatprep.subr.bf16.mxu0 %v5662_v15  ;;  %3291 = vmatprep.subr.bf16.mxu1 %v5664_v16  ;;  %v597_v15 = vunpack.c.l.s8.bf16 %v262_v9  ;;  %v594_v16 = vunpack.c.h.s8.bf16 %v260_v8  ;;  %v286_v8 = vld [vmem:[#allocation5 + $0x518] sm:$0xff] }
 0x1ac   :  { %v5718_v27 = vcombine.high %v593_v14, %v597_v15  ;;  %v5720_v28 = vcombine.high %v594_v16, %v598_v17  ;;  %v5717_v32 = vcombine.low %v593_v14, %v597_v15  ;;  %v645_v14 = vunpack.c.l.s8.bf16 %v286_v8 }
 0x1ad   :  { %3120 = vmatpush1.bf16.msra.mxu0 %v5661_v23  ;;  %3292 = vmatpush1.bf16.msra.mxu1 %v5663_v24  ;;  %v601_v23 = vunpack.c.l.s8.bf16 %v264_v18  ;;  %v605_v24 = vunpack.c.l.s8.bf16 %v266_v19  ;;  %v290_v18 = vld [vmem:[#allocation5 + $0x538] sm:$0xff] }
 0x1ae   :  { %3121 = vmatprep.subr.bf16.mxu0 %v5670_v29  ;;  %3293 = vmatprep.subr.bf16.mxu1 %v5672_v30  ;;  %v268_v29 = vld [vmem:[#allocation5 + $0x488] sm:$0xff]  ;;  %v270_v30 = vld [vmem:[#allocation5 + $0x498] sm:$0xff] }
 0x1af   :  { %v613_v37 = vunpack.c.l.s8.bf16 %v270_v30  ;;  %v610_v38 = vunpack.c.h.s8.bf16 %v268_v29  ;;  %v614_v39 = vunpack.c.h.s8.bf16 %v270_v30  ;;  %v5725_v42 = vcombine.low %v601_v23, %v605_v24 }
 0x1b1   :  { %3122 = vmatpush1.bf16.msra.mxu0 %v5669_v33  ;;  %3294 = vmatpush1.bf16.msra.mxu1 %v5671_v34  ;;  %v5719_v33 = vcombine.low %v594_v16, %v598_v17  ;;  %v5726_v34 = vcombine.high %v601_v23, %v605_v24  ;;  %v646_v16 = vunpack.c.h.s8.bf16 %v286_v8  ;;  %v288_v17 = vld [vmem:[#allocation5 + $0x528] sm:$0xff]  ;;  %v654_v24 = vunpack.c.h.s8.bf16 %v290_v18 }
 0x1b2   :  { %3123 = vmatprep.subr.bf16.mxu0 %v5678_v35  ;;  %3295 = vmatprep.subr.bf16.mxu1 %v5680_v36  ;;  %v5728_v35 = vcombine.high %v602_v25, %v606_v26  ;;  %v609_v36 = vunpack.c.l.s8.bf16 %v268_v29  ;;  %v650_v23 = vunpack.c.h.s8.bf16 %v288_v17 }
 0x1b4   :  { %v5734_v48 = vcombine.high %v609_v36, %v613_v37  ;;  %v5733_v52 = vcombine.low %v609_v36, %v613_v37  ;;  %v296_v37 = vld [vmem:[#allocation5 + $0x568] sm:$0xff] }
 0x1b5   :  { %3124 = vmatpush1.bf16.msra.mxu0 %v5677_v43  ;;  %3296 = vmatpush1.bf16.msra.mxu1 %v5679_v44  ;;  %v5727_v43 = vcombine.low %v602_v25, %v606_v26  ;;  %v617_v44 = vunpack.c.l.s8.bf16 %v272_v40  ;;  %v5775_v40 = vcombine.low %v650_v23, %v654_v24  ;;  %v665_v41 = vunpack.c.l.s8.bf16 %v296_v37 }
 0x1b6   :  { %3125 = vmatprep.subr.bf16.mxu0 %v5686_v49  ;;  %3297 = vmatprep.subr.bf16.mxu1 %v5688_v50  ;;  %v5736_v49 = vcombine.high %v610_v38, %v614_v39  ;;  %v276_v50 = vld [vmem:[#allocation5 + $0x4c8] sm:$0xff] }
 0x1b7   :  { %v626_v59 = vunpack.c.h.s8.bf16 %v276_v50  ;;  %v5741_v63 = vcombine.low %v617_v44, %v621_v45 }
 0x1b9   :  { %3126 = vmatpush1.bf16.msra.mxu0 %v5685_v53  ;;  %3298 = vmatpush1.bf16.msra.mxu1 %v5687_v54  ;;  %v5735_v53 = vcombine.low %v610_v38, %v614_v39  ;;  %v5742_v54 = vcombine.high %v617_v44, %v621_v45  ;;  %v298_v38 = vld [vmem:[#allocation5 + $0x578] sm:$0xff] }
 0x1ba   :  { %3127 = vmatprep.subr.bf16.mxu0 %v5694_v55  ;;  %3299 = vmatprep.subr.bf16.mxu1 %v5696_v57  ;;  %v5744_v55 = vcombine.high %v618_v46, %v622_v47  ;;  %v625_v57 = vunpack.c.l.s8.bf16 %v276_v50  ;;  %v670_v44 = vunpack.c.h.s8.bf16 %v298_v38 }
 0x1bc   :  { %v5750_v5 = vcombine.high %v625_v57, %v629_v58  ;;  %v5749_v9 = vcombine.low %v625_v57, %v629_v58  ;;  %v304_v58 = vld [vmem:[#allocation5 + $0x5a8] sm:$0xff] }
 0x1bd   :  { %3128 = vmatpush1.bf16.msra.mxu0 %v5693_v0  ;;  %3300 = vmatpush1.bf16.msra.mxu1 %v5695_v1  ;;  %v5743_v0 = vcombine.low %v618_v46, %v622_v47  ;;  %v633_v1 = vunpack.c.l.s8.bf16 %v280_v61  ;;  %v300_v47 = vld [vmem:[#allocation5 + $0x588] sm:$0xff]  ;;  %v681_v62 = vunpack.c.l.s8.bf16 %v304_v58 }
 0x1be   :  { %3140 = vmatprep.subr.bf16.mxu0 %v5702_v6  ;;  %3312 = vmatprep.subr.bf16.mxu1 %v5704_v7  ;;  %v5752_v6 = vcombine.high %v626_v59, %v630_v60  ;;  %v284_v7 = vld [vmem:[#allocation5 + $0x508] sm:$0xff] }
 0x1bf   :  { %v642_v15 = vunpack.c.h.s8.bf16 %v284_v7  ;;  %v5757_v19 = vcombine.low %v633_v1, %v637_v2 }
 0x1c0   :  { %3130 = vmatmul.mubr.bf16.vlgmr.msra.gmra.mrb[4].mxu0 %v6052_v20  ;;  %3302 = vmatmul.mubr.bf16.vlgmr.msra.gmra.mrb[4].mxu1 %v6052_v20  ;;  %v5759_v20 = vcombine.low %v634_v3, %v638_v4 }
 0x1c1   :  { %3141 = vmatpush1.bf16.msra.mxu0 %v5701_v10  ;;  %3313 = vmatpush1.bf16.msra.mxu1 %v5703_v11  ;;  %v5751_v10 = vcombine.low %v626_v59, %v630_v60  ;;  %v5758_v11 = vcombine.high %v633_v1, %v637_v2  ;;  %v5768_v26 = vcombine.high %v642_v15, %v646_v16  ;;  %v306_v59 = vld [vmem:[#allocation5 + $0x5b8] sm:$0xff] }
 0x1c2   :  { %3142 = vmatprep.subr.bf16.mxu0 %v5710_v12  ;;  %3314 = vmatprep.subr.bf16.mxu1 %v5712_v13  ;;  %v5760_v12 = vcombine.high %v634_v3, %v638_v4  ;;  %v641_v13 = vunpack.c.l.s8.bf16 %v284_v7  ;;  %v5767_v30 = vcombine.low %v642_v15, %v646_v16  ;;  %v686_v1 = vunpack.c.h.s8.bf16 %v306_v59  ;;  %v308_v4 = vld [vmem:[#allocation5 + $0x5c8] sm:$0xff]  ;;  %v314_v15 = vld [vmem:[#allocation5 + $0x5f8] sm:$0xff] }
 0x1c3   :  { %3172 = vmatprep.mubr.bf16.mxu0 %v6053_v31  ;;  %3344 = vmatprep.mubr.bf16.mxu1 %v6053_v31 }
 0x1c4   :  { %v5766_v25 = vcombine.high %v641_v13, %v645_v14  ;;  %v5765_v29 = vcombine.low %v641_v13, %v645_v14  ;;  %v312_v14 = vld [vmem:[#allocation5 + $0x5e8] sm:$0xff] }
 0x1c5   :  { %3143 = vmatpush1.bf16.msra.mxu0 %v5709_v21  ;;  %3315 = vmatpush1.bf16.msra.mxu1 %v5711_v22  ;;  %v649_v21 = vunpack.c.l.s8.bf16 %v288_v17  ;;  %v653_v22 = vunpack.c.l.s8.bf16 %v290_v18  ;;  %v697_v18 = vunpack.c.l.s8.bf16 %v312_v14 }
 0x1c6   :  { %3144 = vmatprep.subr.bf16.mxu0 %v5718_v27  ;;  %3316 = vmatprep.subr.bf16.mxu1 %v5720_v28  ;;  %v292_v27 = vld [vmem:[#allocation5 + $0x548] sm:$0xff]  ;;  %v294_v28 = vld [vmem:[#allocation5 + $0x558] sm:$0xff] }
 0x1c7   :  { %v5774_v31 = vcombine.high %v649_v21, %v653_v22  ;;  %v662_v36 = vunpack.c.h.s8.bf16 %v294_v28  ;;  %v5773_v39 = vcombine.low %v649_v21, %v653_v22  ;;  %v702_v21 = vunpack.c.h.s8.bf16 %v314_v15 }
 0x1c9   :  { %3145 = vmatpush1.bf16.msra.mxu0 %v5717_v32  ;;  %3317 = vmatpush1.bf16.msra.mxu1 %v5719_v33  ;;  %v5776_v32 = vcombine.high %v650_v23, %v654_v24  ;;  %v657_v33 = vunpack.c.l.s8.bf16 %v292_v27  ;;  %v316_v24 = vld [vmem:[#allocation5 + $0x608] sm:$0xff] }
 0x1ca   :  { %3146 = vmatprep.subr.bf16.mxu0 %v5726_v34  ;;  %3318 = vmatprep.subr.bf16.mxu1 %v5728_v35  ;;  %v661_v34 = vunpack.c.l.s8.bf16 %v294_v28  ;;  %v658_v35 = vunpack.c.h.s8.bf16 %v292_v27 }
 0x1cc   :  { %v5782_v45 = vcombine.high %v657_v33, %v661_v34  ;;  %v5784_v46 = vcombine.high %v658_v35, %v662_v36  ;;  %v5783_v50 = vcombine.low %v658_v35, %v662_v36 }
 0x1cd   :  { %3147 = vmatpush1.bf16.msra.mxu0 %v5725_v42  ;;  %3319 = vmatpush1.bf16.msra.mxu1 %v5727_v43  ;;  %v669_v42 = vunpack.c.l.s8.bf16 %v298_v38  ;;  %v666_v43 = vunpack.c.h.s8.bf16 %v296_v37  ;;  %v3531_v38 = vld [vmem:[#allocation8 + $0x8] sm:$0xff] }
 0x1ce   :  { %3148 = vmatprep.subr.bf16.mxu0 %v5734_v48  ;;  %3320 = vmatprep.subr.bf16.mxu1 %v5736_v49  ;;  %v302_v48 = vld [vmem:[#allocation5 + $0x598] sm:$0xff]  ;;  %v5781_v49 = vcombine.low %v657_v33, %v661_v34 }
 0x1cf   :  { %v5790_v51 = vcombine.high %v665_v41, %v669_v42  ;;  %v678_v57 = vunpack.c.h.s8.bf16 %v302_v48  ;;  %v5789_v60 = vcombine.low %v665_v41, %v669_v42  ;;  %v5791_v61 = vcombine.low %v666_v43, %v670_v44 }
 0x1d0   :  { %v3787_v42 = vunpack.c.l.s8.bf16 %v3531_v38 }
 0x1d1   :  { %3149 = vmatpush1.bf16.msra.mxu0 %v5733_v52  ;;  %3321 = vmatpush1.bf16.msra.mxu1 %v5735_v53  ;;  %v5792_v52 = vcombine.high %v666_v43, %v670_v44  ;;  %v673_v53 = vunpack.c.l.s8.bf16 %v300_v47  ;;  %v6054_v44 = vld [vmem:[#allocation2 + $0x10] ss:$28 sps:$4 sm:$0xff]  }
 0x1d2   :  { %3150 = vmatprep.subr.bf16.mxu0 %v5742_v54  ;;  %3322 = vmatprep.subr.bf16.mxu1 %v5744_v55  ;;  %v677_v54 = vunpack.c.l.s8.bf16 %v302_v48  ;;  %v674_v55 = vunpack.c.h.s8.bf16 %v300_v47  ;;  %v3532_v47 = vld [vmem:[#allocation8 + $0x10] sm:$0xff] }
 0x1d4   :  { %v5798_v2 = vcombine.high %v673_v53, %v677_v54  ;;  %v5800_v3 = vcombine.high %v674_v55, %v678_v57  ;;  %v5799_v7 = vcombine.low %v674_v55, %v678_v57  ;;  %v6055_v55 = vld [vmem:[#allocation2 + $0x18] ss:$28 sps:$4 sm:$0xff]  }
 0x1d5   :  { %3151 = vmatpush1.bf16.msra.mxu0 %v5741_v63  ;;  %3323 = vmatpush1.bf16.msra.mxu1 %v5743_v0  ;;  %v685_v63 = vunpack.c.l.s8.bf16 %v306_v59  ;;  %v682_v0 = vunpack.c.h.s8.bf16 %v304_v58  ;;  %v3796_v59 = vunpack.c.h.s8.bf16 %v3532_v47 }
 0x1d6   :  { %3152 = vmatprep.subr.bf16.mxu0 %v5750_v5  ;;  %3324 = vmatprep.subr.bf16.mxu1 %v5752_v6  ;;  %v310_v5 = vld [vmem:[#allocation5 + $0x5d8] sm:$0xff]  ;;  %v5797_v6 = vcombine.low %v673_v53, %v677_v54  ;;  %v6376_v53 = vld [vmem:[#allocation8 + $0x48] sm:$0xff]  ;;  %v6378_v54 = vld [vmem:[#allocation8 + $0x58] sm:$0xff] }
 0x1d7   :  { %v5806_v8 = vcombine.high %v681_v62, %v685_v63  ;;  %v694_v13 = vunpack.c.h.s8.bf16 %v310_v5  ;;  %v5805_v16 = vcombine.low %v681_v62, %v685_v63  ;;  %v5807_v17 = vcombine.low %v682_v0, %v686_v1 }
 0x1d8   :  { %v3803_v63 = vunpack.c.l.s8.bf16 %v6376_v53 }
 0x1d9   :  { %3153 = vmatpush1.bf16.msra.mxu0 %v5749_v9  ;;  %3325 = vmatpush1.bf16.msra.mxu1 %v5751_v10  ;;  %v5808_v9 = vcombine.high %v682_v0, %v686_v1  ;;  %v689_v10 = vunpack.c.l.s8.bf16 %v308_v4  ;;  %v3805_v0 = vunpack.c.l.s8.bf16 %v6378_v54  ;;  %v3538_v1 = vld [vmem:[#allocation8 + $0x40] sm:$0xff] }
 0x1da   :  { %3154 = vmatprep.subr.bf16.mxu0 %v5758_v11  ;;  %3326 = vmatprep.subr.bf16.mxu1 %v5760_v12  ;;  %v693_v11 = vunpack.c.l.s8.bf16 %v310_v5  ;;  %v690_v12 = vunpack.c.h.s8.bf16 %v308_v4 }
 0x1dc   :  { %v5814_v22 = vcombine.high %v689_v10, %v693_v11  ;;  %v5816_v23 = vcombine.high %v690_v12, %v694_v13  ;;  %v5815_v27 = vcombine.low %v690_v12, %v694_v13  ;;  %v3811_v12 = vunpack.c.h.s8.bf16 %v6376_v53  ;;  %v6406_v13 = vld [vmem:[#allocation8 + $0x88] sm:$0xff] }
 0x1dd   :  { %3155 = vmatpush1.bf16.msra.mxu0 %v5757_v19  ;;  %3327 = vmatpush1.bf16.msra.mxu1 %v5759_v20  ;;  %v701_v19 = vunpack.c.l.s8.bf16 %v314_v15  ;;  %v698_v20 = vunpack.c.h.s8.bf16 %v312_v14  ;;  %v6408_v14 = vld [vmem:[#allocation8 + $0x98] sm:$0xff] }
 0x1de   :  { %3156 = vmatprep.subr.bf16.mxu0 %v5766_v25  ;;  %3328 = vmatprep.subr.bf16.mxu1 %v5768_v26  ;;  %v318_v25 = vld [vmem:[#allocation5 + $0x618] sm:$0xff]  ;;  %v5813_v26 = vcombine.low %v689_v10, %v693_v11 }
 0x1df   :  { %v5822_v28 = vcombine.high %v697_v18, %v701_v19  ;;  %v710_v33 = vunpack.c.h.s8.bf16 %v318_v25  ;;  %v5821_v34 = vcombine.low %v697_v18, %v701_v19  ;;  %v5823_v35 = vcombine.low %v698_v20, %v702_v21 }
 0x1e0   :  { %v3813_v19 = vunpack.c.h.s8.bf16 %v6378_v54 }
 0x1e1   :  { %3157 = vmatpush1.bf16.msra.mxu0 %v5765_v29  ;;  %3329 = vmatpush1.bf16.msra.mxu1 %v5767_v30  ;;  %v5824_v29 = vcombine.high %v698_v20, %v702_v21  ;;  %v705_v30 = vunpack.c.l.s8.bf16 %v316_v24 }
 0x1e2   :  { %3158 = vmatprep.subr.bf16.mxu0 %v5774_v31  ;;  %3330 = vmatprep.subr.bf16.mxu1 %v5776_v32  ;;  %v709_v31 = vunpack.c.l.s8.bf16 %v318_v25  ;;  %v706_v32 = vunpack.c.h.s8.bf16 %v316_v24  ;;  %v3810_v24 = vunpack.c.h.s8.bf16 %v3538_v1 }
 0x1e4   :  { %v5830_v36 = vcombine.high %v705_v30, %v709_v31  ;;  %v5832_v37 = vcombine.high %v706_v32, %v710_v33  ;;  %v5831_v41 = vcombine.low %v706_v32, %v710_v33  ;;  %v3546_v32 = vld [vmem:[#allocation8 + $0x80] sm:$0xff]  ;;  %v3548_v33 = vld [vmem:[#allocation8 + $0x90] sm:$0xff] }
 0x1e5   :  { %3159 = vmatpush1.bf16.msra.mxu0 %v5773_v39  ;;  %3331 = vmatpush1.bf16.msra.mxu1 %v5775_v40  ;;  %v3533_v39 = vld [vmem:[#allocation8 + $0x18] sm:$0xff]  ;;  %v5829_v40 = vcombine.low %v705_v30, %v709_v31  ;;  %v3819_v30 = vunpack.c.l.s8.bf16 %v6406_v13  ;;  %v3821_v31 = vunpack.c.l.s8.bf16 %v6408_v14 }
 0x1e6   :  { %3160 = vmatprep.subr.bf16.mxu0 %v5782_v45  ;;  %3332 = vmatprep.subr.bf16.mxu1 %v5784_v46  ;;  %v3789_v43 = vunpack.c.l.s8.bf16 %v3533_v39  ;;  %v3400_v45 = vlaneseq  ;;  %v3530_v46 = vld [vmem:[#allocation8] sm:$0xff] }
 0x1e7   :  { %v3794_v58 = vunpack.c.h.s8.bf16 %v3530_v46 }
 0x1e8   :  { %v6374_v48 = vshrl.u32 %v3400_v45, 7 }
 0x1e9   :  { %3161 = vmatpush1.bf16.msra.mxu0 %v5781_v49  ;;  %3333 = vmatpush1.bf16.msra.mxu1 %v5783_v50  ;;  %v3786_v49 = vunpack.c.l.s8.bf16 %v3530_v46  ;;  %v3788_v50 = vunpack.c.l.s8.bf16 %v3532_v47  ;;  %v3818_v46 = vunpack.c.l.s8.bf16 %v3546_v32  ;;  %v3820_v47 = vunpack.c.l.s8.bf16 %v3548_v33 }
 0x1ea   :  { %3162 = vmatprep.subr.bf16.mxu0 %v5790_v51  ;;  %3334 = vmatprep.subr.bf16.mxu1 %v5792_v52  ;;  %v3795_v51 = vunpack.c.h.s8.bf16 %v3531_v38  ;;  %v3797_v52 = vunpack.c.h.s8.bf16 %v3533_v39  ;;  %v6386_v57 = vsub.s32 2, %v6374_v48  ;;  %v6392_v62 = vsub.s32 3, %v6374_v48 }
 0x1ed   :  { %3163 = vmatpush1.bf16.msra.mxu0 %v5789_v60  ;;  %3335 = vmatpush1.bf16.msra.mxu1 %v5791_v61  ;;  %v3398_v60 = vld [vmem:[#allocation7] sm:$0xff]  ;;  %v6389_v61 = vsub.s32 1, %v6374_v48 }
 0x1ee   :  { %3164 = vmatprep.subr.bf16.mxu0 %v5798_v2  ;;  %3336 = vmatprep.subr.bf16.mxu1 %v5800_v3  ;;  %v3540_v2 = vld [vmem:[#allocation8 + $0x50] sm:$0xff]  ;;  %v3456_v3 = vld [vmem:[%s6583_s3] sm:$0xff]  ;;  %v3411_v5 = vrot.slane %v3398_v60, %v6386_v57 }
 0x1ef   :  { %v3469_v11 = vrot.slane %v3456_v3, %v6386_v57  ;;  %v3473_v18 = vrot.slane %v3456_v3, %v6392_v62  ;;  %v3812_v25 = vunpack.c.h.s8.bf16 %v3540_v2 }
 0x1f1   :  { %3165 = vmatpush1.bf16.msra.mxu0 %v5797_v6  ;;  %3337 = vmatpush1.bf16.msra.mxu1 %v5799_v7  ;;  %v3802_v6 = vunpack.c.l.s8.bf16 %v3538_v1  ;;  %v3804_v7 = vunpack.c.l.s8.bf16 %v3540_v2  ;;  %v3555_v1 = vld [vmem:[#allocation8 + $0xc8] sm:$0xff]  ;;  %v3557_v2 = vld [vmem:[#allocation8 + $0xd8] sm:$0xff] }
 0x1f2   :  { %3166 = vmatprep.subr.bf16.mxu0 %v5806_v8  ;;  %3338 = vmatprep.subr.bf16.mxu1 %v5808_v9  ;;  %v3407_v8 = vrot.slane %v3398_v60, %v6389_v61  ;;  %v3415_v9 = vrot.slane %v3398_v60, %v6392_v62 }
 0x1f5   :  { %3167 = vmatpush1.bf16.msra.mxu0 %v5805_v16  ;;  %3339 = vmatpush1.bf16.msra.mxu1 %v5807_v17  ;;  %v3465_v17 = vrot.slane %v3456_v3, %v6389_v61 }
 0x1f6   :  { %3168 = vmatprep.subr.bf16.mxu0 %v5814_v22  ;;  %3340 = vmatprep.subr.bf16.mxu1 %v5816_v23 }
 0x1f9   :  { %3169 = vmatpush1.bf16.msra.mxu0 %v5813_v26  ;;  %3341 = vmatpush1.bf16.msra.mxu1 %v5815_v27 }
 0x1fa   :  { %3170 = vmatprep.subr.bf16.mxu0 %v5822_v28  ;;  %3342 = vmatprep.subr.bf16.mxu1 %v5824_v29 }
 0x1fd   :  { %3171 = vmatpush1.bf16.msra.mxu0 %v5821_v34  ;;  %3343 = vmatpush1.bf16.msra.mxu1 %v5823_v35 }
 0x1fe   :  { %3183 = vmatprep.subr.bf16.mxu0 %v5830_v36  ;;  %3355 = vmatprep.subr.bf16.mxu1 %v5832_v37 }
 0x200   :  { %3173 = vmatmul.mubr.bf16.vlgmr.msra.gmra.mrb[4].mxu0 %v6054_v44  ;;  %3345 = vmatmul.mubr.bf16.vlgmr.msra.gmra.mrb[4].mxu1 %v6054_v44 }
 0x201   :  { %3184 = vmatpush1.bf16.msra.mxu0 %v5829_v40  ;;  %3356 = vmatpush1.bf16.msra.mxu1 %v5831_v41 }
 0x202   :  { %3215 = vmatprep.mubr.bf16.mxu0 %v6236_v56  ;;  %3387 = vmatprep.mubr.bf16.mxu1 %v6236_v56  ;;  %v6383_v56 = vsub.s32 0, %v6374_v48 }
 0x203   :  { %4306 = vmatprep.subr.bf16.mxu0 %v3787_v42  ;;  %4478 = vmatprep.subr.bf16.mxu1 %v3789_v43 }
 0x204   :  { %v3403_v4 = vrot.slane %v3398_v60, %v6383_v56  ;;  %v3461_v10 = vrot.slane %v3456_v3, %v6383_v56 }
 0x20c   :  { %5835 = vmatmul.mubr.msk.bf16.vlgmr.msra.gmra.mrb[4].mxu0 %vm2706_vm0, %v6055_v55  ;;  %5836 = vmatmul.mubr.msk.bf16.vlgmr.msra.gmra.mrb[4].mxu1 %vm2706_vm0, %v6055_v55 }
 0x20d   :  { %4307 = vmatpush1.bf16.msra.mxu0 %v3786_v49  ;;  %4479 = vmatpush1.bf16.msra.mxu1 %v3788_v50 }
 0x20e   :  { %4308 = vmatprep.subr.bf16.mxu0 %v3795_v51  ;;  %4480 = vmatprep.subr.bf16.mxu1 %v3797_v52  ;;  %v3827_v51 = vunpack.c.h.s8.bf16 %v6406_v13  ;;  %v3829_v52 = vunpack.c.h.s8.bf16 %v6408_v14 }
 0x211   :  { %4309 = vmatpush1.bf16.msra.mxu0 %v3794_v58  ;;  %4481 = vmatpush1.bf16.msra.mxu1 %v3796_v59 }
 0x212   :  { %4310 = vmatprep.subr.bf16.mxu0 %v3803_v63  ;;  %4482 = vmatprep.subr.bf16.mxu1 %v3805_v0 }
 0x213   :  { %v2873_v15 = vpop.f32.mrb[0].mxu0  ;;  %v3045_v16 = vpop.f32.mrb[0].mxu1 }
 0x214   :  { %v3440_v20 = vmul.f32 %v3403_v4, %v2873_v15  ;;  %v3442_v21 = vmul.f32 %v3411_v5, %v3045_v16  ;;  %v2875_v22 = vpop.f32.mrb[1].mxu0  ;;  %v3047_v23 = vpop.f32.mrb[1].mxu1  ;;  %v3843_v15 = vunpack.c.h.s8.bf16 %v3555_v1  ;;  %v3845_v16 = vunpack.c.h.s8.bf16 %v3557_v2 }
 0x215   :  { %4311 = vmatpush1.bf16.msra.mxu0 %v3802_v6  ;;  %4483 = vmatpush1.bf16.msra.mxu1 %v3804_v7  ;;  %v3441_v26 = vmul.f32 %v3407_v8, %v2875_v22  ;;  %v3443_v27 = vmul.f32 %v3415_v9, %v3047_v23  ;;  %v2877_v28 = vpop.f32.mrb[2].mxu0  ;;  %v3049_v29 = vpop.f32.mrb[2].mxu1  ;;  %v3826_v7 = vunpack.c.h.s8.bf16 %v3546_v32  ;;  %v3562_v23 = vld [vmem:[#allocation8 + $0x100] sm:$0xff] }
 0x216   :  { %v3498_v34 = vadd.f32 %v3461_v10, %v3440_v20  ;;  %v3500_v35 = vadd.f32 %v3469_v11, %v3442_v21  ;;  %v3448_v36 = vmul.f32 %v3403_v4, %v2877_v28  ;;  %v3450_v37 = vmul.f32 %v3411_v5, %v3049_v29  ;;  %v2879_v38 = vpop.f32.mrb[3].mxu0  ;;  %v3051_v39 = vpop.f32.mrb[3].mxu1  ;;  %4312 = vmatprep.subr.bf16.mxu0 %v3811_v12  ;;  %v3556_v12 = vld [vmem:[#allocation8 + $0xd0] sm:$0xff]  ;;  %v3571_v29 = vld [vmem:[#allocation8 + $0x148] sm:$0xff] }
 0x217   :  { %v3499_v40 = vadd.f32 %v3465_v17, %v3441_v26  ;;  %v3501_v41 = vadd.f32 %v3473_v18, %v3443_v27  ;;  %v3449_v42 = vmul.f32 %v3407_v8, %v2879_v38  ;;  %v3451_v43 = vmul.f32 %v3415_v9, %v3051_v39  ;;  %4484 = vmatprep.subr.bf16.mxu1 %v3813_v19 }
 0x218   :  { %v3506_v44 = vadd.f32 %v3461_v10, %v3448_v36  ;;  %v3508_v45 = vadd.f32 %v3469_v11, %v3450_v37  ;;  %v3514_v53 = vmax.f32 %v3498_v34, 0.0  ;;  %v3516_v54 = vmax.f32 %v3500_v35, 0.0  ;;  %v3554_v11 = vld [vmem:[#allocation8 + $0xc0] sm:$0xff]  ;;  %v3572_v36 = vld [vmem:[#allocation8 + $0x150] sm:$0xff] }
 0x219   :  { %v3507_v49 = vadd.f32 %v3465_v17, %v3449_v42  ;;  %v3509_v50 = vadd.f32 %v3473_v18, %v3451_v43  ;;  %4313 = vmatpush1.bf16.msra.mxu0 %v3810_v24  ;;  %4485 = vmatpush1.bf16.msra.mxu1 %v3812_v25  ;;  %v3515_v59 = vmax.f32 %v3499_v40, 0.0  ;;  %v3517_v60 = vmax.f32 %v3501_v41, 0.0  ;;  %v3563_v17 = vld [vmem:[#allocation8 + $0x108] sm:$0xff]  ;;  %v3565_v18 = vld [vmem:[#allocation8 + $0x118] sm:$0xff]  ;;  %v3564_v24 = vld [vmem:[#allocation8 + $0x110] sm:$0xff] }
 0x21a   :  { %v3522_v55 = vmax.f32 %v3506_v44, 0.0  ;;  %v3524_v58 = vmax.f32 %v3508_v45, 0.0  ;;  %4314 = vmatprep.subr.bf16.mxu0 %v3819_v30  ;;  %4486 = vmatprep.subr.bf16.mxu1 %v3821_v31  ;;  %v3828_v8 = vunpack.c.h.s8.bf16 %v3548_v33  ;;  %v3835_v9 = vunpack.c.l.s8.bf16 %v3555_v1  ;;  %v3573_v30 = vld [vmem:[#allocation8 + $0x158] sm:$0xff]  ;;  %v3570_v35 = vld [vmem:[#allocation8 + $0x140] sm:$0xff]  ;;  %v3579_v41 = vld [vmem:[#allocation8 + $0x188] sm:$0xff] }
 0x21b   :  { %v3523_v63 = vmax.f32 %v3507_v49, 0.0  ;;  %v3525_v0 = vmax.f32 %v3509_v50, 0.0  ;;  %v3837_v10 = vunpack.c.l.s8.bf16 %v3557_v2  ;;  %v3834_v13 = vunpack.c.l.s8.bf16 %v3554_v11  ;;  %v3581_v42 = vld [vmem:[#allocation8 + $0x198] sm:$0xff]  ;;  %v3580_v49 = vld [vmem:[#allocation8 + $0x190] sm:$0xff] }
 0x21c   :  { %v6417_v3 = vpack.c.bf16 %v3522_v55, %v3514_v53  ;;  %v6419_v4 = vpack.c.bf16 %v3524_v58, %v3516_v54  ;;  %v3836_v14 = vunpack.c.l.s8.bf16 %v3556_v12  ;;  %v3842_v19 = vunpack.c.h.s8.bf16 %v3554_v11  ;;  %v3587_v54 = vld [vmem:[#allocation8 + $0x1c8] sm:$0xff]  ;;  %v3589_v55 = vld [vmem:[#allocation8 + $0x1d8] sm:$0xff]  ;;  %v3588_v1 = vld [vmem:[#allocation8 + $0x1d0] sm:$0xff] }
 0x21d   :  { %v6421_v5 = vpack.c.bf16 %v3523_v63, %v3515_v59  ;;  %v6423_v6 = vpack.c.bf16 %v3525_v0, %v3517_v60  ;;  %4315 = vmatpush1.bf16.msra.mxu0 %v3818_v46  ;;  %4487 = vmatpush1.bf16.msra.mxu1 %v3820_v47  ;;  %v3844_v20 = vunpack.c.h.s8.bf16 %v3556_v12  ;;  %v3851_v21 = vunpack.c.l.s8.bf16 %v3563_v17  ;;  %v3578_v47 = vld [vmem:[#allocation8 + $0x180] sm:$0xff]  ;;  %v3597_v11 = vld [vmem:[#allocation8 + $0x218] sm:$0xff] }
 0x21e   :  { %4316 = vmatprep.subr.bf16.mxu0 %v3827_v51  ;;  %4488 = vmatprep.subr.bf16.mxu1 %v3829_v52  ;;  %v3853_v22 = vunpack.c.l.s8.bf16 %v3565_v18  ;;  %v3850_v25 = vunpack.c.l.s8.bf16 %v3562_v23  ;;  %v3852_v26 = vunpack.c.l.s8.bf16 %v3564_v24  ;;  %v3859_v27 = vunpack.c.h.s8.bf16 %v3563_v17  ;;  %v3586_v0 = vld [vmem:[#allocation8 + $0x1c0] sm:$0xff]  ;;  %v3596_v17 = vld [vmem:[#allocation8 + $0x210] sm:$0xff] }
 0x21f   :  { %4338 = vmatprep.mubr.bf16.mxu0 %v6421_v5  ;;  %4510 = vmatprep.mubr.bf16.mxu1 %v6421_v5  ;;  %v3861_v28 = vunpack.c.h.s8.bf16 %v3565_v18  ;;  %v3858_v31 = vunpack.c.h.s8.bf16 %v3562_v23  ;;  %v3860_v32 = vunpack.c.h.s8.bf16 %v3564_v24  ;;  %v3867_v33 = vunpack.c.l.s8.bf16 %v3571_v29  ;;  %v3605_v23 = vld [vmem:[#allocation8 + $0x258] sm:$0xff] }
 0x220   :  { %v3869_v34 = vunpack.c.l.s8.bf16 %v3573_v30  ;;  %v3866_v37 = vunpack.c.l.s8.bf16 %v3570_v35  ;;  %v3868_v38 = vunpack.c.l.s8.bf16 %v3572_v36  ;;  %v3875_v39 = vunpack.c.h.s8.bf16 %v3571_v29  ;;  %v3604_v29 = vld [vmem:[#allocation8 + $0x250] sm:$0xff] }
 0x221   :  { %4317 = vmatpush1.bf16.msra.mxu0 %v3826_v7  ;;  %4489 = vmatpush1.bf16.msra.mxu1 %v3828_v8  ;;  %v3877_v40 = vunpack.c.h.s8.bf16 %v3573_v30  ;;  %v3874_v43 = vunpack.c.h.s8.bf16 %v3570_v35  ;;  %v3876_v44 = vunpack.c.h.s8.bf16 %v3572_v36  ;;  %v3883_v45 = vunpack.c.l.s8.bf16 %v3579_v41  ;;  %v3613_v35 = vld [vmem:[#allocation8 + $0x298] sm:$0xff] }
 0x222   :  { %4318 = vmatprep.subr.bf16.mxu0 %v3835_v9  ;;  %4490 = vmatprep.subr.bf16.mxu1 %v3837_v10  ;;  %v3885_v46 = vunpack.c.l.s8.bf16 %v3581_v42  ;;  %v3882_v50 = vunpack.c.l.s8.bf16 %v3578_v47  ;;  %v3884_v51 = vunpack.c.l.s8.bf16 %v3580_v49  ;;  %v3891_v52 = vunpack.c.h.s8.bf16 %v3579_v41  ;;  %v3595_v10 = vld [vmem:[#allocation8 + $0x208] sm:$0xff]  ;;  %v3612_v41 = vld [vmem:[#allocation8 + $0x290] sm:$0xff] }
 0x223   :  { %v3893_v53 = vunpack.c.h.s8.bf16 %v3581_v42  ;;  %v3890_v58 = vunpack.c.h.s8.bf16 %v3578_v47  ;;  %v3892_v59 = vunpack.c.h.s8.bf16 %v3580_v49  ;;  %v3899_v60 = vunpack.c.l.s8.bf16 %v3587_v54  ;;  %v3621_v47 = vld [vmem:[#allocation8 + $0x2d8] sm:$0xff] }
 0x224   :  { %v3901_v63 = vunpack.c.l.s8.bf16 %v3589_v55  ;;  %v3898_v2 = vunpack.c.l.s8.bf16 %v3586_v0  ;;  %v3900_v7 = vunpack.c.l.s8.bf16 %v3588_v1  ;;  %v3907_v8 = vunpack.c.h.s8.bf16 %v3587_v54  ;;  %v3620_v54 = vld [vmem:[#allocation8 + $0x2d0] sm:$0xff] }
 0x225   :  { %4319 = vmatpush1.bf16.msra.mxu0 %v3834_v13  ;;  %4491 = vmatpush1.bf16.msra.mxu1 %v3836_v14  ;;  %v3909_v9 = vunpack.c.h.s8.bf16 %v3589_v55  ;;  %v3906_v12 = vunpack.c.h.s8.bf16 %v3586_v0  ;;  %v3908_v13 = vunpack.c.h.s8.bf16 %v3588_v1  ;;  %v3915_v14 = vunpack.c.l.s8.bf16 %v3595_v10  ;;  %v3629_v0 = vld [vmem:[#allocation8 + $0x318] sm:$0xff] }
 0x226   :  { %4320 = vmatprep.subr.bf16.mxu0 %v3843_v15  ;;  %4492 = vmatprep.subr.bf16.mxu1 %v3845_v16  ;;  %v3917_v15 = vunpack.c.l.s8.bf16 %v3597_v11  ;;  %v3594_v16 = vld [vmem:[#allocation8 + $0x200] sm:$0xff] }
 0x227   :  { %v3914_v18 = vunpack.c.l.s8.bf16 %v3594_v16  ;;  %v3922_v24 = vunpack.c.h.s8.bf16 %v3594_v16  ;;  %v3637_v16 = vld [vmem:[#allocation8 + $0x358] sm:$0xff] }
 0x229   :  { %4321 = vmatpush1.bf16.msra.mxu0 %v3842_v19  ;;  %4493 = vmatpush1.bf16.msra.mxu1 %v3844_v20  ;;  %v3916_v19 = vunpack.c.l.s8.bf16 %v3596_v17  ;;  %v3923_v20 = vunpack.c.h.s8.bf16 %v3595_v10  ;;  %v3628_v10 = vld [vmem:[#allocation8 + $0x310] sm:$0xff] }
 0x22a   :  { %4322 = vmatprep.subr.bf16.mxu0 %v3851_v21  ;;  %4494 = vmatprep.subr.bf16.mxu1 %v3853_v22  ;;  %v3925_v21 = vunpack.c.h.s8.bf16 %v3597_v11  ;;  %v3603_v22 = vld [vmem:[#allocation8 + $0x248] sm:$0xff] }
 0x22d   :  { %4323 = vmatpush1.bf16.msra.mxu0 %v3850_v25  ;;  %4495 = vmatpush1.bf16.msra.mxu1 %v3852_v26  ;;  %v3924_v25 = vunpack.c.h.s8.bf16 %v3596_v17  ;;  %v3931_v26 = vunpack.c.l.s8.bf16 %v3603_v22 }
 0x22e   :  { %4324 = vmatprep.subr.bf16.mxu0 %v3859_v27  ;;  %4496 = vmatprep.subr.bf16.mxu1 %v3861_v28  ;;  %v3602_v27 = vld [vmem:[#allocation8 + $0x240] sm:$0xff]  ;;  %v3933_v28 = vunpack.c.l.s8.bf16 %v3605_v23 }
 0x22f   :  { %v3930_v30 = vunpack.c.l.s8.bf16 %v3602_v27  ;;  %v3938_v36 = vunpack.c.h.s8.bf16 %v3602_v27  ;;  %v3643_v27 = vld [vmem:[#allocation8 + $0x388] sm:$0xff] }
 0x231   :  { %4325 = vmatpush1.bf16.msra.mxu0 %v3858_v31  ;;  %4497 = vmatpush1.bf16.msra.mxu1 %v3860_v32  ;;  %v3932_v31 = vunpack.c.l.s8.bf16 %v3604_v29  ;;  %v3939_v32 = vunpack.c.h.s8.bf16 %v3603_v22  ;;  %v3636_v22 = vld [vmem:[#allocation8 + $0x350] sm:$0xff] }
 0x232   :  { %4326 = vmatprep.subr.bf16.mxu0 %v3867_v33  ;;  %4498 = vmatprep.subr.bf16.mxu1 %v3869_v34  ;;  %v3941_v33 = vunpack.c.h.s8.bf16 %v3605_v23  ;;  %v3611_v34 = vld [vmem:[#allocation8 + $0x288] sm:$0xff] }
 0x235   :  { %4327 = vmatpush1.bf16.msra.mxu0 %v3866_v37  ;;  %4499 = vmatpush1.bf16.msra.mxu1 %v3868_v38  ;;  %v3940_v37 = vunpack.c.h.s8.bf16 %v3604_v29  ;;  %v3947_v38 = vunpack.c.l.s8.bf16 %v3611_v34 }
 0x236   :  { %4328 = vmatprep.subr.bf16.mxu0 %v3875_v39  ;;  %4500 = vmatprep.subr.bf16.mxu1 %v3877_v40  ;;  %v3610_v39 = vld [vmem:[#allocation8 + $0x280] sm:$0xff]  ;;  %v3949_v40 = vunpack.c.l.s8.bf16 %v3613_v35 }
 0x237   :  { %v3946_v42 = vunpack.c.l.s8.bf16 %v3610_v39  ;;  %v3954_v49 = vunpack.c.h.s8.bf16 %v3610_v39  ;;  %v3651_v39 = vld [vmem:[#allocation8 + $0x3c8] sm:$0xff] }
 0x239   :  { %4329 = vmatpush1.bf16.msra.mxu0 %v3874_v43  ;;  %4501 = vmatpush1.bf16.msra.mxu1 %v3876_v44  ;;  %v3948_v43 = vunpack.c.l.s8.bf16 %v3612_v41  ;;  %v3955_v44 = vunpack.c.h.s8.bf16 %v3611_v34  ;;  %v3644_v34 = vld [vmem:[#allocation8 + $0x390] sm:$0xff] }
 0x23a   :  { %4330 = vmatprep.subr.bf16.mxu0 %v3883_v45  ;;  %4502 = vmatprep.subr.bf16.mxu1 %v3885_v46  ;;  %v3957_v45 = vunpack.c.h.s8.bf16 %v3613_v35  ;;  %v3619_v46 = vld [vmem:[#allocation8 + $0x2c8] sm:$0xff] }
 0x23d   :  { %4331 = vmatpush1.bf16.msra.mxu0 %v3882_v50  ;;  %4503 = vmatpush1.bf16.msra.mxu1 %v3884_v51  ;;  %v3956_v50 = vunpack.c.h.s8.bf16 %v3612_v41  ;;  %v3963_v51 = vunpack.c.l.s8.bf16 %v3619_v46 }
 0x23e   :  { %4332 = vmatprep.subr.bf16.mxu0 %v3891_v52  ;;  %4504 = vmatprep.subr.bf16.mxu1 %v3893_v53  ;;  %v3618_v52 = vld [vmem:[#allocation8 + $0x2c0] sm:$0xff]  ;;  %v3965_v53 = vunpack.c.l.s8.bf16 %v3621_v47 }
 0x23f   :  { %v3962_v55 = vunpack.c.l.s8.bf16 %v3618_v52  ;;  %v3970_v1 = vunpack.c.h.s8.bf16 %v3618_v52  ;;  %v3659_v52 = vld [vmem:[#allocation8 + $0x408] sm:$0xff] }
 0x241   :  { %4333 = vmatpush1.bf16.msra.mxu0 %v3890_v58  ;;  %4505 = vmatpush1.bf16.msra.mxu1 %v3892_v59  ;;  %v3964_v58 = vunpack.c.l.s8.bf16 %v3620_v54  ;;  %v3971_v59 = vunpack.c.h.s8.bf16 %v3619_v46  ;;  %v3652_v46 = vld [vmem:[#allocation8 + $0x3d0] sm:$0xff] }
 0x242   :  { %4334 = vmatprep.subr.bf16.mxu0 %v3899_v60  ;;  %4506 = vmatprep.subr.bf16.mxu1 %v3901_v63  ;;  %v3973_v60 = vunpack.c.h.s8.bf16 %v3621_v47  ;;  %v3627_v63 = vld [vmem:[#allocation8 + $0x308] sm:$0xff] }
 0x245   :  { %4335 = vmatpush1.bf16.msra.mxu0 %v3898_v2  ;;  %4507 = vmatpush1.bf16.msra.mxu1 %v3900_v7  ;;  %v3972_v2 = vunpack.c.h.s8.bf16 %v3620_v54  ;;  %v3979_v7 = vunpack.c.l.s8.bf16 %v3627_v63 }
 0x246   :  { %4336 = vmatprep.subr.bf16.mxu0 %v3907_v8  ;;  %4508 = vmatprep.subr.bf16.mxu1 %v3909_v9  ;;  %v3626_v8 = vld [vmem:[#allocation8 + $0x300] sm:$0xff]  ;;  %v3981_v9 = vunpack.c.l.s8.bf16 %v3629_v0 }
 0x247   :  { %v3978_v11 = vunpack.c.l.s8.bf16 %v3626_v8  ;;  %v3986_v17 = vunpack.c.h.s8.bf16 %v3626_v8  ;;  %v3667_v8 = vld [vmem:[#allocation8 + $0x448] sm:$0xff] }
 0x249   :  { %4337 = vmatpush1.bf16.msra.mxu0 %v3906_v12  ;;  %4509 = vmatpush1.bf16.msra.mxu1 %v3908_v13  ;;  %v3980_v12 = vunpack.c.l.s8.bf16 %v3628_v10  ;;  %v3987_v13 = vunpack.c.h.s8.bf16 %v3627_v63  ;;  %v3660_v63 = vld [vmem:[#allocation8 + $0x410] sm:$0xff] }
 0x24a   :  { %4349 = vmatprep.subr.bf16.mxu0 %v3915_v14  ;;  %4521 = vmatprep.subr.bf16.mxu1 %v3917_v15  ;;  %v3989_v14 = vunpack.c.h.s8.bf16 %v3629_v0  ;;  %v3635_v15 = vld [vmem:[#allocation8 + $0x348] sm:$0xff] }
 0x24c   :  { %4339 = vmatmul.mubr.bf16.vlgmr.msra.gmra.mrb[8].mxu0 %v6417_v3  ;;  %4511 = vmatmul.mubr.bf16.vlgmr.msra.gmra.mrb[8].mxu1 %v6417_v3 }
 0x24d   :  { %4350 = vmatpush1.bf16.msra.mxu0 %v3914_v18  ;;  %4381 = vmatprep.mubr.bf16.mxu0 %v6423_v6  ;;  %v3988_v18 = vunpack.c.h.s8.bf16 %v3628_v10 }
 0x24e   :  { %4522 = vmatpush1.bf16.msra.mxu1 %v3916_v19  ;;  %4553 = vmatprep.mubr.bf16.mxu1 %v6423_v6  ;;  %v3995_v19 = vunpack.c.l.s8.bf16 %v3635_v15 }
 0x24f   :  { %4351 = vmatprep.subr.bf16.mxu0 %v3923_v20  ;;  %4523 = vmatprep.subr.bf16.mxu1 %v3925_v21  ;;  %v3634_v20 = vld [vmem:[#allocation8 + $0x340] sm:$0xff]  ;;  %v3997_v21 = vunpack.c.l.s8.bf16 %v3637_v16 }
 0x250   :  { %v3994_v23 = vunpack.c.l.s8.bf16 %v3634_v20  ;;  %v4002_v29 = vunpack.c.h.s8.bf16 %v3634_v20  ;;  %v3675_v20 = vld [vmem:[#allocation8 + $0x488] sm:$0xff] }
 0x251   :  { %4352 = vmatpush1.bf16.msra.mxu0 %v3922_v24  ;;  %v3996_v24 = vunpack.c.l.s8.bf16 %v3636_v22 }
 0x252   :  { %4524 = vmatpush1.bf16.msra.mxu1 %v3924_v25  ;;  %4353 = vmatprep.subr.bf16.mxu0 %v3931_v26  ;;  %v4003_v25 = vunpack.c.h.s8.bf16 %v3635_v15  ;;  %v4005_v26 = vunpack.c.h.s8.bf16 %v3637_v16  ;;  %v3668_v15 = vld [vmem:[#allocation8 + $0x450] sm:$0xff] }
 0x253   :  { %4525 = vmatprep.subr.bf16.mxu1 %v3933_v28  ;;  %v3645_v28 = vld [vmem:[#allocation8 + $0x398] sm:$0xff] }
 0x255   :  { %4354 = vmatpush1.bf16.msra.mxu0 %v3930_v30  ;;  %v4004_v30 = vunpack.c.h.s8.bf16 %v3636_v22 }
 0x256   :  { %4526 = vmatpush1.bf16.msra.mxu1 %v3932_v31  ;;  %4355 = vmatprep.subr.bf16.mxu0 %v3939_v32  ;;  %v4011_v31 = vunpack.c.l.s8.bf16 %v3643_v27  ;;  %v3642_v32 = vld [vmem:[#allocation8 + $0x380] sm:$0xff] }
 0x257   :  { %4527 = vmatprep.subr.bf16.mxu1 %v3941_v33  ;;  %v4013_v33 = vunpack.c.l.s8.bf16 %v3645_v28  ;;  %v4010_v35 = vunpack.c.l.s8.bf16 %v3642_v32  ;;  %v4018_v41 = vunpack.c.h.s8.bf16 %v3642_v32  ;;  %v3683_v32 = vld [vmem:[#allocation8 + $0x4c8] sm:$0xff] }
 0x259   :  { %4356 = vmatpush1.bf16.msra.mxu0 %v3938_v36  ;;  %v4012_v36 = vunpack.c.l.s8.bf16 %v3644_v34 }
 0x25a   :  { %4528 = vmatpush1.bf16.msra.mxu1 %v3940_v37  ;;  %4357 = vmatprep.subr.bf16.mxu0 %v3947_v38  ;;  %v4019_v37 = vunpack.c.h.s8.bf16 %v3643_v27  ;;  %v4021_v38 = vunpack.c.h.s8.bf16 %v3645_v28  ;;  %v3676_v27 = vld [vmem:[#allocation8 + $0x490] sm:$0xff] }
 0x25b   :  { %4529 = vmatprep.subr.bf16.mxu1 %v3949_v40  ;;  %v3653_v40 = vld [vmem:[#allocation8 + $0x3d8] sm:$0xff] }
 0x25d   :  { %4358 = vmatpush1.bf16.msra.mxu0 %v3946_v42  ;;  %v4020_v42 = vunpack.c.h.s8.bf16 %v3644_v34 }
 0x25e   :  { %4530 = vmatpush1.bf16.msra.mxu1 %v3948_v43  ;;  %4359 = vmatprep.subr.bf16.mxu0 %v3955_v44  ;;  %v4027_v43 = vunpack.c.l.s8.bf16 %v3651_v39  ;;  %v3650_v44 = vld [vmem:[#allocation8 + $0x3c0] sm:$0xff] }
 0x25f   :  { %4531 = vmatprep.subr.bf16.mxu1 %v3957_v45  ;;  %v4029_v45 = vunpack.c.l.s8.bf16 %v3653_v40  ;;  %v4026_v47 = vunpack.c.l.s8.bf16 %v3650_v44  ;;  %v4034_v54 = vunpack.c.h.s8.bf16 %v3650_v44  ;;  %v3691_v44 = vld [vmem:[#allocation8 + $0x508] sm:$0xff] }
 0x261   :  { %4360 = vmatpush1.bf16.msra.mxu0 %v3954_v49  ;;  %v4028_v49 = vunpack.c.l.s8.bf16 %v3652_v46 }
 0x262   :  { %4532 = vmatpush1.bf16.msra.mxu1 %v3956_v50  ;;  %4361 = vmatprep.subr.bf16.mxu0 %v3963_v51  ;;  %v4035_v50 = vunpack.c.h.s8.bf16 %v3651_v39  ;;  %v4037_v51 = vunpack.c.h.s8.bf16 %v3653_v40  ;;  %v3684_v39 = vld [vmem:[#allocation8 + $0x4d0] sm:$0xff] }
 0x263   :  { %4533 = vmatprep.subr.bf16.mxu1 %v3965_v53  ;;  %v3661_v53 = vld [vmem:[#allocation8 + $0x418] sm:$0xff] }
 0x265   :  { %4362 = vmatpush1.bf16.msra.mxu0 %v3962_v55  ;;  %v4036_v55 = vunpack.c.h.s8.bf16 %v3652_v46 }
 0x266   :  { %4534 = vmatpush1.bf16.msra.mxu1 %v3964_v58  ;;  %4363 = vmatprep.subr.bf16.mxu0 %v3971_v59  ;;  %v4043_v58 = vunpack.c.l.s8.bf16 %v3659_v52  ;;  %v3658_v59 = vld [vmem:[#allocation8 + $0x400] sm:$0xff] }
 0x267   :  { %4535 = vmatprep.subr.bf16.mxu1 %v3973_v60  ;;  %v4045_v60 = vunpack.c.l.s8.bf16 %v3661_v53  ;;  %v4042_v0 = vunpack.c.l.s8.bf16 %v3658_v59  ;;  %v4050_v10 = vunpack.c.h.s8.bf16 %v3658_v59  ;;  %v3699_v59 = vld [vmem:[#allocation8 + $0x548] sm:$0xff] }
 0x269   :  { %4364 = vmatpush1.bf16.msra.mxu0 %v3970_v1  ;;  %v4044_v1 = vunpack.c.l.s8.bf16 %v3660_v63 }
 0x26a   :  { %4536 = vmatpush1.bf16.msra.mxu1 %v3972_v2  ;;  %4365 = vmatprep.subr.bf16.mxu0 %v3979_v7  ;;  %v4051_v2 = vunpack.c.h.s8.bf16 %v3659_v52  ;;  %v4053_v7 = vunpack.c.h.s8.bf16 %v3661_v53  ;;  %v3692_v52 = vld [vmem:[#allocation8 + $0x510] sm:$0xff] }
 0x26b   :  { %4537 = vmatprep.subr.bf16.mxu1 %v3981_v9  ;;  %v3669_v9 = vld [vmem:[#allocation8 + $0x458] sm:$0xff] }
 0x26d   :  { %4366 = vmatpush1.bf16.msra.mxu0 %v3978_v11  ;;  %v4052_v11 = vunpack.c.h.s8.bf16 %v3660_v63 }
 0x26e   :  { %4538 = vmatpush1.bf16.msra.mxu1 %v3980_v12  ;;  %4367 = vmatprep.subr.bf16.mxu0 %v3987_v13  ;;  %v4059_v12 = vunpack.c.l.s8.bf16 %v3667_v8  ;;  %v3666_v13 = vld [vmem:[#allocation8 + $0x440] sm:$0xff] }
 0x26f   :  { %4539 = vmatprep.subr.bf16.mxu1 %v3989_v14  ;;  %v4061_v14 = vunpack.c.l.s8.bf16 %v3669_v9  ;;  %v4058_v16 = vunpack.c.l.s8.bf16 %v3666_v13  ;;  %v4066_v22 = vunpack.c.h.s8.bf16 %v3666_v13  ;;  %v3707_v13 = vld [vmem:[#allocation8 + $0x588] sm:$0xff] }
 0x271   :  { %4368 = vmatpush1.bf16.msra.mxu0 %v3986_v17  ;;  %v4060_v17 = vunpack.c.l.s8.bf16 %v3668_v15 }
 0x272   :  { %4540 = vmatpush1.bf16.msra.mxu1 %v3988_v18  ;;  %4369 = vmatprep.subr.bf16.mxu0 %v3995_v19  ;;  %v4067_v18 = vunpack.c.h.s8.bf16 %v3667_v8  ;;  %v4069_v19 = vunpack.c.h.s8.bf16 %v3669_v9  ;;  %v3700_v8 = vld [vmem:[#allocation8 + $0x550] sm:$0xff] }
 0x273   :  { %4541 = vmatprep.subr.bf16.mxu1 %v3997_v21  ;;  %v3677_v21 = vld [vmem:[#allocation8 + $0x498] sm:$0xff] }
 0x275   :  { %4370 = vmatpush1.bf16.msra.mxu0 %v3994_v23  ;;  %v4068_v23 = vunpack.c.h.s8.bf16 %v3668_v15 }
 0x276   :  { %4542 = vmatpush1.bf16.msra.mxu1 %v3996_v24  ;;  %4371 = vmatprep.subr.bf16.mxu0 %v4003_v25  ;;  %v4075_v24 = vunpack.c.l.s8.bf16 %v3675_v20  ;;  %v3674_v25 = vld [vmem:[#allocation8 + $0x480] sm:$0xff] }
 0x277   :  { %4543 = vmatprep.subr.bf16.mxu1 %v4005_v26  ;;  %v4077_v26 = vunpack.c.l.s8.bf16 %v3677_v21  ;;  %v4074_v28 = vunpack.c.l.s8.bf16 %v3674_v25  ;;  %v4082_v34 = vunpack.c.h.s8.bf16 %v3674_v25  ;;  %v3715_v25 = vld [vmem:[#allocation8 + $0x5c8] sm:$0xff] }
 0x279   :  { %4372 = vmatpush1.bf16.msra.mxu0 %v4002_v29  ;;  %v4076_v29 = vunpack.c.l.s8.bf16 %v3676_v27 }
 0x27a   :  { %4544 = vmatpush1.bf16.msra.mxu1 %v4004_v30  ;;  %4373 = vmatprep.subr.bf16.mxu0 %v4011_v31  ;;  %v4083_v30 = vunpack.c.h.s8.bf16 %v3675_v20  ;;  %v4085_v31 = vunpack.c.h.s8.bf16 %v3677_v21  ;;  %v3708_v20 = vld [vmem:[#allocation8 + $0x590] sm:$0xff] }
 0x27b   :  { %4545 = vmatprep.subr.bf16.mxu1 %v4013_v33  ;;  %v3685_v33 = vld [vmem:[#allocation8 + $0x4d8] sm:$0xff] }
 0x27d   :  { %4374 = vmatpush1.bf16.msra.mxu0 %v4010_v35  ;;  %v4084_v35 = vunpack.c.h.s8.bf16 %v3676_v27 }
 0x27e   :  { %4546 = vmatpush1.bf16.msra.mxu1 %v4012_v36  ;;  %4375 = vmatprep.subr.bf16.mxu0 %v4019_v37  ;;  %v4091_v36 = vunpack.c.l.s8.bf16 %v3683_v32  ;;  %v3682_v37 = vld [vmem:[#allocation8 + $0x4c0] sm:$0xff] }
 0x27f   :  { %4547 = vmatprep.subr.bf16.mxu1 %v4021_v38  ;;  %v4093_v38 = vunpack.c.l.s8.bf16 %v3685_v33  ;;  %v4090_v40 = vunpack.c.l.s8.bf16 %v3682_v37  ;;  %v4098_v46 = vunpack.c.h.s8.bf16 %v3682_v37  ;;  %v6433_v37 = vld [vmem:[#allocation8 + $0x608] sm:$0xff] }
 0x281   :  { %4376 = vmatpush1.bf16.msra.mxu0 %v4018_v41  ;;  %v4092_v41 = vunpack.c.l.s8.bf16 %v3684_v39 }
 0x282   :  { %4548 = vmatpush1.bf16.msra.mxu1 %v4020_v42  ;;  %4377 = vmatprep.subr.bf16.mxu0 %v4027_v43  ;;  %v4099_v42 = vunpack.c.h.s8.bf16 %v3683_v32  ;;  %v4101_v43 = vunpack.c.h.s8.bf16 %v3685_v33  ;;  %v3716_v32 = vld [vmem:[#allocation8 + $0x5d0] sm:$0xff] }
 0x283   :  { %4549 = vmatprep.subr.bf16.mxu1 %v4029_v45  ;;  %v3693_v45 = vld [vmem:[#allocation8 + $0x518] sm:$0xff] }
 0x285   :  { %4378 = vmatpush1.bf16.msra.mxu0 %v4026_v47  ;;  %v4100_v47 = vunpack.c.h.s8.bf16 %v3684_v39 }
 0x286   :  { %4550 = vmatpush1.bf16.msra.mxu1 %v4028_v49  ;;  %4379 = vmatprep.subr.bf16.mxu0 %v4035_v50  ;;  %v4107_v49 = vunpack.c.l.s8.bf16 %v3691_v44  ;;  %v3690_v50 = vld [vmem:[#allocation8 + $0x500] sm:$0xff] }
 0x287   :  { %4551 = vmatprep.subr.bf16.mxu1 %v4037_v51  ;;  %v4109_v51 = vunpack.c.l.s8.bf16 %v3693_v45  ;;  %v4106_v53 = vunpack.c.l.s8.bf16 %v3690_v50  ;;  %v4114_v63 = vunpack.c.h.s8.bf16 %v3690_v50 }
 0x289   :  { %4380 = vmatpush1.bf16.msra.mxu0 %v4034_v54  ;;  %v4108_v54 = vunpack.c.l.s8.bf16 %v3692_v52 }
 0x28a   :  { %4552 = vmatpush1.bf16.msra.mxu1 %v4036_v55  ;;  %4392 = vmatprep.subr.bf16.mxu0 %v4043_v58  ;;  %v4115_v55 = vunpack.c.h.s8.bf16 %v3691_v44  ;;  %v4117_v58 = vunpack.c.h.s8.bf16 %v3693_v45  ;;  %v6443_v44 = vsub.s32 6, %v6374_v48  ;;  %v6446_v45 = vsub.s32 5, %v6374_v48 }
 0x28b   :  { %4564 = vmatprep.subr.bf16.mxu1 %v4045_v60  ;;  %v3701_v60 = vld [vmem:[#allocation8 + $0x558] sm:$0xff] }
 0x28c   :  { %4382 = vmatmul.mubr.bf16.vlgmr.msra.gmra.mrb[8].mxu0 %v6419_v4 }
 0x28d   :  { %4554 = vmatmul.mubr.bf16.vlgmr.msra.gmra.mrb[8].mxu1 %v6419_v4  ;;  %4393 = vmatpush1.bf16.msra.mxu0 %v4042_v0  ;;  %v4116_v0 = vunpack.c.h.s8.bf16 %v3692_v52 }
 0x28e   :  { %4565 = vmatpush1.bf16.msra.mxu1 %v4044_v1  ;;  %4394 = vmatprep.subr.bf16.mxu0 %v4051_v2  ;;  %v4123_v1 = vunpack.c.l.s8.bf16 %v3699_v59  ;;  %v3698_v2 = vld [vmem:[#allocation8 + $0x540] sm:$0xff] }
 0x28f   :  { %4566 = vmatprep.subr.bf16.mxu1 %v4053_v7  ;;  %v4125_v7 = vunpack.c.l.s8.bf16 %v3701_v60  ;;  %v4122_v9 = vunpack.c.l.s8.bf16 %v3698_v2  ;;  %v4130_v15 = vunpack.c.h.s8.bf16 %v3698_v2 }
 0x291   :  { %4395 = vmatpush1.bf16.msra.mxu0 %v4050_v10  ;;  %v4124_v10 = vunpack.c.l.s8.bf16 %v3700_v8 }
 0x292   :  { %4567 = vmatpush1.bf16.msra.mxu1 %v4052_v11  ;;  %4396 = vmatprep.subr.bf16.mxu0 %v4059_v12  ;;  %v4131_v11 = vunpack.c.h.s8.bf16 %v3699_v59  ;;  %v4133_v12 = vunpack.c.h.s8.bf16 %v3701_v60 }
 0x293   :  { %4568 = vmatprep.subr.bf16.mxu1 %v4061_v14  ;;  %v3709_v14 = vld [vmem:[#allocation8 + $0x598] sm:$0xff] }
 0x295   :  { %4397 = vmatpush1.bf16.msra.mxu0 %v4058_v16  ;;  %v4132_v16 = vunpack.c.h.s8.bf16 %v3700_v8 }
 0x296   :  { %4569 = vmatpush1.bf16.msra.mxu1 %v4060_v17  ;;  %4398 = vmatprep.subr.bf16.mxu0 %v4067_v18  ;;  %v4139_v17 = vunpack.c.l.s8.bf16 %v3707_v13  ;;  %v3706_v18 = vld [vmem:[#allocation8 + $0x580] sm:$0xff] }
 0x297   :  { %4570 = vmatprep.subr.bf16.mxu1 %v4069_v19  ;;  %v4141_v19 = vunpack.c.l.s8.bf16 %v3709_v14  ;;  %v4138_v21 = vunpack.c.l.s8.bf16 %v3706_v18  ;;  %v4146_v27 = vunpack.c.h.s8.bf16 %v3706_v18 }
 0x299   :  { %4399 = vmatpush1.bf16.msra.mxu0 %v4066_v22  ;;  %v4140_v22 = vunpack.c.l.s8.bf16 %v3708_v20 }
 0x29a   :  { %4571 = vmatpush1.bf16.msra.mxu1 %v4068_v23  ;;  %4400 = vmatprep.subr.bf16.mxu0 %v4075_v24  ;;  %v4147_v23 = vunpack.c.h.s8.bf16 %v3707_v13  ;;  %v4149_v24 = vunpack.c.h.s8.bf16 %v3709_v14 }
 0x29b   :  { %4572 = vmatprep.subr.bf16.mxu1 %v4077_v26  ;;  %v3717_v26 = vld [vmem:[#allocation8 + $0x5d8] sm:$0xff] }
 0x29d   :  { %4401 = vmatpush1.bf16.msra.mxu0 %v4074_v28  ;;  %v4148_v28 = vunpack.c.h.s8.bf16 %v3708_v20 }
 0x29e   :  { %4573 = vmatpush1.bf16.msra.mxu1 %v4076_v29  ;;  %4402 = vmatprep.subr.bf16.mxu0 %v4083_v30  ;;  %v4155_v29 = vunpack.c.l.s8.bf16 %v3715_v25  ;;  %v3714_v30 = vld [vmem:[#allocation8 + $0x5c0] sm:$0xff] }
 0x29f   :  { %4574 = vmatprep.subr.bf16.mxu1 %v4085_v31  ;;  %v4157_v31 = vunpack.c.l.s8.bf16 %v3717_v26  ;;  %v4154_v33 = vunpack.c.l.s8.bf16 %v3714_v30  ;;  %v4162_v39 = vunpack.c.h.s8.bf16 %v3714_v30  ;;  %v3724_v30 = vld [vmem:[#allocation8 + $0x610] sm:$0xff] }
 0x2a1   :  { %4403 = vmatpush1.bf16.msra.mxu0 %v4082_v34  ;;  %v4156_v34 = vunpack.c.l.s8.bf16 %v3716_v32 }
 0x2a2   :  { %4575 = vmatpush1.bf16.msra.mxu1 %v4084_v35  ;;  %4404 = vmatprep.subr.bf16.mxu0 %v4091_v36  ;;  %v4163_v35 = vunpack.c.h.s8.bf16 %v3715_v25  ;;  %v4165_v36 = vunpack.c.h.s8.bf16 %v3717_v26 }
 0x2a3   :  { %4576 = vmatprep.subr.bf16.mxu1 %v4093_v38  ;;  %v6435_v38 = vld [vmem:[#allocation8 + $0x618] sm:$0xff] }
 0x2a5   :  { %4405 = vmatpush1.bf16.msra.mxu0 %v4090_v40  ;;  %v4164_v40 = vunpack.c.h.s8.bf16 %v3716_v32 }
 0x2a6   :  { %4577 = vmatpush1.bf16.msra.mxu1 %v4092_v41  ;;  %4406 = vmatprep.subr.bf16.mxu0 %v4099_v42  ;;  %v4171_v41 = vunpack.c.l.s8.bf16 %v6433_v37  ;;  %v4173_v42 = vunpack.c.l.s8.bf16 %v6435_v38 }
 0x2a7   :  { %4578 = vmatprep.subr.bf16.mxu1 %v4101_v43  ;;  %v6440_v43 = vsub.s32 4, %v6374_v48 }
 0x2a9   :  { %4407 = vmatpush1.bf16.msra.mxu0 %v4098_v46  ;;  %v6449_v46 = vsub.s32 7, %v6374_v48 }
 0x2aa   :  { %4579 = vmatpush1.bf16.msra.mxu1 %v4100_v47  ;;  %4408 = vmatprep.subr.bf16.mxu0 %v4107_v49  ;;  %v6056_v47 = vld [vmem:[#allocation7] sm:$0xff] }
 0x2ab   :  { %4580 = vmatprep.subr.bf16.mxu1 %v4109_v51  ;;  %v3419_v49 = vrot.slane %v6056_v47, %v6440_v43  ;;  %v3427_v50 = vrot.slane %v6056_v47, %v6443_v44  ;;  %v3423_v51 = vrot.slane %v6056_v47, %v6446_v45  ;;  %v3431_v52 = vrot.slane %v6056_v47, %v6449_v46 }
 0x2ac   :  { %v4179_v47 = vunpack.c.h.s8.bf16 %v6433_v37  ;;  %v3732_v37 = vld [vmem:[#allocation8 + $0x650] sm:$0xff] }
 0x2ad   :  { %4409 = vmatpush1.bf16.msra.mxu0 %v4106_v53  ;;  %v6057_v53 = vld [vmem:[%s6583_s3] sm:$0xff] }
 0x2ae   :  { %4581 = vmatpush1.bf16.msra.mxu1 %v4108_v54  ;;  %4410 = vmatprep.subr.bf16.mxu0 %v4115_v55  ;;  %v3477_v54 = vrot.slane %v6057_v53, %v6440_v43  ;;  %v3485_v55 = vrot.slane %v6057_v53, %v6443_v44  ;;  %v3481_v59 = vrot.slane %v6057_v53, %v6446_v45 }
 0x2af   :  { %4582 = vmatprep.subr.bf16.mxu1 %v4117_v58  ;;  %v3489_v60 = vrot.slane %v6057_v53, %v6449_v46  ;;  %v4180_v53 = vunpack.c.h.s8.bf16 %v3724_v30 }
 0x2b1   :  { %4411 = vmatpush1.bf16.msra.mxu0 %v4114_v63 }
 0x2b2   :  { %4583 = vmatpush1.bf16.msra.mxu1 %v4116_v0  ;;  %4412 = vmatprep.subr.bf16.mxu0 %v4123_v1 }
 0x2b3   :  { %4584 = vmatprep.subr.bf16.mxu1 %v4125_v7 }
 0x2b5   :  { %4413 = vmatpush1.bf16.msra.mxu0 %v4122_v9 }
 0x2b6   :  { %4585 = vmatpush1.bf16.msra.mxu1 %v4124_v10  ;;  %4414 = vmatprep.subr.bf16.mxu0 %v4131_v11 }
 0x2b7   :  { %4586 = vmatprep.subr.bf16.mxu1 %v4133_v12 }
 0x2b9   :  { %4415 = vmatpush1.bf16.msra.mxu0 %v4130_v15 }
 0x2ba   :  { %4587 = vmatpush1.bf16.msra.mxu1 %v4132_v16  ;;  %4416 = vmatprep.subr.bf16.mxu0 %v4139_v17 }
 0x2bb   :  { %4588 = vmatprep.subr.bf16.mxu1 %v4141_v19 }
 0x2bd   :  { %4417 = vmatpush1.bf16.msra.mxu0 %v4138_v21 }
 0x2be   :  { %4589 = vmatpush1.bf16.msra.mxu1 %v4140_v22  ;;  %4418 = vmatprep.subr.bf16.mxu0 %v4147_v23 }
 0x2bf   :  { %4590 = vmatprep.subr.bf16.mxu1 %v4149_v24 }
 0x2c1   :  { %4419 = vmatpush1.bf16.msra.mxu0 %v4146_v27 }
 0x2c2   :  { %4591 = vmatpush1.bf16.msra.mxu1 %v4148_v28  ;;  %4420 = vmatprep.subr.bf16.mxu0 %v4155_v29  ;;  %v3722_v29 = vld [vmem:[#allocation8 + $0x600] sm:$0xff] }
 0x2c3   :  { %4592 = vmatprep.subr.bf16.mxu1 %v4157_v31 }
 0x2c5   :  { %4421 = vmatpush1.bf16.msra.mxu0 %v4154_v33 }
 0x2c6   :  { %4593 = vmatpush1.bf16.msra.mxu1 %v4156_v34  ;;  %4422 = vmatprep.subr.bf16.mxu0 %v4163_v35 }
 0x2c7   :  { %4594 = vmatprep.subr.bf16.mxu1 %v4165_v36 }
 0x2c9   :  { %4423 = vmatpush1.bf16.msra.mxu0 %v4162_v39 }
 0x2ca   :  { %4595 = vmatpush1.bf16.msra.mxu1 %v4164_v40  ;;  %4435 = vmatprep.subr.bf16.mxu0 %v4171_v41  ;;  %v4170_v41 = vunpack.c.l.s8.bf16 %v3722_v29 }
 0x2cb   :  { %4607 = vmatprep.subr.bf16.mxu1 %v4173_v42  ;;  %v4172_v42 = vunpack.c.l.s8.bf16 %v3724_v30 }
 0x2df   :  { %v3217_v58 = vpop.f32.mrb[4].mxu0  ;;  %v3389_v48 = vpop.f32.mrb[4].mxu1 }
 0x2e0   :  { %v3444_v63 = vmul.f32 %v3419_v49, %v3217_v58  ;;  %v3446_v0 = vmul.f32 %v3427_v50, %v3389_v48  ;;  %v3219_v1 = vpop.f32.mrb[5].mxu0  ;;  %v3391_v2 = vpop.f32.mrb[5].mxu1  ;;  %v3730_v58 = vld [vmem:[#allocation8 + $0x640] sm:$0xff]  ;;  %v4188_v48 = vunpack.c.l.s8.bf16 %v3732_v37 }
 0x2e1   :  { %v3445_v7 = vmul.f32 %v3423_v51, %v3219_v1  ;;  %v3447_v8 = vmul.f32 %v3431_v52, %v3391_v2  ;;  %v3221_v9 = vpop.f32.mrb[6].mxu0  ;;  %v3393_v10 = vpop.f32.mrb[6].mxu1  ;;  %v4194_v1 = vunpack.c.h.s8.bf16 %v3730_v58  ;;  %v4196_v2 = vunpack.c.h.s8.bf16 %v3732_v37  ;;  %v3764_v37 = vld [vmem:[#allocation8 + $0x750] sm:$0xff] }
 0x2e2   :  { %v3502_v11 = vadd.f32 %v3477_v54, %v3444_v63  ;;  %v3504_v12 = vadd.f32 %v3485_v55, %v3446_v0  ;;  %v3452_v13 = vmul.f32 %v3419_v49, %v3221_v9  ;;  %v3454_v14 = vmul.f32 %v3427_v50, %v3393_v10  ;;  %v3223_v15 = vpop.f32.mrb[7].mxu0  ;;  %v3395_v16 = vpop.f32.mrb[7].mxu1  ;;  %v3731_v50 = vld [vmem:[#allocation8 + $0x648] sm:$0xff]  ;;  %v3741_v0 = vld [vmem:[#allocation8 + $0x698] sm:$0xff]  ;;  %v3738_v9 = vld [vmem:[#allocation8 + $0x680] sm:$0xff] }
 0x2e3   :  { %v3503_v17 = vadd.f32 %v3481_v59, %v3445_v7  ;;  %v3505_v18 = vadd.f32 %v3489_v60, %v3447_v8  ;;  %v3453_v19 = vmul.f32 %v3423_v51, %v3223_v15  ;;  %v3455_v20 = vmul.f32 %v3431_v52, %v3395_v16  ;;  %v3733_v51 = vld [vmem:[#allocation8 + $0x658] sm:$0xff]  ;;  %v3739_v63 = vld [vmem:[#allocation8 + $0x688] sm:$0xff]  ;;  %v3740_v10 = vld [vmem:[#allocation8 + $0x690] sm:$0xff] }
 0x2e4   :  { %v3510_v21 = vadd.f32 %v3477_v54, %v3452_v13  ;;  %v3512_v22 = vadd.f32 %v3485_v55, %v3454_v14  ;;  %v3518_v25 = vmax.f32 %v3502_v11, 0.0  ;;  %v3520_v26 = vmax.f32 %v3504_v12, 0.0  ;;  %v3747_v15 = vld [vmem:[#allocation8 + $0x6c8] sm:$0xff]  ;;  %v3749_v16 = vld [vmem:[#allocation8 + $0x6d8] sm:$0xff] }
 0x2e5   :  { %v3511_v23 = vadd.f32 %v3481_v59, %v3453_v19  ;;  %v3513_v24 = vadd.f32 %v3489_v60, %v3455_v20  ;;  %v3519_v31 = vmax.f32 %v3503_v17, 0.0  ;;  %v3521_v32 = vmax.f32 %v3505_v18, 0.0 }
 0x2e6   :  { %v3526_v27 = vmax.f32 %v3510_v21, 0.0  ;;  %v3528_v28 = vmax.f32 %v3512_v22, 0.0  ;;  %v4181_v49 = vunpack.c.h.s8.bf16 %v6435_v38  ;;  %v4178_v52 = vunpack.c.h.s8.bf16 %v3722_v29  ;;  %v3746_v21 = vld [vmem:[#allocation8 + $0x6c0] sm:$0xff]  ;;  %v3748_v22 = vld [vmem:[#allocation8 + $0x6d0] sm:$0xff] }
 0x2e7   :  { %v3527_v33 = vmax.f32 %v3511_v23, 0.0  ;;  %v3529_v34 = vmax.f32 %v3513_v24, 0.0  ;;  %v4187_v54 = vunpack.c.l.s8.bf16 %v3731_v50  ;;  %v4189_v55 = vunpack.c.l.s8.bf16 %v3733_v51 }
 0x2e8   :  { %v6462_v35 = vpack.c.bf16 %v3526_v27, %v3518_v25  ;;  %v6464_v36 = vpack.c.bf16 %v3528_v28, %v3520_v26  ;;  %v4186_v38 = vunpack.c.l.s8.bf16 %v3730_v58  ;;  %v4195_v59 = vunpack.c.h.s8.bf16 %v3731_v50  ;;  %v3755_v27 = vld [vmem:[#allocation8 + $0x708] sm:$0xff]  ;;  %v3757_v28 = vld [vmem:[#allocation8 + $0x718] sm:$0xff]  ;;  %v3762_v58 = vld [vmem:[#allocation8 + $0x740] sm:$0xff] }
 0x2e9   :  { %v6466_v39 = vpack.c.bf16 %v3527_v33, %v3519_v31  ;;  %v6468_v40 = vpack.c.bf16 %v3529_v34, %v3521_v32  ;;  %v4197_v60 = vunpack.c.h.s8.bf16 %v3733_v51  ;;  %v4203_v7 = vunpack.c.l.s8.bf16 %v3739_v63  ;;  %v3754_v33 = vld [vmem:[#allocation8 + $0x700] sm:$0xff]  ;;  %v3756_v34 = vld [vmem:[#allocation8 + $0x710] sm:$0xff]  ;;  %v3763_v50 = vld [vmem:[#allocation8 + $0x748] sm:$0xff] }
 0x2ea   :  { %v4205_v8 = vunpack.c.l.s8.bf16 %v3741_v0  ;;  %v4202_v11 = vunpack.c.l.s8.bf16 %v3738_v9  ;;  %v4204_v12 = vunpack.c.l.s8.bf16 %v3740_v10  ;;  %v4211_v13 = vunpack.c.h.s8.bf16 %v3739_v63  ;;  %v3765_v51 = vld [vmem:[#allocation8 + $0x758] sm:$0xff]  ;;  %v3771_v63 = vld [vmem:[#allocation8 + $0x788] sm:$0xff] }
 0x2eb   :  { %4424 = vmatprep.mubr.bf16.mxu0 %v6466_v39  ;;  %4596 = vmatprep.mubr.bf16.mxu1 %v6466_v39  ;;  %v4213_v14 = vunpack.c.h.s8.bf16 %v3741_v0  ;;  %v4210_v17 = vunpack.c.h.s8.bf16 %v3738_v9  ;;  %v4212_v18 = vunpack.c.h.s8.bf16 %v3740_v10  ;;  %v4219_v19 = vunpack.c.l.s8.bf16 %v3747_v15  ;;  %v3773_v0 = vld [vmem:[#allocation8 + $0x798] sm:$0xff]  ;;  %v3770_v9 = vld [vmem:[#allocation8 + $0x780] sm:$0xff]  ;;  %v3772_v10 = vld [vmem:[#allocation8 + $0x790] sm:$0xff] }
 0x2ec   :  { %4425 = vmatmul.mubr.bf16.vlgmr.msra.gmra.mrb[8].mxu0 %v6462_v35  ;;  %4597 = vmatmul.mubr.bf16.vlgmr.msra.gmra.mrb[8].mxu1 %v6462_v35  ;;  %v4221_v20 = vunpack.c.l.s8.bf16 %v3749_v16  ;;  %v4218_v23 = vunpack.c.l.s8.bf16 %v3746_v21  ;;  %v4220_v24 = vunpack.c.l.s8.bf16 %v3748_v22  ;;  %v4227_v25 = vunpack.c.h.s8.bf16 %v3747_v15  ;;  %v3779_v15 = vld [vmem:[#allocation8 + $0x7c8] sm:$0xff] }
 0x2ed   :  { %4436 = vmatpush1.bf16.msra.mxu0 %v4170_v41  ;;  %4608 = vmatpush1.bf16.msra.mxu1 %v4172_v42  ;;  %v4229_v26 = vunpack.c.h.s8.bf16 %v3749_v16  ;;  %v4226_v29 = vunpack.c.h.s8.bf16 %v3746_v21  ;;  %v4228_v30 = vunpack.c.h.s8.bf16 %v3748_v22  ;;  %v4235_v31 = vunpack.c.l.s8.bf16 %v3755_v27  ;;  %v3781_v16 = vld [vmem:[#allocation8 + $0x7d8] sm:$0xff]  ;;  %v3778_v21 = vld [vmem:[#allocation8 + $0x7c0] sm:$0xff]  ;;  %v3780_v22 = vld [vmem:[#allocation8 + $0x7d0] sm:$0xff] }
 0x2ee   :  { %4467 = vmatprep.mubr.bf16.mxu0 %v6468_v40  ;;  %4639 = vmatprep.mubr.bf16.mxu1 %v6468_v40  ;;  %v4237_v32 = vunpack.c.l.s8.bf16 %v3757_v28  ;;  %v4234_v41 = vunpack.c.l.s8.bf16 %v3754_v33  ;;  %v4236_v42 = vunpack.c.l.s8.bf16 %v3756_v34 }
 0x2ef   :  { %4437 = vmatprep.subr.bf16.mxu0 %v4179_v47  ;;  %4609 = vmatprep.subr.bf16.mxu1 %v4181_v49  ;;  %v4243_v47 = vunpack.c.h.s8.bf16 %v3755_v27  ;;  %v4245_v49 = vunpack.c.h.s8.bf16 %v3757_v28  ;;  %v3535_v27 = vld [vmem:[#allocation8 + $0x28] sm:$0xff]  ;;  %v3537_v28 = vld [vmem:[#allocation8 + $0x38] sm:$0xff] }
 0x2f1   :  { %4438 = vmatpush1.bf16.msra.mxu0 %v4178_v52  ;;  %4610 = vmatpush1.bf16.msra.mxu1 %v4180_v53  ;;  %v4242_v52 = vunpack.c.h.s8.bf16 %v3754_v33  ;;  %v4244_v53 = vunpack.c.h.s8.bf16 %v3756_v34  ;;  %v3534_v33 = vld [vmem:[#allocation8 + $0x20] sm:$0xff]  ;;  %v3536_v34 = vld [vmem:[#allocation8 + $0x30] sm:$0xff] }
 0x2f2   :  { %4439 = vmatprep.subr.bf16.mxu0 %v4187_v54  ;;  %4611 = vmatprep.subr.bf16.mxu1 %v4189_v55  ;;  %v4251_v54 = vunpack.c.l.s8.bf16 %v3763_v50  ;;  %v4253_v55 = vunpack.c.l.s8.bf16 %v3765_v51 }
 0x2f5   :  { %4440 = vmatpush1.bf16.msra.mxu0 %v4186_v38  ;;  %4612 = vmatpush1.bf16.msra.mxu1 %v4188_v48  ;;  %v4250_v38 = vunpack.c.l.s8.bf16 %v3762_v58  ;;  %v4252_v48 = vunpack.c.l.s8.bf16 %v3764_v37 }
 0x2f6   :  { %4441 = vmatprep.subr.bf16.mxu0 %v4195_v59  ;;  %4613 = vmatprep.subr.bf16.mxu1 %v4197_v60  ;;  %v4259_v59 = vunpack.c.h.s8.bf16 %v3763_v50  ;;  %v4261_v60 = vunpack.c.h.s8.bf16 %v3765_v51  ;;  %v3543_v50 = vld [vmem:[#allocation8 + $0x68] sm:$0xff]  ;;  %v3545_v51 = vld [vmem:[#allocation8 + $0x78] sm:$0xff] }
 0x2f9   :  { %4442 = vmatpush1.bf16.msra.mxu0 %v4194_v1  ;;  %4614 = vmatpush1.bf16.msra.mxu1 %v4196_v2  ;;  %v4258_v1 = vunpack.c.h.s8.bf16 %v3762_v58  ;;  %v4260_v2 = vunpack.c.h.s8.bf16 %v3764_v37  ;;  %v3809_v58 = vunpack.c.l.s8.bf16 %v3545_v51  ;;  %v3544_v37 = vld [vmem:[#allocation8 + $0x70] sm:$0xff] }
 0x2fa   :  { %4443 = vmatprep.subr.bf16.mxu0 %v4203_v7  ;;  %4615 = vmatprep.subr.bf16.mxu1 %v4205_v8  ;;  %v4267_v7 = vunpack.c.l.s8.bf16 %v3771_v63  ;;  %v4269_v8 = vunpack.c.l.s8.bf16 %v3773_v0 }
 0x2fd   :  { %4444 = vmatpush1.bf16.msra.mxu0 %v4202_v11  ;;  %4616 = vmatpush1.bf16.msra.mxu1 %v4204_v12  ;;  %v4266_v11 = vunpack.c.l.s8.bf16 %v3770_v9  ;;  %v4268_v12 = vunpack.c.l.s8.bf16 %v3772_v10 }
 0x2fe   :  { %4445 = vmatprep.subr.bf16.mxu0 %v4211_v13  ;;  %4617 = vmatprep.subr.bf16.mxu1 %v4213_v14  ;;  %v4275_v13 = vunpack.c.h.s8.bf16 %v3771_v63  ;;  %v4277_v14 = vunpack.c.h.s8.bf16 %v3773_v0  ;;  %v3551_v63 = vld [vmem:[#allocation8 + $0xa8] sm:$0xff]  ;;  %v3553_v0 = vld [vmem:[#allocation8 + $0xb8] sm:$0xff] }
 0x301   :  { %4446 = vmatpush1.bf16.msra.mxu0 %v4210_v17  ;;  %4618 = vmatpush1.bf16.msra.mxu1 %v4212_v18  ;;  %v4274_v17 = vunpack.c.h.s8.bf16 %v3770_v9  ;;  %v4276_v18 = vunpack.c.h.s8.bf16 %v3772_v10  ;;  %v3552_v9 = vld [vmem:[#allocation8 + $0xb0] sm:$0xff] }
 0x302   :  { %4447 = vmatprep.subr.bf16.mxu0 %v4219_v19  ;;  %4619 = vmatprep.subr.bf16.mxu1 %v4221_v20  ;;  %v4283_v19 = vunpack.c.l.s8.bf16 %v3779_v15  ;;  %v4285_v20 = vunpack.c.l.s8.bf16 %v3781_v16 }
 0x305   :  { %4448 = vmatpush1.bf16.msra.mxu0 %v4218_v23  ;;  %4620 = vmatpush1.bf16.msra.mxu1 %v4220_v24  ;;  %v4282_v23 = vunpack.c.l.s8.bf16 %v3778_v21  ;;  %v4284_v24 = vunpack.c.l.s8.bf16 %v3780_v22 }
 0x306   :  { %4449 = vmatprep.subr.bf16.mxu0 %v4227_v25  ;;  %4621 = vmatprep.subr.bf16.mxu1 %v4229_v26  ;;  %v4291_v25 = vunpack.c.h.s8.bf16 %v3779_v15  ;;  %v4293_v26 = vunpack.c.h.s8.bf16 %v3781_v16  ;;  %v3561_v15 = vld [vmem:[#allocation8 + $0xf8] sm:$0xff] }
 0x309   :  { %4450 = vmatpush1.bf16.msra.mxu0 %v4226_v29  ;;  %4622 = vmatpush1.bf16.msra.mxu1 %v4228_v30  ;;  %v4290_v29 = vunpack.c.h.s8.bf16 %v3778_v21  ;;  %v4292_v30 = vunpack.c.h.s8.bf16 %v3780_v22  ;;  %v3560_v21 = vld [vmem:[#allocation8 + $0xf0] sm:$0xff] }
 0x30a   :  { %4451 = vmatprep.subr.bf16.mxu0 %v4235_v31  ;;  %4623 = vmatprep.subr.bf16.mxu1 %v4237_v32  ;;  %v3791_v31 = vunpack.c.l.s8.bf16 %v3535_v27  ;;  %v3793_v32 = vunpack.c.l.s8.bf16 %v3537_v28 }
 0x30d   :  { %4452 = vmatpush1.bf16.msra.mxu0 %v4234_v41  ;;  %4624 = vmatpush1.bf16.msra.mxu1 %v4236_v42  ;;  %v3790_v41 = vunpack.c.l.s8.bf16 %v3534_v33  ;;  %v3792_v42 = vunpack.c.l.s8.bf16 %v3536_v34 }
 0x30e   :  { %4453 = vmatprep.subr.bf16.mxu0 %v4243_v47  ;;  %4625 = vmatprep.subr.bf16.mxu1 %v4245_v49  ;;  %v3799_v47 = vunpack.c.h.s8.bf16 %v3535_v27  ;;  %v3801_v49 = vunpack.c.h.s8.bf16 %v3537_v28  ;;  %v3569_v27 = vld [vmem:[#allocation8 + $0x138] sm:$0xff] }
 0x311   :  { %4454 = vmatpush1.bf16.msra.mxu0 %v4242_v52  ;;  %4626 = vmatpush1.bf16.msra.mxu1 %v4244_v53  ;;  %v3798_v52 = vunpack.c.h.s8.bf16 %v3534_v33  ;;  %v3800_v53 = vunpack.c.h.s8.bf16 %v3536_v34  ;;  %v3568_v33 = vld [vmem:[#allocation8 + $0x130] sm:$0xff] }
 0x312   :  { %4455 = vmatprep.subr.bf16.mxu0 %v4251_v54  ;;  %4627 = vmatprep.subr.bf16.mxu1 %v4253_v55  ;;  %v3807_v54 = vunpack.c.l.s8.bf16 %v3543_v50  ;;  %v3542_v55 = vld [vmem:[#allocation8 + $0x60] sm:$0xff] }
 0x315   :  { %4456 = vmatpush1.bf16.msra.mxu0 %v4250_v38  ;;  %4628 = vmatpush1.bf16.msra.mxu1 %v4252_v48  ;;  %v3806_v38 = vunpack.c.l.s8.bf16 %v3542_v55  ;;  %v3808_v48 = vunpack.c.l.s8.bf16 %v3544_v37 }
 0x316   :  { %4457 = vmatprep.subr.bf16.mxu0 %v4259_v59  ;;  %4629 = vmatprep.subr.bf16.mxu1 %v4261_v60  ;;  %v3815_v59 = vunpack.c.h.s8.bf16 %v3543_v50  ;;  %v3817_v60 = vunpack.c.h.s8.bf16 %v3545_v51  ;;  %v3577_v50 = vld [vmem:[#allocation8 + $0x178] sm:$0xff] }
 0x319   :  { %4458 = vmatpush1.bf16.msra.mxu0 %v4258_v1  ;;  %4630 = vmatpush1.bf16.msra.mxu1 %v4260_v2  ;;  %v3814_v1 = vunpack.c.h.s8.bf16 %v3542_v55  ;;  %v3823_v2 = vunpack.c.l.s8.bf16 %v3551_v63  ;;  %v3873_v55 = vunpack.c.l.s8.bf16 %v3577_v50 }
 0x31a   :  { %4459 = vmatprep.subr.bf16.mxu0 %v4267_v7  ;;  %4631 = vmatprep.subr.bf16.mxu1 %v4269_v8  ;;  %v3550_v7 = vld [vmem:[#allocation8 + $0xa0] sm:$0xff]  ;;  %v3825_v8 = vunpack.c.l.s8.bf16 %v3553_v0 }
 0x31b   :  { %v3822_v10 = vunpack.c.l.s8.bf16 %v3550_v7  ;;  %v3830_v16 = vunpack.c.h.s8.bf16 %v3550_v7 }
 0x31d   :  { %4460 = vmatpush1.bf16.msra.mxu0 %v4266_v11  ;;  %4632 = vmatpush1.bf16.msra.mxu1 %v4268_v12  ;;  %v3824_v11 = vunpack.c.l.s8.bf16 %v3552_v9  ;;  %v3831_v12 = vunpack.c.h.s8.bf16 %v3551_v63  ;;  %v3585_v63 = vld [vmem:[#allocation8 + $0x1b8] sm:$0xff] }
 0x31e   :  { %4461 = vmatprep.subr.bf16.mxu0 %v4275_v13  ;;  %4633 = vmatprep.subr.bf16.mxu1 %v4277_v14  ;;  %v3833_v13 = vunpack.c.h.s8.bf16 %v3553_v0  ;;  %v3559_v14 = vld [vmem:[#allocation8 + $0xe8] sm:$0xff]  ;;  %v3889_v7 = vunpack.c.l.s8.bf16 %v3585_v63 }
 0x321   :  { %4462 = vmatpush1.bf16.msra.mxu0 %v4274_v17  ;;  %4634 = vmatpush1.bf16.msra.mxu1 %v4276_v18  ;;  %v3832_v17 = vunpack.c.h.s8.bf16 %v3552_v9  ;;  %v3839_v18 = vunpack.c.l.s8.bf16 %v3559_v14 }
 0x322   :  { %4463 = vmatprep.subr.bf16.mxu0 %v4283_v19  ;;  %4635 = vmatprep.subr.bf16.mxu1 %v4285_v20  ;;  %v3558_v19 = vld [vmem:[#allocation8 + $0xe0] sm:$0xff]  ;;  %v3841_v20 = vunpack.c.l.s8.bf16 %v3561_v15 }
 0x323   :  { %v3838_v22 = vunpack.c.l.s8.bf16 %v3558_v19  ;;  %v3846_v28 = vunpack.c.h.s8.bf16 %v3558_v19 }
 0x325   :  { %4464 = vmatpush1.bf16.msra.mxu0 %v4282_v23  ;;  %4636 = vmatpush1.bf16.msra.mxu1 %v4284_v24  ;;  %v3840_v23 = vunpack.c.l.s8.bf16 %v3560_v21  ;;  %v3847_v24 = vunpack.c.h.s8.bf16 %v3559_v14  ;;  %v3593_v14 = vld [vmem:[#allocation8 + $0x1f8] sm:$0xff] }
 0x326   :  { %4465 = vmatprep.subr.bf16.mxu0 %v4291_v25  ;;  %4637 = vmatprep.subr.bf16.mxu1 %v4293_v26  ;;  %v3849_v25 = vunpack.c.h.s8.bf16 %v3561_v15  ;;  %v3567_v26 = vld [vmem:[#allocation8 + $0x128] sm:$0xff]  ;;  %v3905_v19 = vunpack.c.l.s8.bf16 %v3593_v14 }
 0x329   :  { %4466 = vmatpush1.bf16.msra.mxu0 %v4290_v29  ;;  %4638 = vmatpush1.bf16.msra.mxu1 %v4292_v30  ;;  %v3848_v29 = vunpack.c.h.s8.bf16 %v3560_v21  ;;  %v3855_v30 = vunpack.c.l.s8.bf16 %v3567_v26 }
 0x32a   :  { %4650 = vmatprep.subr.bf16.mxu0 %v3791_v31  ;;  %4822 = vmatprep.subr.bf16.mxu1 %v3793_v32  ;;  %v3566_v31 = vld [vmem:[#allocation8 + $0x120] sm:$0xff]  ;;  %v3857_v32 = vunpack.c.l.s8.bf16 %v3569_v27 }
 0x32b   :  { %v3854_v34 = vunpack.c.l.s8.bf16 %v3566_v31  ;;  %v3862_v51 = vunpack.c.h.s8.bf16 %v3566_v31 }
 0x32c   :  { %4468 = vmatmul.mubr.bf16.vlgmr.msra.gmra.mrb[8].mxu0 %v6464_v36  ;;  %4640 = vmatmul.mubr.bf16.vlgmr.msra.gmra.mrb[8].mxu1 %v6464_v36 }
 0x32d   :  { %4651 = vmatpush1.bf16.msra.mxu0 %v3790_v41  ;;  %4682 = vmatprep.mubr.bf16.mxu0 %v6421_v5  ;;  %v3856_v41 = vunpack.c.l.s8.bf16 %v3568_v33 }
 0x32e   :  { %4823 = vmatpush1.bf16.msra.mxu1 %v3792_v42  ;;  %4854 = vmatprep.mubr.bf16.mxu1 %v6421_v5  ;;  %v3816_v5 = vunpack.c.h.s8.bf16 %v3544_v37  ;;  %v3863_v42 = vunpack.c.h.s8.bf16 %v3567_v26  ;;  %v3601_v26 = vld [vmem:[#allocation8 + $0x238] sm:$0xff] }
 0x32f   :  { %4652 = vmatprep.subr.bf16.mxu0 %v3799_v47  ;;  %4824 = vmatprep.subr.bf16.mxu1 %v3801_v49  ;;  %v3865_v47 = vunpack.c.h.s8.bf16 %v3569_v27  ;;  %v3575_v49 = vld [vmem:[#allocation8 + $0x168] sm:$0xff]  ;;  %v3921_v31 = vunpack.c.l.s8.bf16 %v3601_v26 }
 0x331   :  { %4653 = vmatpush1.bf16.msra.mxu0 %v3798_v52  ;;  %v3864_v52 = vunpack.c.h.s8.bf16 %v3568_v33 }
 0x332   :  { %4825 = vmatpush1.bf16.msra.mxu1 %v3800_v53  ;;  %4654 = vmatprep.subr.bf16.mxu0 %v3807_v54  ;;  %v3871_v53 = vunpack.c.l.s8.bf16 %v3575_v49  ;;  %v3574_v54 = vld [vmem:[#allocation8 + $0x160] sm:$0xff] }
 0x333   :  { %4826 = vmatprep.subr.bf16.mxu1 %v3809_v58  ;;  %v3576_v58 = vld [vmem:[#allocation8 + $0x170] sm:$0xff]  ;;  %v3870_v37 = vunpack.c.l.s8.bf16 %v3574_v54  ;;  %v3878_v0 = vunpack.c.h.s8.bf16 %v3574_v54 }
 0x335   :  { %4655 = vmatpush1.bf16.msra.mxu0 %v3806_v38  ;;  %v3872_v38 = vunpack.c.l.s8.bf16 %v3576_v58 }
 0x336   :  { %4827 = vmatpush1.bf16.msra.mxu1 %v3808_v48  ;;  %4656 = vmatprep.subr.bf16.mxu0 %v3815_v59  ;;  %v3879_v48 = vunpack.c.h.s8.bf16 %v3575_v49  ;;  %v3881_v59 = vunpack.c.h.s8.bf16 %v3577_v50  ;;  %v3609_v49 = vld [vmem:[#allocation8 + $0x278] sm:$0xff] }
 0x337   :  { %4828 = vmatprep.subr.bf16.mxu1 %v3817_v60  ;;  %v3583_v60 = vld [vmem:[#allocation8 + $0x1a8] sm:$0xff]  ;;  %v3937_v54 = vunpack.c.l.s8.bf16 %v3609_v49 }
 0x339   :  { %4657 = vmatpush1.bf16.msra.mxu0 %v3814_v1  ;;  %v3880_v1 = vunpack.c.h.s8.bf16 %v3576_v58 }
 0x33a   :  { %4829 = vmatpush1.bf16.msra.mxu1 %v3816_v5  ;;  %4658 = vmatprep.subr.bf16.mxu0 %v3823_v2  ;;  %v3887_v5 = vunpack.c.l.s8.bf16 %v3583_v60  ;;  %v3582_v2 = vld [vmem:[#allocation8 + $0x1a0] sm:$0xff] }
 0x33b   :  { %4830 = vmatprep.subr.bf16.mxu1 %v3825_v8  ;;  %v3584_v8 = vld [vmem:[#allocation8 + $0x1b0] sm:$0xff]  ;;  %v3886_v9 = vunpack.c.l.s8.bf16 %v3582_v2  ;;  %v3894_v15 = vunpack.c.h.s8.bf16 %v3582_v2 }
 0x33d   :  { %4659 = vmatpush1.bf16.msra.mxu0 %v3822_v10  ;;  %v3888_v10 = vunpack.c.l.s8.bf16 %v3584_v8 }
 0x33e   :  { %4831 = vmatpush1.bf16.msra.mxu1 %v3824_v11  ;;  %4660 = vmatprep.subr.bf16.mxu0 %v3831_v12  ;;  %v3895_v11 = vunpack.c.h.s8.bf16 %v3583_v60  ;;  %v3897_v12 = vunpack.c.h.s8.bf16 %v3585_v63 }
 0x33f   :  { %4832 = vmatprep.subr.bf16.mxu1 %v3833_v13  ;;  %v3591_v13 = vld [vmem:[#allocation8 + $0x1e8] sm:$0xff] }
 0x341   :  { %4661 = vmatpush1.bf16.msra.mxu0 %v3830_v16  ;;  %v3896_v16 = vunpack.c.h.s8.bf16 %v3584_v8 }
 0x342   :  { %4833 = vmatpush1.bf16.msra.mxu1 %v3832_v17  ;;  %4662 = vmatprep.subr.bf16.mxu0 %v3839_v18  ;;  %v3903_v17 = vunpack.c.l.s8.bf16 %v3591_v13  ;;  %v3590_v18 = vld [vmem:[#allocation8 + $0x1e0] sm:$0xff] }
 0x343   :  { %4834 = vmatprep.subr.bf16.mxu1 %v3841_v20  ;;  %v3592_v20 = vld [vmem:[#allocation8 + $0x1f0] sm:$0xff]  ;;  %v3902_v21 = vunpack.c.l.s8.bf16 %v3590_v18  ;;  %v3910_v27 = vunpack.c.h.s8.bf16 %v3590_v18 }
 0x345   :  { %4663 = vmatpush1.bf16.msra.mxu0 %v3838_v22  ;;  %v3904_v22 = vunpack.c.l.s8.bf16 %v3592_v20 }
 0x346   :  { %4835 = vmatpush1.bf16.msra.mxu1 %v3840_v23  ;;  %4664 = vmatprep.subr.bf16.mxu0 %v3847_v24  ;;  %v3911_v23 = vunpack.c.h.s8.bf16 %v3591_v13  ;;  %v3913_v24 = vunpack.c.h.s8.bf16 %v3593_v14 }
 0x347   :  { %4836 = vmatprep.subr.bf16.mxu1 %v3849_v25  ;;  %v3599_v25 = vld [vmem:[#allocation8 + $0x228] sm:$0xff] }
 0x349   :  { %4665 = vmatpush1.bf16.msra.mxu0 %v3846_v28  ;;  %v3912_v28 = vunpack.c.h.s8.bf16 %v3592_v20 }
 0x34a   :  { %4837 = vmatpush1.bf16.msra.mxu1 %v3848_v29  ;;  %4666 = vmatprep.subr.bf16.mxu0 %v3855_v30  ;;  %v3919_v29 = vunpack.c.l.s8.bf16 %v3599_v25  ;;  %v3598_v30 = vld [vmem:[#allocation8 + $0x220] sm:$0xff] }
 0x34b   :  { %4838 = vmatprep.subr.bf16.mxu1 %v3857_v32  ;;  %v3600_v32 = vld [vmem:[#allocation8 + $0x230] sm:$0xff]  ;;  %v3918_v33 = vunpack.c.l.s8.bf16 %v3598_v30  ;;  %v3926_v50 = vunpack.c.h.s8.bf16 %v3598_v30 }
 0x34d   :  { %4667 = vmatpush1.bf16.msra.mxu0 %v3854_v34  ;;  %v3920_v34 = vunpack.c.l.s8.bf16 %v3600_v32 }
 0x34e   :  { %4839 = vmatpush1.bf16.msra.mxu1 %v3856_v41  ;;  %4668 = vmatprep.subr.bf16.mxu0 %v3863_v42  ;;  %v3927_v41 = vunpack.c.h.s8.bf16 %v3599_v25  ;;  %v3607_v42 = vld [vmem:[#allocation8 + $0x268] sm:$0xff] }
 0x34f   :  { %4840 = vmatprep.subr.bf16.mxu1 %v3865_v47  ;;  %v3929_v47 = vunpack.c.h.s8.bf16 %v3601_v26 }
 0x351   :  { %4669 = vmatpush1.bf16.msra.mxu0 %v3862_v51  ;;  %v3928_v51 = vunpack.c.h.s8.bf16 %v3600_v32 }
 0x352   :  { %4841 = vmatpush1.bf16.msra.mxu1 %v3864_v52  ;;  %4670 = vmatprep.subr.bf16.mxu0 %v3871_v53  ;;  %v3935_v52 = vunpack.c.l.s8.bf16 %v3607_v42  ;;  %v3606_v53 = vld [vmem:[#allocation8 + $0x260] sm:$0xff] }
 0x353   :  { %4842 = vmatprep.subr.bf16.mxu1 %v3873_v55  ;;  %v3608_v55 = vld [vmem:[#allocation8 + $0x270] sm:$0xff]  ;;  %v3934_v58 = vunpack.c.l.s8.bf16 %v3606_v53  ;;  %v3942_v60 = vunpack.c.h.s8.bf16 %v3606_v53 }
 0x354   :  { %v3944_v63 = vunpack.c.h.s8.bf16 %v3608_v55 }
 0x355   :  { %4671 = vmatpush1.bf16.msra.mxu0 %v3870_v37  ;;  %v3936_v37 = vunpack.c.l.s8.bf16 %v3608_v55 }
 0x356   :  { %4843 = vmatpush1.bf16.msra.mxu1 %v3872_v38  ;;  %4672 = vmatprep.subr.bf16.mxu0 %v3879_v48  ;;  %v3945_v38 = vunpack.c.h.s8.bf16 %v3609_v49  ;;  %v3615_v48 = vld [vmem:[#allocation8 + $0x2a8] sm:$0xff] }
 0x357   :  { %4844 = vmatprep.subr.bf16.mxu1 %v3881_v59  ;;  %v3617_v59 = vld [vmem:[#allocation8 + $0x2b8] sm:$0xff]  ;;  %v3959_v8 = vunpack.c.h.s8.bf16 %v3615_v48 }
 0x359   :  { %4673 = vmatpush1.bf16.msra.mxu0 %v3878_v0  ;;  %v3614_v0 = vld [vmem:[#allocation8 + $0x2a0] sm:$0xff] }
 0x35a   :  { %4845 = vmatpush1.bf16.msra.mxu1 %v3880_v1  ;;  %4674 = vmatprep.subr.bf16.mxu0 %v3887_v5  ;;  %v3953_v1 = vunpack.c.l.s8.bf16 %v3617_v59  ;;  %v3616_v5 = vld [vmem:[#allocation8 + $0x2b0] sm:$0xff]  ;;  %v3950_v2 = vunpack.c.l.s8.bf16 %v3614_v0 }
 0x35b   :  { %4846 = vmatprep.subr.bf16.mxu1 %v3889_v7  ;;  %v3952_v7 = vunpack.c.l.s8.bf16 %v3616_v5  ;;  %v3960_v13 = vunpack.c.h.s8.bf16 %v3616_v5 }
 0x35d   :  { %4675 = vmatpush1.bf16.msra.mxu0 %v3886_v9  ;;  %v3961_v9 = vunpack.c.h.s8.bf16 %v3617_v59 }
 0x35e   :  { %4847 = vmatpush1.bf16.msra.mxu1 %v3888_v10  ;;  %4676 = vmatprep.subr.bf16.mxu0 %v3895_v11  ;;  %v3623_v10 = vld [vmem:[#allocation8 + $0x2e8] sm:$0xff]  ;;  %v3625_v11 = vld [vmem:[#allocation8 + $0x2f8] sm:$0xff] }
 0x35f   :  { %4848 = vmatprep.subr.bf16.mxu1 %v3897_v12  ;;  %v3958_v12 = vunpack.c.h.s8.bf16 %v3614_v0  ;;  %v3967_v14 = vunpack.c.l.s8.bf16 %v3623_v10  ;;  %v3975_v20 = vunpack.c.h.s8.bf16 %v3623_v10 }
 0x361   :  { %4677 = vmatpush1.bf16.msra.mxu0 %v3894_v15  ;;  %v3622_v15 = vld [vmem:[#allocation8 + $0x2e0] sm:$0xff] }
 0x362   :  { %4849 = vmatpush1.bf16.msra.mxu1 %v3896_v16  ;;  %4678 = vmatprep.subr.bf16.mxu0 %v3903_v17  ;;  %v3969_v16 = vunpack.c.l.s8.bf16 %v3625_v11  ;;  %v3624_v17 = vld [vmem:[#allocation8 + $0x2f0] sm:$0xff]  ;;  %v3966_v18 = vunpack.c.l.s8.bf16 %v3622_v15 }
 0x363   :  { %4850 = vmatprep.subr.bf16.mxu1 %v3905_v19  ;;  %v3968_v19 = vunpack.c.l.s8.bf16 %v3624_v17  ;;  %v3976_v25 = vunpack.c.h.s8.bf16 %v3624_v17 }
 0x365   :  { %4679 = vmatpush1.bf16.msra.mxu0 %v3902_v21  ;;  %v3977_v21 = vunpack.c.h.s8.bf16 %v3625_v11 }
 0x366   :  { %4851 = vmatpush1.bf16.msra.mxu1 %v3904_v22  ;;  %4680 = vmatprep.subr.bf16.mxu0 %v3911_v23  ;;  %v3631_v22 = vld [vmem:[#allocation8 + $0x328] sm:$0xff]  ;;  %v3633_v23 = vld [vmem:[#allocation8 + $0x338] sm:$0xff] }
 0x367   :  { %4852 = vmatprep.subr.bf16.mxu1 %v3913_v24  ;;  %v3974_v24 = vunpack.c.h.s8.bf16 %v3622_v15  ;;  %v3983_v26 = vunpack.c.l.s8.bf16 %v3631_v22  ;;  %v3991_v32 = vunpack.c.h.s8.bf16 %v3631_v22 }
 0x369   :  { %4681 = vmatpush1.bf16.msra.mxu0 %v3910_v27  ;;  %v3630_v27 = vld [vmem:[#allocation8 + $0x320] sm:$0xff] }
 0x36a   :  { %4853 = vmatpush1.bf16.msra.mxu1 %v3912_v28  ;;  %4693 = vmatprep.subr.bf16.mxu0 %v3919_v29  ;;  %v3985_v28 = vunpack.c.l.s8.bf16 %v3633_v23  ;;  %v3632_v29 = vld [vmem:[#allocation8 + $0x330] sm:$0xff]  ;;  %v3982_v30 = vunpack.c.l.s8.bf16 %v3630_v27 }
 0x36b   :  { %4865 = vmatprep.subr.bf16.mxu1 %v3921_v31  ;;  %v3984_v31 = vunpack.c.l.s8.bf16 %v3632_v29 }
 0x36c   :  { %4683 = vmatmul.mubr.bf16.vlgmr.msra.gmra.mrb[12].mxu0 %v6417_v3 }
 0x36d   :  { %4855 = vmatmul.mubr.bf16.vlgmr.msra.gmra.mrb[12].mxu1 %v6417_v3  ;;  %4694 = vmatpush1.bf16.msra.mxu0 %v3918_v33  ;;  %v3943_v3 = vunpack.c.h.s8.bf16 %v3607_v42  ;;  %v3993_v33 = vunpack.c.h.s8.bf16 %v3633_v23  ;;  %v3990_v42 = vunpack.c.h.s8.bf16 %v3630_v27 }
 0x36e   :  { %4725 = vmatprep.mubr.bf16.mxu0 %v6423_v6  ;;  %4866 = vmatpush1.bf16.msra.mxu1 %v3920_v34  ;;  %v3639_v34 = vld [vmem:[#allocation8 + $0x368] sm:$0xff] }
 0x36f   :  { %4897 = vmatprep.mubr.bf16.mxu1 %v6423_v6  ;;  %4695 = vmatprep.subr.bf16.mxu0 %v3927_v41  ;;  %v3951_v6 = vunpack.c.l.s8.bf16 %v3615_v48  ;;  %v3641_v41 = vld [vmem:[#allocation8 + $0x378] sm:$0xff]  ;;  %v3999_v49 = vunpack.c.l.s8.bf16 %v3639_v34  ;;  %v4007_v55 = vunpack.c.h.s8.bf16 %v3639_v34 }
 0x370   :  { %4867 = vmatprep.subr.bf16.mxu1 %v3929_v47  ;;  %v3992_v47 = vunpack.c.h.s8.bf16 %v3632_v29 }
 0x371   :  { %4696 = vmatpush1.bf16.msra.mxu0 %v3926_v50  ;;  %v3638_v50 = vld [vmem:[#allocation8 + $0x360] sm:$0xff] }
 0x372   :  { %4868 = vmatpush1.bf16.msra.mxu1 %v3928_v51  ;;  %4697 = vmatprep.subr.bf16.mxu0 %v3935_v52  ;;  %v4001_v51 = vunpack.c.l.s8.bf16 %v3641_v41  ;;  %v3640_v52 = vld [vmem:[#allocation8 + $0x370] sm:$0xff]  ;;  %v3998_v53 = vunpack.c.l.s8.bf16 %v3638_v50 }
 0x373   :  { %4869 = vmatprep.subr.bf16.mxu1 %v3937_v54  ;;  %v4000_v54 = vunpack.c.l.s8.bf16 %v3640_v52  ;;  %v4008_v48 = vunpack.c.h.s8.bf16 %v3640_v52 }
 0x375   :  { %4698 = vmatpush1.bf16.msra.mxu0 %v3934_v58  ;;  %v4009_v58 = vunpack.c.h.s8.bf16 %v3641_v41 }
 0x376   :  { %4870 = vmatpush1.bf16.msra.mxu1 %v3936_v37  ;;  %4699 = vmatprep.subr.bf16.mxu0 %v3943_v3  ;;  %v3647_v37 = vld [vmem:[#allocation8 + $0x3a8] sm:$0xff]  ;;  %v3649_v3 = vld [vmem:[#allocation8 + $0x3b8] sm:$0xff] }
 0x377   :  { %4871 = vmatprep.subr.bf16.mxu1 %v3945_v38  ;;  %v4006_v38 = vunpack.c.h.s8.bf16 %v3638_v50  ;;  %v4015_v59 = vunpack.c.l.s8.bf16 %v3647_v37  ;;  %v4023_v5 = vunpack.c.h.s8.bf16 %v3647_v37  ;;  %v3678_v37 = vld [vmem:[#allocation8 + $0x4a0] sm:$0xff] }
 0x379   :  { %4700 = vmatpush1.bf16.msra.mxu0 %v3942_v60  ;;  %v3646_v60 = vld [vmem:[#allocation8 + $0x3a0] sm:$0xff] }
 0x37a   :  { %4872 = vmatpush1.bf16.msra.mxu1 %v3944_v63  ;;  %4701 = vmatprep.subr.bf16.mxu0 %v3951_v6  ;;  %v4017_v63 = vunpack.c.l.s8.bf16 %v3649_v3  ;;  %v3648_v6 = vld [vmem:[#allocation8 + $0x3b0] sm:$0xff]  ;;  %v4014_v0 = vunpack.c.l.s8.bf16 %v3646_v60 }
 0x37b   :  { %4873 = vmatprep.subr.bf16.mxu1 %v3953_v1  ;;  %v4016_v1 = vunpack.c.l.s8.bf16 %v3648_v6  ;;  %v4024_v10 = vunpack.c.h.s8.bf16 %v3648_v6  ;;  %v3687_v6 = vld [vmem:[#allocation8 + $0x4e8] sm:$0xff] }
 0x37d   :  { %4702 = vmatpush1.bf16.msra.mxu0 %v3950_v2  ;;  %v4025_v2 = vunpack.c.h.s8.bf16 %v3649_v3 }
 0x37e   :  { %4874 = vmatpush1.bf16.msra.mxu1 %v3952_v7  ;;  %4703 = vmatprep.subr.bf16.mxu0 %v3959_v8  ;;  %v3655_v7 = vld [vmem:[#allocation8 + $0x3e8] sm:$0xff]  ;;  %v3657_v8 = vld [vmem:[#allocation8 + $0x3f8] sm:$0xff] }
 0x37f   :  { %4875 = vmatprep.subr.bf16.mxu1 %v3961_v9  ;;  %v4022_v9 = vunpack.c.h.s8.bf16 %v3646_v60  ;;  %v4031_v11 = vunpack.c.l.s8.bf16 %v3655_v7  ;;  %v4039_v17 = vunpack.c.h.s8.bf16 %v3655_v7  ;;  %v3686_v7 = vld [vmem:[#allocation8 + $0x4e0] sm:$0xff] }
 0x381   :  { %4704 = vmatpush1.bf16.msra.mxu0 %v3958_v12  ;;  %v3654_v12 = vld [vmem:[#allocation8 + $0x3e0] sm:$0xff] }
 0x382   :  { %4876 = vmatpush1.bf16.msra.mxu1 %v3960_v13  ;;  %4705 = vmatprep.subr.bf16.mxu0 %v3967_v14  ;;  %v4033_v13 = vunpack.c.l.s8.bf16 %v3657_v8  ;;  %v3656_v14 = vld [vmem:[#allocation8 + $0x3f0] sm:$0xff]  ;;  %v4030_v15 = vunpack.c.l.s8.bf16 %v3654_v12 }
 0x383   :  { %4877 = vmatprep.subr.bf16.mxu1 %v3969_v16  ;;  %v4032_v16 = vunpack.c.l.s8.bf16 %v3656_v14  ;;  %v4040_v22 = vunpack.c.h.s8.bf16 %v3656_v14  ;;  %v3695_v14 = vld [vmem:[#allocation8 + $0x528] sm:$0xff] }
 0x385   :  { %4706 = vmatpush1.bf16.msra.mxu0 %v3966_v18  ;;  %v4041_v18 = vunpack.c.h.s8.bf16 %v3657_v8 }
 0x386   :  { %4878 = vmatpush1.bf16.msra.mxu1 %v3968_v19  ;;  %4707 = vmatprep.subr.bf16.mxu0 %v3975_v20  ;;  %v3663_v19 = vld [vmem:[#allocation8 + $0x428] sm:$0xff]  ;;  %v3665_v20 = vld [vmem:[#allocation8 + $0x438] sm:$0xff] }
 0x387   :  { %4879 = vmatprep.subr.bf16.mxu1 %v3977_v21  ;;  %v4038_v21 = vunpack.c.h.s8.bf16 %v3654_v12  ;;  %v4047_v23 = vunpack.c.l.s8.bf16 %v3663_v19  ;;  %v4055_v29 = vunpack.c.h.s8.bf16 %v3663_v19  ;;  %v4103_v12 = vunpack.c.h.s8.bf16 %v3687_v6  ;;  %v3694_v19 = vld [vmem:[#allocation8 + $0x520] sm:$0xff] }
 0x389   :  { %4708 = vmatpush1.bf16.msra.mxu0 %v3974_v24  ;;  %v3662_v24 = vld [vmem:[#allocation8 + $0x420] sm:$0xff] }
 0x38a   :  { %4880 = vmatpush1.bf16.msra.mxu1 %v3976_v25  ;;  %4709 = vmatprep.subr.bf16.mxu0 %v3983_v26  ;;  %v4049_v25 = vunpack.c.l.s8.bf16 %v3665_v20  ;;  %v3664_v26 = vld [vmem:[#allocation8 + $0x430] sm:$0xff]  ;;  %v4046_v27 = vunpack.c.l.s8.bf16 %v3662_v24 }
 0x38b   :  { %4881 = vmatprep.subr.bf16.mxu1 %v3985_v28  ;;  %v4048_v28 = vunpack.c.l.s8.bf16 %v3664_v26  ;;  %v4056_v34 = vunpack.c.h.s8.bf16 %v3664_v26  ;;  %v3703_v26 = vld [vmem:[#allocation8 + $0x568] sm:$0xff] }
 0x38d   :  { %4710 = vmatpush1.bf16.msra.mxu0 %v3982_v30  ;;  %v3671_v30 = vld [vmem:[#allocation8 + $0x468] sm:$0xff] }
 0x38e   :  { %4882 = vmatpush1.bf16.msra.mxu1 %v3984_v31  ;;  %4711 = vmatprep.subr.bf16.mxu0 %v3991_v32  ;;  %v4057_v31 = vunpack.c.h.s8.bf16 %v3665_v20  ;;  %v3673_v32 = vld [vmem:[#allocation8 + $0x478] sm:$0xff]  ;;  %v4063_v41 = vunpack.c.l.s8.bf16 %v3671_v30 }
 0x38f   :  { %4883 = vmatprep.subr.bf16.mxu1 %v3993_v33  ;;  %v4054_v33 = vunpack.c.h.s8.bf16 %v3662_v24  ;;  %v4073_v52 = vunpack.c.h.s8.bf16 %v3673_v32  ;;  %v4119_v24 = vunpack.c.h.s8.bf16 %v3695_v14 }
 0x391   :  { %4712 = vmatpush1.bf16.msra.mxu0 %v3990_v42  ;;  %v3670_v42 = vld [vmem:[#allocation8 + $0x460] sm:$0xff] }
 0x392   :  { %4884 = vmatpush1.bf16.msra.mxu1 %v3992_v47  ;;  %4713 = vmatprep.subr.bf16.mxu0 %v3999_v49  ;;  %v4065_v47 = vunpack.c.l.s8.bf16 %v3673_v32  ;;  %v3672_v49 = vld [vmem:[#allocation8 + $0x470] sm:$0xff]  ;;  %v4062_v50 = vunpack.c.l.s8.bf16 %v3670_v42 }
 0x393   :  { %4885 = vmatprep.subr.bf16.mxu1 %v4001_v51  ;;  %v4064_v51 = vunpack.c.l.s8.bf16 %v3672_v49 }
 0x395   :  { %4714 = vmatpush1.bf16.msra.mxu0 %v3998_v53  ;;  %v3679_v53 = vld [vmem:[#allocation8 + $0x4a8] sm:$0xff] }
 0x396   :  { %4886 = vmatpush1.bf16.msra.mxu1 %v4000_v54  ;;  %4715 = vmatprep.subr.bf16.mxu0 %v4007_v55  ;;  %v3681_v54 = vld [vmem:[#allocation8 + $0x4b8] sm:$0xff]  ;;  %v4070_v55 = vunpack.c.h.s8.bf16 %v3670_v42  ;;  %v4087_v60 = vunpack.c.h.s8.bf16 %v3679_v53  ;;  %v4135_v42 = vunpack.c.h.s8.bf16 %v3703_v26 }
 0x397   :  { %4887 = vmatprep.subr.bf16.mxu1 %v4009_v58  ;;  %v4072_v58 = vunpack.c.h.s8.bf16 %v3672_v49  ;;  %v4081_v3 = vunpack.c.l.s8.bf16 %v3681_v54  ;;  %v3711_v49 = vld [vmem:[#allocation8 + $0x5a8] sm:$0xff] }
 0x399   :  { %4716 = vmatpush1.bf16.msra.mxu0 %v4006_v38  ;;  %v3680_v38 = vld [vmem:[#allocation8 + $0x4b0] sm:$0xff] }
 0x39a   :  { %4888 = vmatpush1.bf16.msra.mxu1 %v4008_v48  ;;  %4717 = vmatprep.subr.bf16.mxu0 %v4015_v59  ;;  %v4078_v48 = vunpack.c.l.s8.bf16 %v3678_v37  ;;  %v4080_v59 = vunpack.c.l.s8.bf16 %v3680_v38 }
 0x39b   :  { %4889 = vmatprep.subr.bf16.mxu1 %v4017_v63  ;;  %v4089_v63 = vunpack.c.h.s8.bf16 %v3681_v54 }
 0x39d   :  { %4718 = vmatpush1.bf16.msra.mxu0 %v4014_v0  ;;  %v3689_v0 = vld [vmem:[#allocation8 + $0x4f8] sm:$0xff] }
 0x39e   :  { %4890 = vmatpush1.bf16.msra.mxu1 %v4016_v1  ;;  %4719 = vmatprep.subr.bf16.mxu0 %v4023_v5  ;;  %v4086_v1 = vunpack.c.h.s8.bf16 %v3678_v37  ;;  %v4088_v5 = vunpack.c.h.s8.bf16 %v3680_v38  ;;  %v4097_v8 = vunpack.c.l.s8.bf16 %v3689_v0  ;;  %v4151_v37 = vunpack.c.h.s8.bf16 %v3711_v49  ;;  %v3719_v38 = vld [vmem:[#allocation8 + $0x5e8] sm:$0xff] }
 0x39f   :  { %4891 = vmatprep.subr.bf16.mxu1 %v4025_v2  ;;  %v4095_v2 = vunpack.c.l.s8.bf16 %v3687_v6  ;;  %v3718_v6 = vld [vmem:[#allocation8 + $0x5e0] sm:$0xff] }
 0x3a1   :  { %4720 = vmatpush1.bf16.msra.mxu0 %v4022_v9  ;;  %v3688_v9 = vld [vmem:[#allocation8 + $0x4f0] sm:$0xff] }
 0x3a2   :  { %4892 = vmatpush1.bf16.msra.mxu1 %v4024_v10  ;;  %4721 = vmatprep.subr.bf16.mxu0 %v4031_v11  ;;  %v4094_v10 = vunpack.c.l.s8.bf16 %v3686_v7  ;;  %v4096_v11 = vunpack.c.l.s8.bf16 %v3688_v9 }
 0x3a3   :  { %4893 = vmatprep.subr.bf16.mxu1 %v4033_v13  ;;  %v4105_v13 = vunpack.c.h.s8.bf16 %v3689_v0 }
 0x3a5   :  { %4722 = vmatpush1.bf16.msra.mxu0 %v4030_v15  ;;  %v3697_v15 = vld [vmem:[#allocation8 + $0x538] sm:$0xff] }
 0x3a6   :  { %4894 = vmatpush1.bf16.msra.mxu1 %v4032_v16  ;;  %4723 = vmatprep.subr.bf16.mxu0 %v4039_v17  ;;  %v4102_v16 = vunpack.c.h.s8.bf16 %v3686_v7  ;;  %v4104_v17 = vunpack.c.h.s8.bf16 %v3688_v9  ;;  %v4113_v20 = vunpack.c.l.s8.bf16 %v3697_v15  ;;  %v4167_v7 = vunpack.c.h.s8.bf16 %v3719_v38  ;;  %v3727_v9 = vld [vmem:[#allocation8 + $0x628] sm:$0xff] }
 0x3a7   :  { %4895 = vmatprep.subr.bf16.mxu1 %v4041_v18  ;;  %v4111_v18 = vunpack.c.l.s8.bf16 %v3695_v14  ;;  %v3726_v14 = vld [vmem:[#allocation8 + $0x620] sm:$0xff] }
 0x3a9   :  { %4724 = vmatpush1.bf16.msra.mxu0 %v4038_v21  ;;  %v3696_v21 = vld [vmem:[#allocation8 + $0x530] sm:$0xff] }
 0x3aa   :  { %4896 = vmatpush1.bf16.msra.mxu1 %v4040_v22  ;;  %4736 = vmatprep.subr.bf16.mxu0 %v4047_v23  ;;  %v4110_v22 = vunpack.c.l.s8.bf16 %v3694_v19  ;;  %v4112_v23 = vunpack.c.l.s8.bf16 %v3696_v21 }
 0x3ab   :  { %4908 = vmatprep.subr.bf16.mxu1 %v4049_v25  ;;  %v4121_v25 = vunpack.c.h.s8.bf16 %v3697_v15 }
 0x3ac   :  { %4726 = vmatmul.mubr.bf16.vlgmr.msra.gmra.mrb[12].mxu0 %v6419_v4 }
 0x3ad   :  { %4898 = vmatmul.mubr.bf16.vlgmr.msra.gmra.mrb[12].mxu1 %v6419_v4  ;;  %4737 = vmatpush1.bf16.msra.mxu0 %v4046_v27  ;;  %v4071_v4 = vunpack.c.h.s8.bf16 %v3671_v30  ;;  %v3705_v27 = vld [vmem:[#allocation8 + $0x578] sm:$0xff]  ;;  %v4127_v30 = vunpack.c.l.s8.bf16 %v3703_v26  ;;  %v3734_v26 = vld [vmem:[#allocation8 + $0x660] sm:$0xff] }
 0x3ae   :  { %4768 = vmatprep.mubr.bf16.mxu0 %v6466_v39  ;;  %4909 = vmatpush1.bf16.msra.mxu1 %v4048_v28  ;;  %v4118_v28 = vunpack.c.h.s8.bf16 %v3694_v19  ;;  %v4129_v32 = vunpack.c.l.s8.bf16 %v3705_v27  ;;  %v4183_v19 = vunpack.c.h.s8.bf16 %v3727_v9 }
 0x3af   :  { %4940 = vmatprep.mubr.bf16.mxu1 %v6466_v39  ;;  %4738 = vmatprep.subr.bf16.mxu0 %v4055_v29  ;;  %v4079_v39 = vunpack.c.l.s8.bf16 %v3679_v53  ;;  %v4120_v29 = vunpack.c.h.s8.bf16 %v3696_v21  ;;  %v3710_v53 = vld [vmem:[#allocation8 + $0x5a0] sm:$0xff] }
 0x3b0   :  { %4910 = vmatprep.subr.bf16.mxu1 %v4057_v31  ;;  %v3702_v31 = vld [vmem:[#allocation8 + $0x560] sm:$0xff] }
 0x3b1   :  { %4739 = vmatpush1.bf16.msra.mxu0 %v4054_v33  ;;  %v3704_v33 = vld [vmem:[#allocation8 + $0x570] sm:$0xff] }
 0x3b2   :  { %4911 = vmatpush1.bf16.msra.mxu1 %v4056_v34  ;;  %4740 = vmatprep.subr.bf16.mxu0 %v4063_v41  ;;  %v4126_v34 = vunpack.c.l.s8.bf16 %v3702_v31  ;;  %v4128_v41 = vunpack.c.l.s8.bf16 %v3704_v33 }
 0x3b3   :  { %4912 = vmatprep.subr.bf16.mxu1 %v4065_v47  ;;  %v4137_v47 = vunpack.c.h.s8.bf16 %v3705_v27 }
 0x3b5   :  { %4741 = vmatpush1.bf16.msra.mxu0 %v4062_v50  ;;  %v3713_v50 = vld [vmem:[#allocation8 + $0x5b8] sm:$0xff] }
 0x3b6   :  { %4913 = vmatpush1.bf16.msra.mxu1 %v4064_v51  ;;  %4742 = vmatprep.subr.bf16.mxu0 %v4071_v4  ;;  %v4134_v51 = vunpack.c.h.s8.bf16 %v3702_v31  ;;  %v4136_v4 = vunpack.c.h.s8.bf16 %v3704_v33  ;;  %v4145_v54 = vunpack.c.l.s8.bf16 %v3713_v50  ;;  %v3745_v33 = vld [vmem:[#allocation8 + $0x6b8] sm:$0xff] }
 0x3b7   :  { %4914 = vmatprep.subr.bf16.mxu1 %v4073_v52  ;;  %v4143_v52 = vunpack.c.l.s8.bf16 %v3711_v49  ;;  %v3744_v49 = vld [vmem:[#allocation8 + $0x6b0] sm:$0xff] }
 0x3b9   :  { %4743 = vmatpush1.bf16.msra.mxu0 %v4070_v55  ;;  %v3712_v55 = vld [vmem:[#allocation8 + $0x5b0] sm:$0xff] }
 0x3ba   :  { %4915 = vmatpush1.bf16.msra.mxu1 %v4072_v58  ;;  %4744 = vmatprep.subr.bf16.mxu0 %v4079_v39  ;;  %v4142_v58 = vunpack.c.l.s8.bf16 %v3710_v53  ;;  %v4144_v39 = vunpack.c.l.s8.bf16 %v3712_v55 }
 0x3bb   :  { %4916 = vmatprep.subr.bf16.mxu1 %v4081_v3  ;;  %v4153_v3 = vunpack.c.h.s8.bf16 %v3713_v50 }
 0x3bd   :  { %4745 = vmatpush1.bf16.msra.mxu0 %v4078_v48  ;;  %v3721_v48 = vld [vmem:[#allocation8 + $0x5f8] sm:$0xff] }
 0x3be   :  { %4917 = vmatpush1.bf16.msra.mxu1 %v4080_v59  ;;  %4746 = vmatprep.subr.bf16.mxu0 %v4087_v60  ;;  %v4150_v59 = vunpack.c.h.s8.bf16 %v3710_v53  ;;  %v4152_v60 = vunpack.c.h.s8.bf16 %v3712_v55  ;;  %v4161_v0 = vunpack.c.l.s8.bf16 %v3721_v48  ;;  %v6499_v53 = vld [vmem:[#allocation10] sm:$0xff] }
 0x3bf   :  { %4918 = vmatprep.subr.bf16.mxu1 %v4089_v63  ;;  %v4159_v63 = vunpack.c.l.s8.bf16 %v3719_v38 }
 0x3c1   :  { %4747 = vmatpush1.bf16.msra.mxu0 %v4086_v1  ;;  %v3720_v1 = vld [vmem:[#allocation8 + $0x5f0] sm:$0xff] }
 0x3c2   :  { %4919 = vmatpush1.bf16.msra.mxu1 %v4088_v5  ;;  %4748 = vmatprep.subr.bf16.mxu0 %v4095_v2  ;;  %v4158_v5 = vunpack.c.l.s8.bf16 %v3718_v6  ;;  %v4160_v2 = vunpack.c.l.s8.bf16 %v3720_v1 }
 0x3c3   :  { %4920 = vmatprep.subr.bf16.mxu1 %v4097_v8  ;;  %v4169_v8 = vunpack.c.h.s8.bf16 %v3721_v48 }
 0x3c5   :  { %4749 = vmatpush1.bf16.msra.mxu0 %v4094_v10  ;;  %v3729_v10 = vld [vmem:[#allocation8 + $0x638] sm:$0xff] }
 0x3c6   :  { %4921 = vmatpush1.bf16.msra.mxu1 %v4096_v11  ;;  %4750 = vmatprep.subr.bf16.mxu0 %v4103_v12  ;;  %v4166_v11 = vunpack.c.h.s8.bf16 %v3718_v6  ;;  %v4168_v12 = vunpack.c.h.s8.bf16 %v3720_v1  ;;  %v4177_v15 = vunpack.c.l.s8.bf16 %v3729_v10  ;;  %v4185_v21 = vunpack.c.h.s8.bf16 %v3729_v10 }
 0x3c7   :  { %4922 = vmatprep.subr.bf16.mxu1 %v4105_v13  ;;  %v4175_v13 = vunpack.c.l.s8.bf16 %v3727_v9  ;;  %v5065_v6 = vrot.slane %v6499_v53, %v6386_v57 }
 0x3c9   :  { %4751 = vmatpush1.bf16.msra.mxu0 %v4102_v16  ;;  %v3728_v16 = vld [vmem:[#allocation8 + $0x630] sm:$0xff] }
 0x3ca   :  { %4923 = vmatpush1.bf16.msra.mxu1 %v4104_v17  ;;  %4752 = vmatprep.subr.bf16.mxu0 %v4111_v18  ;;  %v4174_v17 = vunpack.c.l.s8.bf16 %v3726_v14  ;;  %v4176_v18 = vunpack.c.l.s8.bf16 %v3728_v16 }
 0x3cb   :  { %4924 = vmatprep.subr.bf16.mxu1 %v4113_v20  ;;  %v3735_v20 = vld [vmem:[#allocation8 + $0x668] sm:$0xff] }
 0x3cd   :  { %4753 = vmatpush1.bf16.msra.mxu0 %v4110_v22  ;;  %v3737_v22 = vld [vmem:[#allocation8 + $0x678] sm:$0xff] }
 0x3ce   :  { %4925 = vmatpush1.bf16.msra.mxu1 %v4112_v23  ;;  %4754 = vmatprep.subr.bf16.mxu0 %v4119_v24  ;;  %v4182_v23 = vunpack.c.h.s8.bf16 %v3726_v14  ;;  %v4184_v24 = vunpack.c.h.s8.bf16 %v3728_v16  ;;  %v4193_v27 = vunpack.c.l.s8.bf16 %v3737_v22  ;;  %v4201_v31 = vunpack.c.h.s8.bf16 %v3737_v22 }
 0x3cf   :  { %4926 = vmatprep.subr.bf16.mxu1 %v4121_v25  ;;  %v4191_v25 = vunpack.c.l.s8.bf16 %v3735_v20 }
 0x3d1   :  { %4755 = vmatpush1.bf16.msra.mxu0 %v4118_v28  ;;  %v3736_v28 = vld [vmem:[#allocation8 + $0x670] sm:$0xff] }
 0x3d2   :  { %4927 = vmatpush1.bf16.msra.mxu1 %v4120_v29  ;;  %4756 = vmatprep.subr.bf16.mxu0 %v4127_v30  ;;  %v4190_v29 = vunpack.c.l.s8.bf16 %v3734_v26  ;;  %v4192_v30 = vunpack.c.l.s8.bf16 %v3736_v28 }
 0x3d3   :  { %4928 = vmatprep.subr.bf16.mxu1 %v4129_v32  ;;  %v3743_v32 = vld [vmem:[#allocation8 + $0x6a8] sm:$0xff] }
 0x3d5   :  { %4757 = vmatpush1.bf16.msra.mxu0 %v4126_v34  ;;  %v4198_v34 = vunpack.c.h.s8.bf16 %v3734_v26 }
 0x3d6   :  { %4929 = vmatpush1.bf16.msra.mxu1 %v4128_v41  ;;  %4758 = vmatprep.subr.bf16.mxu0 %v4135_v42  ;;  %v4200_v41 = vunpack.c.h.s8.bf16 %v3736_v28  ;;  %v3742_v42 = vld [vmem:[#allocation8 + $0x6a0] sm:$0xff] }
 0x3d7   :  { %4930 = vmatprep.subr.bf16.mxu1 %v4137_v47  ;;  %v4209_v47 = vunpack.c.l.s8.bf16 %v3745_v33  ;;  %v4206_v50 = vunpack.c.l.s8.bf16 %v3742_v42  ;;  %v4214_v48 = vunpack.c.h.s8.bf16 %v3742_v42 }
 0x3d9   :  { %4759 = vmatpush1.bf16.msra.mxu0 %v4134_v51  ;;  %v6497_v51 = vld [vmem:[%s6585_s5] sm:$0xff] }
 0x3da   :  { %4931 = vmatpush1.bf16.msra.mxu1 %v4136_v4  ;;  %4760 = vmatprep.subr.bf16.mxu0 %v4143_v52  ;;  %v4208_v4 = vunpack.c.l.s8.bf16 %v3744_v49  ;;  %v4215_v52 = vunpack.c.h.s8.bf16 %v3743_v32  ;;  %v4999_v55 = vrot.slane %v6497_v51, %v6383_v56  ;;  %v5011_v38 = vrot.slane %v6497_v51, %v6392_v62 }
 0x3db   :  { %4932 = vmatprep.subr.bf16.mxu1 %v4145_v54  ;;  %v4217_v54 = vunpack.c.h.s8.bf16 %v3745_v33 }
 0x3dd   :  { %4761 = vmatpush1.bf16.msra.mxu0 %v4142_v58  ;;  %v5007_v58 = vrot.slane %v6497_v51, %v6386_v57 }
 0x3de   :  { %4933 = vmatpush1.bf16.msra.mxu1 %v4144_v39  ;;  %4762 = vmatprep.subr.bf16.mxu0 %v4151_v37  ;;  %v3751_v39 = vld [vmem:[#allocation8 + $0x6e8] sm:$0xff]  ;;  %v6505_v37 = vld [vmem:[#allocation8 + $0x6f8] sm:$0xff] }
 0x3df   :  { %4934 = vmatprep.subr.bf16.mxu1 %v4153_v3  ;;  %v5003_v3 = vrot.slane %v6497_v51, %v6389_v61  ;;  %v4225_v9 = vunpack.c.l.s8.bf16 %v6505_v37 }
 0x3e1   :  { %4763 = vmatpush1.bf16.msra.mxu0 %v4150_v59  ;;  %v6511_v59 = vld [vmem:[#allocation8 + $0x6e0] sm:$0xff] }
 0x3e2   :  { %4935 = vmatpush1.bf16.msra.mxu1 %v4152_v60  ;;  %4764 = vmatprep.subr.bf16.mxu0 %v4159_v63  ;;  %v6513_v60 = vld [vmem:[#allocation8 + $0x6f0] sm:$0xff]  ;;  %v5057_v63 = vrot.slane %v6499_v53, %v6383_v56  ;;  %v4222_v57 = vunpack.c.l.s8.bf16 %v6511_v59 }
 0x3e3   :  { %4936 = vmatprep.subr.bf16.mxu1 %v4161_v0  ;;  %v4216_v0 = vunpack.c.h.s8.bf16 %v3744_v49 }
 0x3e5   :  { %4765 = vmatpush1.bf16.msra.mxu0 %v4158_v5 }
 0x3e6   :  { %4937 = vmatpush1.bf16.msra.mxu1 %v4160_v2  ;;  %4766 = vmatprep.subr.bf16.mxu0 %v4167_v7  ;;  %v5061_v2 = vrot.slane %v6499_v53, %v6389_v61  ;;  %v5069_v7 = vrot.slane %v6499_v53, %v6392_v62  ;;  %v4231_v61 = vunpack.c.h.s8.bf16 %v3751_v39  ;;  %v4233_v62 = vunpack.c.h.s8.bf16 %v6505_v37 }
 0x3e7   :  { %4938 = vmatprep.subr.bf16.mxu1 %v4169_v8  ;;  %v4223_v8 = vunpack.c.l.s8.bf16 %v3751_v39  ;;  %v3760_v39 = vld [vmem:[#allocation8 + $0x730] sm:$0xff] }
 0x3e9   :  { %4767 = vmatpush1.bf16.msra.mxu0 %v4166_v11 }
 0x3ea   :  { %4939 = vmatpush1.bf16.msra.mxu1 %v4168_v12  ;;  %4779 = vmatprep.subr.bf16.mxu0 %v4175_v13  ;;  %v4224_v13 = vunpack.c.l.s8.bf16 %v6513_v60 }
 0x3eb   :  { %4951 = vmatprep.subr.bf16.mxu1 %v4177_v15 }
 0x3ec   :  { %4769 = vmatmul.mubr.bf16.vlgmr.msra.gmra.mrb[12].mxu0 %v6462_v35 }
 0x3ed   :  { %4941 = vmatmul.mubr.bf16.vlgmr.msra.gmra.mrb[12].mxu1 %v6462_v35  ;;  %4780 = vmatpush1.bf16.msra.mxu0 %v4174_v17  ;;  %v4199_v35 = vunpack.c.h.s8.bf16 %v3735_v20 }
 0x3ee   :  { %4811 = vmatprep.mubr.bf16.mxu0 %v6468_v40  ;;  %4952 = vmatpush1.bf16.msra.mxu1 %v4176_v18 }
 0x3ef   :  { %4983 = vmatprep.mubr.bf16.mxu1 %v6468_v40  ;;  %4781 = vmatprep.subr.bf16.mxu0 %v4183_v19  ;;  %v4207_v40 = vunpack.c.l.s8.bf16 %v3743_v32  ;;  %v4232_v32 = vunpack.c.h.s8.bf16 %v6513_v60  ;;  %v4240_v60 = vunpack.c.l.s8.bf16 %v3760_v39 }
 0x3f0   :  { %4953 = vmatprep.subr.bf16.mxu1 %v4185_v21 }
 0x3f1   :  { %4782 = vmatpush1.bf16.msra.mxu0 %v4182_v23 }
 0x3f2   :  { %4954 = vmatpush1.bf16.msra.mxu1 %v4184_v24  ;;  %4783 = vmatprep.subr.bf16.mxu0 %v4191_v25  ;;  %v3759_v24 = vld [vmem:[#allocation8 + $0x728] sm:$0xff]  ;;  %v3761_v25 = vld [vmem:[#allocation8 + $0x738] sm:$0xff] }
 0x3f3   :  { %4955 = vmatprep.subr.bf16.mxu1 %v4193_v27 }
 0x3f5   :  { %4784 = vmatpush1.bf16.msra.mxu0 %v4190_v29 }
 0x3f6   :  { %4956 = vmatpush1.bf16.msra.mxu1 %v4192_v30  ;;  %4785 = vmatprep.subr.bf16.mxu0 %v4199_v35 }
 0x3f7   :  { %4957 = vmatprep.subr.bf16.mxu1 %v4201_v31  ;;  %v4230_v31 = vunpack.c.h.s8.bf16 %v6511_v59 }
 0x3f9   :  { %4786 = vmatpush1.bf16.msra.mxu0 %v4198_v34 }
 0x3fa   :  { %4958 = vmatpush1.bf16.msra.mxu1 %v4200_v41  ;;  %4787 = vmatprep.subr.bf16.mxu0 %v4207_v40  ;;  %v4239_v41 = vunpack.c.l.s8.bf16 %v3759_v24  ;;  %v4241_v40 = vunpack.c.l.s8.bf16 %v3761_v25 }
 0x3fb   :  { %4959 = vmatprep.subr.bf16.mxu1 %v4209_v47 }
 0x3fd   :  { %4788 = vmatpush1.bf16.msra.mxu0 %v4206_v50 }
 0x3fe   :  { %4960 = vmatpush1.bf16.msra.mxu1 %v4208_v4  ;;  %4789 = vmatprep.subr.bf16.mxu0 %v4215_v52  ;;  %v3758_v4 = vld [vmem:[#allocation8 + $0x720] sm:$0xff] }
 0x3ff   :  { %v4469_v1 = vpop.f32.mrb[8].mxu0  ;;  %v4641_v5 = vpop.f32.mrb[8].mxu1  ;;  %4961 = vmatprep.subr.bf16.mxu1 %v4217_v54 }
 0x400   :  { %v5036_v10 = vmul.f32 %v4999_v55, %v4469_v1  ;;  %v5038_v11 = vmul.f32 %v5007_v58, %v4641_v5  ;;  %v4471_v56 = vpop.f32.mrb[9].mxu0  ;;  %v4643_v12 = vpop.f32.mrb[9].mxu1  ;;  %v3769_v1 = vld [vmem:[#allocation8 + $0x778] sm:$0xff]  ;;  %v4246_v5 = vunpack.c.h.s8.bf16 %v3758_v4 }
 0x401   :  { %v5037_v14 = vmul.f32 %v5003_v3, %v4471_v56  ;;  %v5039_v15 = vmul.f32 %v5011_v38, %v4643_v12  ;;  %v4473_v16 = vpop.f32.mrb[10].mxu0  ;;  %v4645_v17 = vpop.f32.mrb[10].mxu1  ;;  %4790 = vmatpush1.bf16.msra.mxu0 %v4214_v48 }
 0x402   :  { %v5094_v18 = vadd.f32 %v5057_v63, %v5036_v10  ;;  %v5096_v19 = vadd.f32 %v5065_v6, %v5038_v11  ;;  %v5044_v20 = vmul.f32 %v4999_v55, %v4473_v16  ;;  %v5046_v21 = vmul.f32 %v5007_v58, %v4645_v17  ;;  %4962 = vmatpush1.bf16.msra.mxu1 %v4216_v0  ;;  %v4475_v22 = vpop.f32.mrb[11].mxu0  ;;  %v4647_v23 = vpop.f32.mrb[11].mxu1  ;;  %v3767_v0 = vld [vmem:[#allocation8 + $0x768] sm:$0xff]  ;;  %v3768_v10 = vld [vmem:[#allocation8 + $0x770] sm:$0xff] }
 0x403   :  { %v5095_v26 = vadd.f32 %v5061_v2, %v5037_v14  ;;  %v5097_v27 = vadd.f32 %v5069_v7, %v5039_v15  ;;  %v5045_v28 = vmul.f32 %v5003_v3, %v4475_v22  ;;  %v5047_v29 = vmul.f32 %v5011_v38, %v4647_v23  ;;  %4791 = vmatprep.subr.bf16.mxu0 %v4223_v8  ;;  %v3766_v8 = vld [vmem:[#allocation8 + $0x760] sm:$0xff]  ;;  %v3777_v14 = vld [vmem:[#allocation8 + $0x7b8] sm:$0xff]  ;;  %v3783_v23 = vld [vmem:[#allocation8 + $0x7e8] sm:$0xff] }
 0x404   :  { %v5102_v30 = vadd.f32 %v5057_v63, %v5044_v20  ;;  %v5104_v35 = vadd.f32 %v5065_v6, %v5046_v21  ;;  %4963 = vmatprep.subr.bf16.mxu1 %v4225_v9  ;;  %v5110_v42 = vmax.f32 %v5094_v18, 0.0  ;;  %v5112_v47 = vmax.f32 %v5096_v19, 0.0  ;;  %v3776_v18 = vld [vmem:[#allocation8 + $0x7b0] sm:$0xff] }
 0x405   :  { %v5103_v33 = vadd.f32 %v5061_v2, %v5045_v28  ;;  %v5105_v34 = vadd.f32 %v5069_v7, %v5047_v29  ;;  %4792 = vmatpush1.bf16.msra.mxu0 %v4222_v57  ;;  %v5111_v52 = vmax.f32 %v5095_v26, 0.0  ;;  %v5113_v54 = vmax.f32 %v5097_v27, 0.0  ;;  %v3782_v28 = vld [vmem:[#allocation8 + $0x7e0] sm:$0xff] }
 0x406   :  { %v5118_v49 = vmax.f32 %v5102_v30, 0.0  ;;  %v5120_v50 = vmax.f32 %v5104_v35, 0.0  ;;  %4964 = vmatpush1.bf16.msra.mxu1 %v4224_v13  ;;  %4793 = vmatprep.subr.bf16.mxu0 %v4231_v61  ;;  %v4238_v38 = vunpack.c.l.s8.bf16 %v3758_v4  ;;  %v4247_v63 = vunpack.c.h.s8.bf16 %v3759_v24  ;;  %v3775_v13 = vld [vmem:[#allocation8 + $0x7a8] sm:$0xff]  ;;  %v3774_v61 = vld [vmem:[#allocation8 + $0x7a0] sm:$0xff]  ;;  %v3785_v24 = vld [vmem:[#allocation8 + $0x7f8] sm:$0xff] }
 0x407   :  { %v5119_v55 = vmax.f32 %v5103_v33, 0.0  ;;  %v5121_v58 = vmax.f32 %v5105_v34, 0.0  ;;  %4965 = vmatprep.subr.bf16.mxu1 %v4233_v62  ;;  %v4249_v6 = vunpack.c.h.s8.bf16 %v3761_v25  ;;  %v4248_v2 = vunpack.c.h.s8.bf16 %v3760_v39  ;;  %v3784_v30 = vld [vmem:[#allocation8 + $0x7f0] sm:$0xff]  ;;  %v5130_v34 = vld [vmem:[#allocation11 + $0x20] sm:$0xff] }
 0x408   :  { %v6529_v37 = vpack.c.bf16 %v5118_v49, %v5110_v42  ;;  %v6531_v3 = vpack.c.bf16 %v5120_v50, %v5112_v47  ;;  %v4255_v7 = vunpack.c.l.s8.bf16 %v3767_v0  ;;  %v4257_v9 = vunpack.c.l.s8.bf16 %v3769_v1  ;;  %v5126_v49 = vld [vmem:[#allocation11] sm:$0xff] }
 0x409   :  { %4794 = vmatpush1.bf16.msra.mxu0 %v4230_v31  ;;  %v6533_v48 = vpack.c.bf16 %v5119_v55, %v5111_v52  ;;  %v6535_v59 = vpack.c.bf16 %v5121_v58, %v5113_v54  ;;  %v4254_v11 = vunpack.c.l.s8.bf16 %v3766_v8  ;;  %v4256_v56 = vunpack.c.l.s8.bf16 %v3768_v10  ;;  %v5134_v4 = vld [vmem:[#allocation11 + $0x40] sm:$0xff]  ;;  %v5131_v58 = vld [vmem:[#allocation11 + $0x28] sm:$0xff] }
 0x40a   :  { %4966 = vmatpush1.bf16.msra.mxu1 %v4232_v32  ;;  %4795 = vmatprep.subr.bf16.mxu0 %v4239_v41  ;;  %v4263_v12 = vunpack.c.h.s8.bf16 %v3767_v0  ;;  %v4265_v57 = vunpack.c.h.s8.bf16 %v3769_v1  ;;  %v4262_v15 = vunpack.c.h.s8.bf16 %v3766_v8  ;;  %v4264_v16 = vunpack.c.h.s8.bf16 %v3768_v10  ;;  %v5138_v41 = vld [vmem:[#allocation11 + $0x60] sm:$0xff]  ;;  %v5127_v0 = vld [vmem:[#allocation11 + $0x8] sm:$0xff] }
 0x40b   :  { %4967 = vmatprep.subr.bf16.mxu1 %v4241_v40  ;;  %v4271_v17 = vunpack.c.l.s8.bf16 %v3775_v13  ;;  %v4273_v62 = vunpack.c.l.s8.bf16 %v3777_v14  ;;  %v4270_v19 = vunpack.c.l.s8.bf16 %v3774_v61  ;;  %v4272_v20 = vunpack.c.l.s8.bf16 %v3776_v18 }
 0x40c   :  { %v4279_v21 = vunpack.c.h.s8.bf16 %v3775_v13  ;;  %v4281_v22 = vunpack.c.h.s8.bf16 %v3777_v14  ;;  %v4278_v25 = vunpack.c.h.s8.bf16 %v3774_v61  ;;  %v4280_v26 = vunpack.c.h.s8.bf16 %v3776_v18  ;;  %v5141_v61 = vld [vmem:[#allocation11 + $0x78] sm:$0xff] }
 0x40d   :  { %4796 = vmatpush1.bf16.msra.mxu0 %v4238_v38  ;;  %v4287_v27 = vunpack.c.l.s8.bf16 %v3783_v23  ;;  %v4289_v29 = vunpack.c.l.s8.bf16 %v3785_v24  ;;  %v4286_v35 = vunpack.c.l.s8.bf16 %v3782_v28  ;;  %v4288_v31 = vunpack.c.l.s8.bf16 %v3784_v30  ;;  %v5139_v38 = vld [vmem:[#allocation11 + $0x68] sm:$0xff] }
 0x40e   :  { %4968 = vmatpush1.bf16.msra.mxu1 %v4240_v60  ;;  %4797 = vmatprep.subr.bf16.mxu0 %v4247_v63  ;;  %v4295_v32 = vunpack.c.h.s8.bf16 %v3783_v23  ;;  %v4297_v33 = vunpack.c.h.s8.bf16 %v3785_v24  ;;  %v4294_v40 = vunpack.c.h.s8.bf16 %v3782_v28  ;;  %v4296_v42 = vunpack.c.h.s8.bf16 %v3784_v30  ;;  %v5154_v28 = vld [vmem:[#allocation11 + $0xe0] sm:$0xff] }
 0x40f   :  { %4969 = vmatprep.subr.bf16.mxu1 %v4249_v6  ;;  %v5166_v47 = vunpack.c.l.s8.bf16 %v5130_v34  ;;  %v5182_v50 = vunpack.c.l.s8.bf16 %v5138_v41  ;;  %v5158_v52 = vunpack.c.l.s8.bf16 %v5126_v49  ;;  %v5174_v54 = vunpack.c.l.s8.bf16 %v5134_v4 }
 0x410   :  { %v5167_v55 = vunpack.c.h.s8.bf16 %v5130_v34  ;;  %v5183_v39 = vunpack.c.h.s8.bf16 %v5138_v41  ;;  %v5159_v60 = vunpack.c.h.s8.bf16 %v5126_v49  ;;  %v5175_v63 = vunpack.c.h.s8.bf16 %v5134_v4  ;;  %v5155_v49 = vld [vmem:[#allocation11 + $0xe8] sm:$0xff] }
 0x411   :  { %4798 = vmatpush1.bf16.msra.mxu0 %v4246_v5  ;;  %v5168_v6 = vunpack.c.l.s8.bf16 %v5131_v58  ;;  %v5184_v1 = vunpack.c.l.s8.bf16 %v5139_v38  ;;  %v5135_v5 = vld [vmem:[#allocation11 + $0x48] sm:$0xff]  ;;  %v5185_v8 = vunpack.c.h.s8.bf16 %v5139_v38  ;;  %v5161_v10 = vunpack.c.h.s8.bf16 %v5127_v0 }
 0x412   :  { %4970 = vmatpush1.bf16.msra.mxu1 %v4248_v2  ;;  %4799 = vmatprep.subr.bf16.mxu0 %v4255_v7  ;;  %v5160_v2 = vunpack.c.l.s8.bf16 %v5127_v0  ;;  %v5176_v7 = vunpack.c.l.s8.bf16 %v5135_v5 }
 0x413   :  { %4971 = vmatprep.subr.bf16.mxu1 %v4257_v9  ;;  %v5132_v9 = vld [vmem:[#allocation11 + $0x30] sm:$0xff] }
 0x415   :  { %4800 = vmatpush1.bf16.msra.mxu0 %v4254_v11  ;;  %v5177_v11 = vunpack.c.h.s8.bf16 %v5135_v5  ;;  %v5144_v5 = vld [vmem:[#allocation11 + $0x90] sm:$0xff] }
 0x416   :  { %4972 = vmatpush1.bf16.msra.mxu1 %v4256_v56  ;;  %4801 = vmatprep.subr.bf16.mxu0 %v4263_v12  ;;  %v5128_v56 = vld [vmem:[#allocation11 + $0x10] sm:$0xff] }
 0x417   :  { %4973 = vmatprep.subr.bf16.mxu1 %v4265_v57  ;;  %v5136_v57 = vld [vmem:[#allocation11 + $0x50] sm:$0xff]  ;;  %v5162_v13 = vunpack.c.l.s8.bf16 %v5128_v56 }
 0x418   :  { %v5178_v14 = vunpack.c.l.s8.bf16 %v5136_v57  ;;  %v5179_v18 = vunpack.c.h.s8.bf16 %v5136_v57 }
 0x419   :  { %4802 = vmatpush1.bf16.msra.mxu0 %v4262_v15  ;;  %v5171_v15 = vunpack.c.h.s8.bf16 %v5132_v9 }
 0x41a   :  { %4974 = vmatpush1.bf16.msra.mxu1 %v4264_v16  ;;  %4803 = vmatprep.subr.bf16.mxu0 %v4271_v17  ;;  %v5133_v17 = vld [vmem:[#allocation11 + $0x38] sm:$0xff] }
 0x41b   :  { %4975 = vmatprep.subr.bf16.mxu1 %v4273_v62  ;;  %v5163_v62 = vunpack.c.h.s8.bf16 %v5128_v56  ;;  %v5157_v56 = vld [vmem:[#allocation11 + $0xf8] sm:$0xff] }
 0x41c   :  { %v5220_v57 = vunpack.c.l.s8.bf16 %v5157_v56 }
 0x41d   :  { %4804 = vmatpush1.bf16.msra.mxu0 %v4270_v19  ;;  %v5172_v19 = vunpack.c.l.s8.bf16 %v5133_v17 }
 0x41e   :  { %4976 = vmatpush1.bf16.msra.mxu1 %v4272_v20  ;;  %4805 = vmatprep.subr.bf16.mxu0 %v4279_v21  ;;  %v5129_v20 = vld [vmem:[#allocation11 + $0x18] sm:$0xff]  ;;  %v5188_v21 = vunpack.c.l.s8.bf16 %v5141_v61 }
 0x41f   :  { %4977 = vmatprep.subr.bf16.mxu1 %v4281_v22  ;;  %v5137_v22 = vld [vmem:[#allocation11 + $0x58] sm:$0xff]  ;;  %v5164_v23 = vunpack.c.l.s8.bf16 %v5129_v20 }
 0x420   :  { %v5180_v24 = vunpack.c.l.s8.bf16 %v5137_v22  ;;  %v5181_v30 = vunpack.c.h.s8.bf16 %v5137_v22  ;;  %v5073_v22 = vrot.slane %v6499_v53, %v6440_v43 }
 0x421   :  { %4806 = vmatpush1.bf16.msra.mxu0 %v4278_v25  ;;  %v5173_v25 = vunpack.c.h.s8.bf16 %v5133_v17 }
 0x422   :  { %4978 = vmatpush1.bf16.msra.mxu1 %v4280_v26  ;;  %4807 = vmatprep.subr.bf16.mxu0 %v4287_v27  ;;  %v5189_v26 = vunpack.c.h.s8.bf16 %v5141_v61  ;;  %v5146_v27 = vld [vmem:[#allocation11 + $0xa0] sm:$0xff]  ;;  %v5221_v61 = vunpack.c.h.s8.bf16 %v5157_v56 }
 0x423   :  { %4979 = vmatprep.subr.bf16.mxu1 %v4289_v29  ;;  %v5165_v29 = vunpack.c.h.s8.bf16 %v5129_v20  ;;  %v5023_v20 = vrot.slane %v6497_v51, %v6443_v44 }
 0x425   :  { %4808 = vmatpush1.bf16.msra.mxu0 %v4286_v35  ;;  %v5198_v35 = vunpack.c.l.s8.bf16 %v5146_v27 }
 0x426   :  { %4980 = vmatpush1.bf16.msra.mxu1 %v4288_v31  ;;  %4809 = vmatprep.subr.bf16.mxu0 %v4295_v32  ;;  %v5142_v31 = vld [vmem:[#allocation11 + $0x80] sm:$0xff]  ;;  %v5214_v32 = vunpack.c.l.s8.bf16 %v5154_v28 }
 0x427   :  { %4981 = vmatprep.subr.bf16.mxu1 %v4297_v33  ;;  %v5150_v33 = vld [vmem:[#allocation11 + $0xc0] sm:$0xff]  ;;  %v5190_v34 = vunpack.c.l.s8.bf16 %v5142_v31 }
 0x428   :  { %v5206_v41 = vunpack.c.l.s8.bf16 %v5150_v33  ;;  %v5207_v4 = vunpack.c.h.s8.bf16 %v5150_v33 }
 0x429   :  { %4810 = vmatpush1.bf16.msra.mxu0 %v4294_v40  ;;  %v5199_v40 = vunpack.c.h.s8.bf16 %v5146_v27 }
 0x42a   :  { %4982 = vmatpush1.bf16.msra.mxu1 %v4296_v42  ;;  %5839 = vmatprep.subr.bf16.mxu0 %v5166_v47  ;;  %v5215_v42 = vunpack.c.h.s8.bf16 %v5154_v28  ;;  %v5147_v47 = vld [vmem:[#allocation11 + $0xa8] sm:$0xff] }
 0x42b   :  { %5861 = vmatprep.subr.bf16.mxu1 %v5182_v50  ;;  %v5191_v50 = vunpack.c.h.s8.bf16 %v5142_v31 }
 0x42c   :  { %4812 = vmatmul.mubr.bf16.vlgmr.msra.gmra.mrb[12].mxu0 %v6464_v36 }
 0x42d   :  { %4984 = vmatmul.mubr.bf16.vlgmr.msra.gmra.mrb[12].mxu1 %v6464_v36  ;;  %5840 = vmatpush3.bf16.msra.mxu0 %v5158_v52  ;;  %v5169_v36 = vunpack.c.h.s8.bf16 %v5131_v58  ;;  %v5200_v52 = vunpack.c.l.s8.bf16 %v5147_v47  ;;  %v5151_v58 = vld [vmem:[#allocation11 + $0xc8] sm:$0xff] }
 0x42e   :  { %5262 = vmatprep.mubr.bf16.mxu0 %v6533_v48  ;;  %5862 = vmatpush3.bf16.msra.mxu1 %v5174_v54  ;;  %v5140_v48 = vld [vmem:[#allocation11 + $0x70] sm:$0xff]  ;;  %v5143_v54 = vld [vmem:[#allocation11 + $0x88] sm:$0xff]  ;;  %v5208_v38 = vunpack.c.l.s8.bf16 %v5151_v58  ;;  %v5209_v0 = vunpack.c.h.s8.bf16 %v5151_v58 }
 0x42f   :  { %5303 = vmatprep.mubr.bf16.mxu1 %v6535_v59  ;;  %5841 = vmatprep.subr.bf16.mxu0 %v5167_v55  ;;  %v5170_v59 = vunpack.c.l.s8.bf16 %v5132_v9  ;;  %v5186_v12 = vunpack.c.l.s8.bf16 %v5140_v48  ;;  %v5187_v16 = vunpack.c.h.s8.bf16 %v5140_v48  ;;  %v5216_v55 = vunpack.c.l.s8.bf16 %v5155_v49 }
 0x430   :  { %5863 = vmatprep.subr.bf16.mxu1 %v5183_v39  ;;  %v5192_v39 = vunpack.c.l.s8.bf16 %v5143_v54 }
 0x431   :  { %5842 = vmatpush3.bf16.msra.mxu0 %v5159_v60  ;;  %v5201_v60 = vunpack.c.h.s8.bf16 %v5147_v47 }
 0x432   :  { %5864 = vmatpush3.bf16.msra.mxu1 %v5175_v63  ;;  %5843 = vmatprep.subr.bf16.mxu0 %v5168_v6  ;;  %v5148_v63 = vld [vmem:[#allocation11 + $0xb0] sm:$0xff]  ;;  %v5193_v6 = vunpack.c.h.s8.bf16 %v5143_v54 }
 0x433   :  { %5865 = vmatprep.subr.bf16.mxu1 %v5184_v1  ;;  %v5202_v1 = vunpack.c.l.s8.bf16 %v5148_v63  ;;  %v5203_v9 = vunpack.c.h.s8.bf16 %v5148_v63 }
 0x435   :  { %5844 = vmatpush3.bf16.msra.mxu0 %v5160_v2 }
 0x436   :  { %5866 = vmatpush3.bf16.msra.mxu1 %v5176_v7  ;;  %5845 = vmatprep.subr.bf16.mxu0 %v5169_v36  ;;  %v5152_v7 = vld [vmem:[#allocation11 + $0xd0] sm:$0xff]  ;;  %v5194_v36 = vunpack.c.l.s8.bf16 %v5144_v5 }
 0x437   :  { %5867 = vmatprep.subr.bf16.mxu1 %v5185_v8  ;;  %v5210_v8 = vunpack.c.l.s8.bf16 %v5152_v7 }
 0x439   :  { %5846 = vmatpush3.bf16.msra.mxu0 %v5161_v10  ;;  %v5195_v10 = vunpack.c.h.s8.bf16 %v5144_v5 }
 0x43a   :  { %5868 = vmatpush3.bf16.msra.mxu1 %v5177_v11  ;;  %5847 = vmatprep.subr.bf16.mxu0 %v5170_v59  ;;  %v5211_v11 = vunpack.c.h.s8.bf16 %v5152_v7  ;;  %v5149_v59 = vld [vmem:[#allocation11 + $0xb8] sm:$0xff] }
 0x43b   :  { %5869 = vmatprep.subr.bf16.mxu1 %v5186_v12  ;;  %v5204_v12 = vunpack.c.l.s8.bf16 %v5149_v59  ;;  %v5205_v17 = vunpack.c.h.s8.bf16 %v5149_v59 }
 0x43d   :  { %5848 = vmatpush3.bf16.msra.mxu0 %v5162_v13  ;;  %v5145_v13 = vld [vmem:[#allocation11 + $0x98] sm:$0xff] }
 0x43e   :  { %5870 = vmatpush3.bf16.msra.mxu1 %v5178_v14  ;;  %5849 = vmatprep.subr.bf16.mxu0 %v5171_v15  ;;  %v5153_v14 = vld [vmem:[#allocation11 + $0xd8] sm:$0xff]  ;;  %v5196_v15 = vunpack.c.l.s8.bf16 %v5145_v13 }
 0x43f   :  { %5871 = vmatprep.subr.bf16.mxu1 %v5187_v16  ;;  %v5212_v16 = vunpack.c.l.s8.bf16 %v5153_v14 }
 0x441   :  { %5850 = vmatpush3.bf16.msra.mxu0 %v5163_v62  ;;  %v5197_v62 = vunpack.c.h.s8.bf16 %v5145_v13 }
 0x442   :  { %5872 = vmatpush3.bf16.msra.mxu1 %v5179_v18  ;;  %5851 = vmatprep.subr.bf16.mxu0 %v5172_v19  ;;  %v5213_v18 = vunpack.c.h.s8.bf16 %v5153_v14  ;;  %v5015_v19 = vrot.slane %v6497_v51, %v6440_v43 }
 0x443   :  { %5873 = vmatprep.subr.bf16.mxu1 %v5188_v21  ;;  %v5019_v21 = vrot.slane %v6497_v51, %v6446_v45 }
 0x445   :  { %5852 = vmatpush3.bf16.msra.mxu0 %v5164_v23  ;;  %v5027_v23 = vrot.slane %v6497_v51, %v6449_v46 }
 0x446   :  { %5874 = vmatpush3.bf16.msra.mxu1 %v5180_v24  ;;  %5853 = vmatprep.subr.bf16.mxu0 %v5173_v25  ;;  %v5081_v25 = vrot.slane %v6499_v53, %v6443_v44 }
 0x447   :  { %5875 = vmatprep.subr.bf16.mxu1 %v5189_v26  ;;  %v5077_v26 = vrot.slane %v6499_v53, %v6446_v45 }
 0x449   :  { %5854 = vmatpush3.bf16.msra.mxu0 %v5165_v29 }
 0x44a   :  { %5876 = vmatpush3.bf16.msra.mxu1 %v5181_v30  ;;  %5883 = vmatprep.subr.bf16.mxu0 %v5198_v35  ;;  %v5085_v30 = vrot.slane %v6499_v53, %v6449_v46 }
 0x44b   :  { %5905 = vmatprep.subr.bf16.mxu1 %v5214_v32 }
 0x44c   :  { %5263 = vmatmul.mubr.bf16.vlgmr.msra.gmra.mrb[16].mxu0 %v6529_v37  ;;  %v5217_v37 = vunpack.c.h.s8.bf16 %v5155_v49 }
 0x44d   :  { %5304 = vmatmul.mubr.bf16.vlgmr.msra.gmra.mrb[16].mxu1 %v6531_v3  ;;  %5884 = vmatpush3.bf16.msra.mxu0 %v5190_v34  ;;  %v5156_v3 = vld [vmem:[#allocation11 + $0xf0] sm:$0xff] }
 0x44e   :  { %5906 = vmatpush3.bf16.msra.mxu1 %v5206_v41  ;;  %5885 = vmatprep.subr.bf16.mxu0 %v5199_v40  ;;  %v5218_v2 = vunpack.c.l.s8.bf16 %v5156_v3  ;;  %v5219_v48 = vunpack.c.h.s8.bf16 %v5156_v3 }
 0x44f   :  { %5907 = vmatprep.subr.bf16.mxu1 %v5215_v42 }
 0x451   :  { %5886 = vmatpush3.bf16.msra.mxu0 %v5191_v50 }
 0x452   :  { %5908 = vmatpush3.bf16.msra.mxu1 %v5207_v4  ;;  %5887 = vmatprep.subr.bf16.mxu0 %v5200_v52 }
 0x453   :  { %5909 = vmatprep.subr.bf16.mxu1 %v5216_v55 }
 0x455   :  { %5888 = vmatpush3.bf16.msra.mxu0 %v5192_v39 }
 0x456   :  { %5910 = vmatpush3.bf16.msra.mxu1 %v5208_v38  ;;  %5889 = vmatprep.subr.bf16.mxu0 %v5201_v60 }
 0x457   :  { %5911 = vmatprep.subr.bf16.mxu1 %v5217_v37 }
 0x459   :  { %5890 = vmatpush3.bf16.msra.mxu0 %v5193_v6 }
 0x45a   :  { %5912 = vmatpush3.bf16.msra.mxu1 %v5209_v0  ;;  %5891 = vmatprep.subr.bf16.mxu0 %v5202_v1 }
 0x45b   :  { %5913 = vmatprep.subr.bf16.mxu1 %v5218_v2 }
 0x45d   :  { %5892 = vmatpush3.bf16.msra.mxu0 %v5194_v36 }
 0x45e   :  { %5914 = vmatpush3.bf16.msra.mxu1 %v5210_v8  ;;  %5893 = vmatprep.subr.bf16.mxu0 %v5203_v9 }
 0x45f   :  { %5915 = vmatprep.subr.bf16.mxu1 %v5219_v48 }
 0x461   :  { %5894 = vmatpush3.bf16.msra.mxu0 %v5195_v10 }
 0x462   :  { %5916 = vmatpush3.bf16.msra.mxu1 %v5211_v11  ;;  %5895 = vmatprep.subr.bf16.mxu0 %v5204_v12 }
 0x463   :  { %5917 = vmatprep.subr.bf16.mxu1 %v5220_v57 }
 0x465   :  { %5896 = vmatpush3.bf16.msra.mxu0 %v5196_v15 }
 0x466   :  { %5918 = vmatpush3.bf16.msra.mxu1 %v5212_v16  ;;  %5897 = vmatprep.subr.bf16.mxu0 %v5205_v17 }
 0x467   :  { %5919 = vmatprep.subr.bf16.mxu1 %v5221_v61 }
 0x469   :  { %5898 = vmatpush3.bf16.msra.mxu0 %v5197_v62 }
 0x46a   :  { %5920 = vmatpush3.bf16.msra.mxu1 %v5213_v18 }
 0x4ff   :  { %v4813_v24 = vpop.f32.mrb[12].mxu0 }
 0x500   :  { %v5040_v27 = vmul.f32 %v5015_v19, %v4813_v24  ;;  %v4985_v28 = vpop.f32.mrb[12].mxu1  ;;  %v4815_v29 = vpop.f32.mrb[13].mxu0 }
 0x501   :  { %v5042_v35 = vmul.f32 %v5023_v20, %v4985_v28  ;;  %v5041_v31 = vmul.f32 %v5019_v21, %v4815_v29  ;;  %v4987_v32 = vpop.f32.mrb[13].mxu1  ;;  %v4817_v43 = vpop.f32.mrb[14].mxu0  ;;  %v5838_v29 = vld [vmem:[%s6589_s9] ss:$0 sm:$0xff] }
 0x502   :  { %v5098_v33 = vadd.f32 %v5073_v22, %v5040_v27  ;;  %v5043_v34 = vmul.f32 %v5027_v23, %v4987_v32  ;;  %v5048_v51 = vmul.f32 %v5015_v19, %v4817_v43  ;;  %v4989_v41 = vpop.f32.mrb[14].mxu1  ;;  %v4819_v40 = vpop.f32.mrb[15].mxu0 }
 0x503   :  { %v5100_v42 = vadd.f32 %v5081_v25, %v5042_v35  ;;  %v5099_v44 = vadd.f32 %v5077_v26, %v5041_v31  ;;  %v5050_v47 = vmul.f32 %v5023_v20, %v4989_v41  ;;  %v5049_v49 = vmul.f32 %v5019_v21, %v4819_v40  ;;  %v4991_v45 = vpop.f32.mrb[15].mxu1 }
 0x504   :  { %v5101_v50 = vadd.f32 %v5085_v30, %v5043_v34  ;;  %v5106_v4 = vadd.f32 %v5073_v22, %v5048_v51  ;;  %v5051_v52 = vmul.f32 %v5027_v23, %v4991_v45  ;;  %v5114_v46 = vmax.f32 %v5098_v33, 0.0 }
 0x505   :  { %v5108_v54 = vadd.f32 %v5081_v25, %v5050_v47  ;;  %v5107_v55 = vadd.f32 %v5077_v26, %v5049_v49  ;;  %v5116_v39 = vmax.f32 %v5100_v42, 0.0  ;;  %v5115_v38 = vmax.f32 %v5099_v44, 0.0  ;;  %v5837_v25 = vld [vmem:[%s6588_s8] ss:$0 sm:$0xff] }
 0x506   :  { %v5122_v53 = vmax.f32 %v5106_v4, 0.0  ;;  %v5109_v58 = vadd.f32 %v5085_v30, %v5051_v52  ;;  %v5117_v63 = vmax.f32 %v5101_v50, 0.0 }
 0x507   :  { %v5124_v60 = vmax.f32 %v5108_v54, 0.0  ;;  %v5123_v37 = vmax.f32 %v5107_v55, 0.0 }
 0x508   :  { %v5226_v3 = vpack.c.bf16 %v5122_v53, %v5114_v46  ;;  %v5125_v6 = vmax.f32 %v5109_v58, 0.0 }
 0x509   :  { %v5228_v0 = vpack.c.bf16 %v5124_v60, %v5116_v39  ;;  %v5227_v1 = vpack.c.bf16 %v5123_v37, %v5115_v38 }
 0x50a   :  { %v5229_v5 = vpack.c.bf16 %v5125_v6, %v5117_v63 }
 0x50b   :  { %5344 = vmatprep.mubr.bf16.mxu0 %v5227_v1 }
 0x50c   :  { %5385 = vmatprep.mubr.bf16.mxu1 %v5229_v5  ;;  %5345 = vmatmul.mubr.bf16.vlgmr.msra.gmra.mrb[20].mxu0 %v5226_v3 }
 0x50d   :  { %5386 = vmatmul.mubr.bf16.vlgmr.msra.gmra.mrb[20].mxu1 %v5228_v0 }
 0x51f   :  { %v5855_v2 = vpop.f32.mrb[16].mxu0 }
 0x520   :  { %v5877_v7 = vpop.f32.mrb[16].mxu1  ;;  %v5856_v36 = vpop.f32.mrb[17].mxu0 }
 0x521   :  { %v5857_v8 = vadd.f32 %v5856_v36, %v5855_v2  ;;  %v5878_v9 = vpop.f32.mrb[17].mxu1  ;;  %v5858_v48 = vpop.f32.mrb[18].mxu0 }
 0x522   :  { %v5879_v10 = vadd.f32 %v5878_v9, %v5877_v7  ;;  %v5880_v11 = vpop.f32.mrb[18].mxu1  ;;  %v5859_v59 = vpop.f32.mrb[19].mxu0 }
 0x523   :  { %v5860_v56 = vadd.f32 %v5859_v59, %v5858_v48  ;;  %v5881_v12 = vpop.f32.mrb[19].mxu1 }
 0x524   :  { %v5306_v57 = vadd.f32 %v5879_v10, %v5857_v8  ;;  %v5882_v13 = vadd.f32 %v5881_v12, %v5880_v11 }
 0x526   :  { %v5309_v14 = vadd.f32 %v5882_v13, %v5860_v56 }
 0x5df   :  { %v5899_v15 = vpop.f32.mrb[20].mxu0 }
 0x5e0   :  { %v5921_v16 = vpop.f32.mrb[20].mxu1  ;;  %v5900_v17 = vpop.f32.mrb[21].mxu0 }
 0x5e1   :  { %v5901_v61 = vadd.f32 %v5900_v17, %v5899_v15  ;;  %v5922_v62 = vpop.f32.mrb[21].mxu1  ;;  %v5902_v18 = vpop.f32.mrb[22].mxu0 }
 0x5e2   :  { %v5923_v19 = vadd.f32 %v5922_v62, %v5921_v16  ;;  %v5924_v20 = vpop.f32.mrb[22].mxu1  ;;  %v5903_v21 = vpop.f32.mrb[23].mxu0 }
 0x5e3   :  { %v5347_v22 = vadd.f32 %v5901_v61, %v5306_v57  ;;  %v5904_v23 = vadd.f32 %v5903_v21, %v5902_v18  ;;  %v5925_v24 = vpop.f32.mrb[23].mxu1 }
 0x5e4   :  { %v5926_v26 = vadd.f32 %v5925_v24, %v5924_v20 }
 0x5e5   :  { %v5388_v27 = vadd.f32 %v5923_v19, %v5347_v22  ;;  %v5350_v28 = vadd.f32 %v5904_v23, %v5309_v14 }
 0x5e7   :  { %v5401_v30 = vmul.f32 %v5837_v25, %v5388_v27  ;;  %v5391_v35 = vadd.f32 %v5926_v26, %v5350_v28 }
 0x5e9   :  { %v5402_v31 = vmul.f32 %v5837_v25, %v5391_v35  ;;  %v5410_v32 = vadd.f32 %v5838_v29, %v5401_v30 }
 0x5eb   :  { %v5411_v43 = vadd.f32 %v5838_v29, %v5402_v31  ;;  %5412 = vst [vmem:[#allocation13] sm:$0xff] %v5410_v32 }
 0x5ed   :  { %5413 = vst [vmem:[#allocation13 + $0x8] sm:$0xff] %v5411_v43 }
 0x5ee   :  { %6201 = shalt.err (!%p6198_p10)
}
 0x5ef   :  { %s6202_s9 = scalar_lea.hbm %s6590_s10, 256 }
 0x5f0   :  { %p6203_p11 = scmp.ne.s32.totalorder %s6590_s10, %s6202_s9  ;;  %p6206_p12 = scmp.lt.u32.totalorder %s6202_s9, %s6590_s10 }
 0x5f2   :  { %p6208_p13 = pnand %p6206_p12, %p6203_p11 }
 0x5f4   :  { %6211 = shalt.err (!%p6208_p13)
}
 0x5f5   :  { %5425 = dma.vmem_to_hbm [thread:$0]  %s5420_s11, 256, %s6590_s10, [#allocation4], %s6234_s6, %s6234_s6, %s6235_s17  }
 0x5f6   :  { %6220 = dma.done.wait [#allocation4], 256  }
 0x5f7   :  { %6221 = vsyncadd [#allocation4], 4294967040 }
 0x5f8   :  { %5429 = vsyncpa [#allocation3], 1 }
 0x5f9   :  { %5430 = vsyncpa [#allocation6], 1 }
 0x5fa   :  { %5431 = vsyncpa [#allocation9], 1 }
 0x5fb   :  { %5432 = vsyncpa [#allocation12], 1 }
 0x5fc   :  { %5433 = vsyncpa [#allocation4], 1 }

</bundles_post_ra>
